<compile_context>
chip_gen: v7x
topology: tpu7x:2x2x1
jax: 0.10.0
libtpu: 0.0.40
codegen_flags: <defaults>
</compile_context>

<pallas_src>
import functools

import jax
import jax.numpy as jnp
from jax.experimental import pallas as pl
from jax.experimental.pallas import tpu as pltpu


# ----------------------------------------------------------------------------
# Wrapper-side precomputation helpers
# ----------------------------------------------------------------------------
def _round_up(x, m):
    return ((x + m - 1) // m) * m


def _pick_samples_per_step(n, s, c_max, slab_budget_bytes=8 << 20):
    """Largest Nb dividing n that keeps >=2 grid steps (when n > 1) and keeps
    the im2col scratch slab within budget (VMEM headroom incl. v7x 64 MiB)."""
    best = 1
    upper = n if n == 1 else n // 2
    for nb in range(1, upper + 1):
        if n % nb == 0 and 27 * c_max * nb * s * 4 <= slab_budget_bytes:
            best = nb
    return best


def _mask_table(D, H, W):
    """(27, S) f32 validity masks for the 3x3x3 'SAME' taps (tap-major order)."""
    S = D * H * W
    pos = jnp.arange(S, dtype=jnp.int32)
    w_i = pos % W
    h_i = (pos // W) % H
    d_i = pos // (W * H)
    rows = []
    for kd in (-1, 0, 1):
        for kh in (-1, 0, 1):
            for kw in (-1, 0, 1):
                valid = ((d_i + kd >= 0) & (d_i + kd < D) &
                         (h_i + kh >= 0) & (h_i + kh < H) &
                         (w_i + kw >= 0) & (w_i + kw < W))
                rows.append(valid)
    return jnp.stack(rows).astype(jnp.float32)


def _conv_mat(w, cin_p, cout_p):
    """(3,3,3,Ci,Co) DHWIO weights -> (cout_p, 27*cin_p); tap-major /
    channel-minor columns, zero-padded to sublane-aligned channel counts."""
    ci, co = w.shape[3], w.shape[4]
    w = jnp.pad(w, ((0, 0), (0, 0), (0, 0), (0, cin_p - ci), (0, cout_p - co)))
    return jnp.transpose(w.reshape(27, cin_p, cout_p), (2, 0, 1)).reshape(
        cout_p, 27 * cin_p)


# ----------------------------------------------------------------------------
# In-kernel helpers (operate on packed (C, L) slabs, L = Nb * S)
# ----------------------------------------------------------------------------
def _build_taps(x, masks_ref, slab_ref, c, H, W, L):
    """Stream the 27-tap im2col slab of the packed (c, L) activation into
    slab_ref rows [t*c, (t+1)*c).  Each tap is one XLU lane roll of the whole
    slab; the precomputed mask row zeroes both genuine zero-padding lanes and
    lanes that wrapped across a packed-sample boundary."""
    hw = H * W
    t = 0
    for kd in (-1, 0, 1):
        for kh in (-1, 0, 1):
            for kw in (-1, 0, 1):
                if kd == 0 and kh == 0 and kw == 0:
                    tap = x                               # centre tap: identity
                else:
                    off = kd * hw + kh * W + kw
                    tap = pltpu.roll(x, (-off) % L, axis=1)
                    tap = tap * masks_ref[pl.ds(t, 1), :]
                slab_ref[pl.ds(t * c, c), :] = tap        # 8-sublane aligned
                t += 1


def _inorm_relu_store(h, gamma, beta, out_ref, S, Nb, *, residual=None,
                      eps=1e-5):
    """Per-sample InstanceNorm (fused one-pass sum / sum-sq stats) + affine,
    optional residual add, ReLU; stored segment-by-segment (lane-dense)."""
    inv_s = 1.0 / S
    for n in range(Nb):
        lo = n * S
        seg = h[:, lo:lo + S]
        s1 = jnp.sum(seg, axis=1, keepdims=True) * inv_s            # mean
        s2 = jnp.sum(seg * seg, axis=1, keepdims=True) * inv_s      # E[x^2]
        rstd = jax.lax.rsqrt(s2 - s1 * s1 + eps)
        y = (seg - s1) * rstd * gamma + beta
        if residual is not None:
            y = y + residual[:, lo:lo + S]
        out_ref[:, pl.ds(lo, S)] = jnp.maximum(y, 0.0)


# ----------------------------------------------------------------------------
# Fused ConvBuildingBlock kernel: one grid step per packed batch chunk
# ----------------------------------------------------------------------------
def _block_kernel(x_ref, masks_ref, w1_ref, w2_ref, ws_ref, pp_ref, o_ref,
                  slab_ref, hn_ref, *, H, W, S, Nb, cin, cout):
    L = Nb * S
    x = x_ref[...]                                   # (cin, L) packed input

    pp = pp_ref[...]                                 # (cout, 8) packed params
    g1, b1 = pp[:, 0:1], pp[:, 1:2]
    g2, b2 = pp[:, 2:3], pp[:, 3:4]
    bs = pp[:, 4:5]

    # conv1: 3x3x3 as a single deep-K MXU matmul over the scratch im2col slab.
    _build_taps(x, masks_ref, slab_ref, cin, H, W, L)
    h = jnp.dot(w1_ref[...], slab_ref[pl.ds(0, 27 * cin), :],
                preferred_element_type=jnp.float32)  # (cout, L)

    # IN1 + ReLU -> VMEM scratch (packed slab needed for conv2's rolls).
    _inorm_relu_store(h, g1, b1, hn_ref, S, Nb)

    # conv2 on the normalized activations.
    _build_taps(hn_ref[...], masks_ref, slab_ref, cout, H, W, L)
    h2 = jnp.dot(w2_ref[...], slab_ref[pl.ds(0, 27 * cout), :],
                 preferred_element_type=jnp.float32)  # (cout, L)

    # 1x1x1 shortcut (with bias) on the raw input.
    sc = jnp.dot(ws_ref[...], x, preferred_element_type=jnp.float32) + bs

    # IN2 + residual add + ReLU, stored lane-dense into the output block.
    _inorm_relu_store(h2, g2, b2, o_ref, S, Nb, residual=sc)


def conv_building_block(x_ncdhw, params, samples_per_step=None):
    """x_ncdhw: (N, Cin, D, H, W) f32. Returns (N, Cout, D, H, W) f32."""
    N, Cin, D, H, W = x_ncdhw.shape
    Cout = params["w1"].shape[-1]
    S = D * H * W                          # per-sample lane count (mult of 128)

    cin_p = _round_up(Cin, 8)              # sublane-align the im2col chunks
    cout_p = _round_up(Cout, 8)
    c_max = max(cin_p, cout_p)

    if samples_per_step is None:
        samples_per_step = _pick_samples_per_step(N, S, c_max)
    Nb = samples_per_step
    assert N % Nb == 0, (N, Nb)
    G = N // Nb
    L = Nb * S                             # packed lane width per grid step

    # Activations: (N, Cin, S) -> (cin_p, N*S), samples contiguous along lanes.
    x_flat = jnp.pad(x_ncdhw.reshape(N, Cin, S),
                     ((0, 0), (0, cin_p - Cin), (0, 0)))
    x_pack = jnp.transpose(x_flat, (1, 0, 2)).reshape(cin_p, N * S)

    # Weights (tap-major / channel-minor columns), channel-padded.
    w1m = _conv_mat(params["w1"], cin_p, cout_p)      # (cout_p, 27*cin_p)
    w2m = _conv_mat(params["w2"], cout_p, cout_p)     # (cout_p, 27*cout_p)
    wsm = jnp.pad(params["ws"],
                  ((0, cin_p - Cin), (0, cout_p - Cout))).T   # (cout_p, cin_p)

    # Packed per-channel parameters: columns = [g1, b1, g2, b2, bs, 0, 0, 0].
    pp = jnp.zeros((cout_p, 8), jnp.float32)
    for col, key in enumerate(("g1", "b1", "g2", "b2", "bs")):
        pp = pp.at[:Cout, col].set(params[key])

    # Precomputed boundary-mask table, tiled per packed sample.
    masks = jnp.tile(_mask_table(D, H, W), (1, Nb))   # (27, L)

    kern = functools.partial(_block_kernel, H=H, W=W, S=S, Nb=Nb,
                             cin=cin_p, cout=cout_p)
    out_pack = pl.pallas_call(
        kern,
        out_shape=jax.ShapeDtypeStruct((cout_p, N * S), jnp.float32),
        grid=(G,),
        in_specs=[
            pl.BlockSpec((cin_p, L), lambda g: (0, g)),           # x (packed)
            pl.BlockSpec((27, L), lambda g: (0, 0)),              # mask table
            pl.BlockSpec((cout_p, 27 * cin_p), lambda g: (0, 0)),  # w1
            pl.BlockSpec((cout_p, 27 * cout_p), lambda g: (0, 0)), # w2
            pl.BlockSpec((cout_p, cin_p), lambda g: (0, 0)),       # shortcut w
            pl.BlockSpec((cout_p, 8), lambda g: (0, 0)),           # packed g/b
        ],
        out_specs=pl.BlockSpec((cout_p, L), lambda g: (0, g)),
        scratch_shapes=[
            pltpu.VMEM((27 * c_max, L), jnp.float32),   # im2col tap slab
            pltpu.VMEM((cout_p, L), jnp.float32),       # IN1+ReLU activations
        ],
        compiler_params=pltpu.CompilerParams(
            dimension_semantics=("parallel",),          # >=2 steps feed 2 TCs
            vmem_limit_bytes=32 * 1024 * 1024),
    )(x_pack, masks, w1m, w2m, wsm, pp)

    out = jnp.transpose(out_pack.reshape(cout_p, N, S), (1, 0, 2))
    return out[:, :Cout].reshape(N, Cout, D, H, W)


# ----------------------------------------------------------------------------
# Pure-JAX reference for the correctness check
# ----------------------------------------------------------------------------
def ref_forward(x_ncdhw, params, eps=1e-5):
    x = jnp.transpose(x_ncdhw, (0, 2, 3, 4, 1))   # NCDHW -> NDHWC

    def conv(a, w):
        return jax.lax.conv_general_dilated(
            a, w, window_strides=(1, 1, 1), padding="SAME",
            dimension_numbers=("NDHWC", "DHWIO", "NDHWC"))

    def inorm(a, g, b):
        m = jnp.mean(a, axis=(1, 2, 3), keepdims=True)
        v = jnp.mean((a - m) ** 2, axis=(1, 2, 3), keepdims=True)
        return (a - m) * jax.lax.rsqrt(v + eps) * g + b

    h = conv(x, params["w1"])
    h = jnp.maximum(inorm(h, params["g1"], params["b1"]), 0.0)
    h = conv(h, params["w2"])
    h = inorm(h, params["g2"], params["b2"])
    sc = jnp.einsum("ndhwc,co->ndhwo", x, params["ws"]) + params["bs"]
    out = jnp.maximum(h + sc, 0.0)
    return jnp.transpose(out, (0, 4, 1, 2, 3))    # NDHWC -> NCDHW


if __name__ == "__main__":
    # S = 512 (lane-dense); Nb = 2 samples packed per step -> grid = (2,)
    N, Cin, Cout, D, H, W = 4, 4, 8, 8, 8, 8

    ks = jax.random.split(jax.random.PRNGKey(0), 9)
    params = {
        "w1": 0.1 * jax.random.normal(ks[0], (3, 3, 3, Cin, Cout), jnp.float32),
        "g1": 1.0 + 0.1 * jax.random.normal(ks[1], (Cout,), jnp.float32),
        "b1": 0.1 * jax.random.normal(ks[2], (Cout,), jnp.float32),
        "w2": 0.1 * jax.random.normal(ks[3], (3, 3, 3, Cout, Cout), jnp.float32),
        "g2": 1.0 + 0.1 * jax.random.normal(ks[4], (Cout,), jnp.float32),
        "b2": 0.1 * jax.random.normal(ks[5], (Cout,), jnp.float32),
        "ws": 0.1 * jax.random.normal(ks[6], (Cin, Cout), jnp.float32),
        "bs": 0.1 * jax.random.normal(ks[7], (Cout,), jnp.float32),
    }
    x = jax.random.normal(ks[8], (N, Cin, D, H, W), jnp.float32)

    out = jax.block_until_ready(conv_building_block(x, params))
    ref = jax.block_until_ready(ref_forward(x, params))

    assert out.shape == (N, Cout, D, H, W), out.shape
    assert jnp.allclose(out, ref, atol=2e-3, rtol=2e-3), \
        float(jnp.max(jnp.abs(out - ref)))
    print("KERNEL_OK")
</pallas_src>

<mosaic_0001>
module attributes {stable_mosaic.version = 11 : i64} {
  func.func @_block_kernel(%arg0: i32, %arg1: memref<8x1024xf32, #tpu.memory_space<vmem>>, %arg2: memref<27x1024xf32, #tpu.memory_space<vmem>>, %arg3: memref<8x216xf32, #tpu.memory_space<vmem>>, %arg4: memref<8x216xf32, #tpu.memory_space<vmem>>, %arg5: memref<8x8xf32, #tpu.memory_space<vmem>>, %arg6: memref<8x8xf32, #tpu.memory_space<vmem>>, %arg7: memref<8x1024xf32, #tpu.memory_space<vmem>>, %arg8: memref<216x1024xf32, #tpu.memory_space<vmem>>, %arg9: memref<8x1024xf32, #tpu.memory_space<vmem>>) attributes {dimension_semantics = [#tpu.dimension_semantics<parallel>], iteration_bounds = array<i64: 2>, scalar_prefetch = 0 : i64, scratch_operands = 2 : i64, tpu.core_type = #tpu.core_type<tc>, window_params = [{transform_indices = @transform_0, window_bounds = array<i64: 8, 1024>}, {pipeline_mode = #tpu.pipeline_mode<synchronous>, transform_indices = @transform_1, window_bounds = array<i64: 27, 1024>}, {pipeline_mode = #tpu.pipeline_mode<synchronous>, transform_indices = @transform_2, window_bounds = array<i64: 8, 216>}, {pipeline_mode = #tpu.pipeline_mode<synchronous>, transform_indices = @transform_3, window_bounds = array<i64: 8, 216>}, {pipeline_mode = #tpu.pipeline_mode<synchronous>, transform_indices = @transform_4, window_bounds = array<i64: 8, 8>}, {pipeline_mode = #tpu.pipeline_mode<synchronous>, transform_indices = @transform_5, window_bounds = array<i64: 8, 8>}, {transform_indices = @transform_6, window_bounds = array<i64: 8, 1024>}]} {
    %c0 = arith.constant 0 : index
    %c0_0 = arith.constant 0 : index
    %0 = vector.load %arg1[%c0, %c0_0] : memref<8x1024xf32, #tpu.memory_space<vmem>>, vector<8x1024xf32>
    %c0_1 = arith.constant 0 : index
    %c0_2 = arith.constant 0 : index
    %1 = vector.load %arg6[%c0_1, %c0_2] : memref<8x8xf32, #tpu.memory_space<vmem>>, vector<8x8xf32>
    %2 = vector.extract_strided_slice %1 {offsets = [0, 0], sizes = [8, 1], strides = [1, 1]} : vector<8x8xf32> to vector<8x1xf32>
    %3 = vector.extract_strided_slice %1 {offsets = [0, 1], sizes = [8, 1], strides = [1, 1]} : vector<8x8xf32> to vector<8x1xf32>
    %4 = vector.extract_strided_slice %1 {offsets = [0, 2], sizes = [8, 1], strides = [1, 1]} : vector<8x8xf32> to vector<8x1xf32>
    %5 = vector.extract_strided_slice %1 {offsets = [0, 3], sizes = [8, 1], strides = [1, 1]} : vector<8x8xf32> to vector<8x1xf32>
    %6 = vector.extract_strided_slice %1 {offsets = [0, 4], sizes = [8, 1], strides = [1, 1]} : vector<8x8xf32> to vector<8x1xf32>
    %c73_i32 = arith.constant 73 : i32
    %7 = tpu.dynamic_rotate %0 by %c73_i32 dim 1 : vector<8x1024xf32>, i32 -> vector<8x1024xf32>
    %c0_3 = arith.constant 0 : index
    %c0_4 = arith.constant 0 : index
    %8 = vector.load %arg2[%c0_3, %c0_4] : memref<27x1024xf32, #tpu.memory_space<vmem>>, vector<1x1024xf32>
    %9 = vector.broadcast %8 : vector<1x1024xf32> to vector<8x1024xf32>
    %10 = arith.mulf %7, %9 : vector<8x1024xf32>
    %c0_5 = arith.constant 0 : index
    %c0_6 = arith.constant 0 : index
    %11 = vector.load %arg8[%c0_5, %c0_6] : memref<216x1024xf32, #tpu.memory_space<vmem>>, vector<8x1024xf32>
    tpu.vector_store %arg8[%c0_5, %c0_6], %10 {strides = array<i32>} : memref<216x1024xf32, #tpu.memory_space<vmem>>, vector<8x1024xf32>,
    %c72_i32 = arith.constant 72 : i32
    %12 = tpu.dynamic_rotate %0 by %c72_i32 dim 1 : vector<8x1024xf32>, i32 -> vector<8x1024xf32>
    %c1 = arith.constant 1 : index
    %c0_7 = arith.constant 0 : index
    %13 = vector.load %arg2[%c1, %c0_7] : memref<27x1024xf32, #tpu.memory_space<vmem>>, vector<1x1024xf32>
    %14 = vector.broadcast %13 : vector<1x1024xf32> to vector<8x1024xf32>
    %15 = arith.mulf %12, %14 : vector<8x1024xf32>
    %c8 = arith.constant 8 : index
    %c0_8 = arith.constant 0 : index
    %16 = vector.load %arg8[%c8, %c0_8] : memref<216x1024xf32, #tpu.memory_space<vmem>>, vector<8x1024xf32>
    tpu.vector_store %arg8[%c8, %c0_8], %15 {strides = array<i32>} : memref<216x1024xf32, #tpu.memory_space<vmem>>, vector<8x1024xf32>,
    %c71_i32 = arith.constant 71 : i32
    %17 = tpu.dynamic_rotate %0 by %c71_i32 dim 1 : vector<8x1024xf32>, i32 -> vector<8x1024xf32>
    %c2 = arith.constant 2 : index
    %c0_9 = arith.constant 0 : index
    %18 = vector.load %arg2[%c2, %c0_9] : memref<27x1024xf32, #tpu.memory_space<vmem>>, vector<1x1024xf32>
    %19 = vector.broadcast %18 : vector<1x1024xf32> to vector<8x1024xf32>
    %20 = arith.mulf %17, %19 : vector<8x1024xf32>
    %c16 = arith.constant 16 : index
    %c0_10 = arith.constant 0 : index
    %21 = vector.load %arg8[%c16, %c0_10] : memref<216x1024xf32, #tpu.memory_space<vmem>>, vector<8x1024xf32>
    tpu.vector_store %arg8[%c16, %c0_10], %20 {strides = array<i32>} : memref<216x1024xf32, #tpu.memory_space<vmem>>, vector<8x1024xf32>,
    %c65_i32 = arith.constant 65 : i32
    %22 = tpu.dynamic_rotate %0 by %c65_i32 dim 1 : vector<8x1024xf32>, i32 -> vector<8x1024xf32>
    %c3 = arith.constant 3 : index
    %c0_11 = arith.constant 0 : index
    %23 = vector.load %arg2[%c3, %c0_11] : memref<27x1024xf32, #tpu.memory_space<vmem>>, vector<1x1024xf32>
    %24 = vector.broadcast %23 : vector<1x1024xf32> to vector<8x1024xf32>
    %25 = arith.mulf %22, %24 : vector<8x1024xf32>
    %c24 = arith.constant 24 : index
    %c0_12 = arith.constant 0 : index
    %26 = vector.load %arg8[%c24, %c0_12] : memref<216x1024xf32, #tpu.memory_space<vmem>>, vector<8x1024xf32>
    tpu.vector_store %arg8[%c24, %c0_12], %25 {strides = array<i32>} : memref<216x1024xf32, #tpu.memory_space<vmem>>, vector<8x1024xf32>,
    %c64_i32 = arith.constant 64 : i32
    %27 = tpu.dynamic_rotate %0 by %c64_i32 dim 1 : vector<8x1024xf32>, i32 -> vector<8x1024xf32>
    %c4 = arith.constant 4 : index
    %c0_13 = arith.constant 0 : index
    %28 = vector.load %arg2[%c4, %c0_13] : memref<27x1024xf32, #tpu.memory_space<vmem>>, vector<1x1024xf32>
    %29 = vector.broadcast %28 : vector<1x1024xf32> to vector<8x1024xf32>
    %30 = arith.mulf %27, %29 : vector<8x1024xf32>
    %c32 = arith.constant 32 : index
    %c0_14 = arith.constant 0 : index
    %31 = vector.load %arg8[%c32, %c0_14] : memref<216x1024xf32, #tpu.memory_space<vmem>>, vector<8x1024xf32>
    tpu.vector_store %arg8[%c32, %c0_14], %30 {strides = array<i32>} : memref<216x1024xf32, #tpu.memory_space<vmem>>, vector<8x1024xf32>,
    %c63_i32 = arith.constant 63 : i32
    %32 = tpu.dynamic_rotate %0 by %c63_i32 dim 1 : vector<8x1024xf32>, i32 -> vector<8x1024xf32>
    %c5 = arith.constant 5 : index
    %c0_15 = arith.constant 0 : index
    %33 = vector.load %arg2[%c5, %c0_15] : memref<27x1024xf32, #tpu.memory_space<vmem>>, vector<1x1024xf32>
    %34 = vector.broadcast %33 : vector<1x1024xf32> to vector<8x1024xf32>
    %35 = arith.mulf %32, %34 : vector<8x1024xf32>
    %c40 = arith.constant 40 : index
    %c0_16 = arith.constant 0 : index
    %36 = vector.load %arg8[%c40, %c0_16] : memref<216x1024xf32, #tpu.memory_space<vmem>>, vector<8x1024xf32>
    tpu.vector_store %arg8[%c40, %c0_16], %35 {strides = array<i32>} : memref<216x1024xf32, #tpu.memory_space<vmem>>, vector<8x1024xf32>,
    %c57_i32 = arith.constant 57 : i32
    %37 = tpu.dynamic_rotate %0 by %c57_i32 dim 1 : vector<8x1024xf32>, i32 -> vector<8x1024xf32>
    %c6 = arith.constant 6 : index
    %c0_17 = arith.constant 0 : index
    %38 = vector.load %arg2[%c6, %c0_17] : memref<27x1024xf32, #tpu.memory_space<vmem>>, vector<1x1024xf32>
    %39 = vector.broadcast %38 : vector<1x1024xf32> to vector<8x1024xf32>
    %40 = arith.mulf %37, %39 : vector<8x1024xf32>
    %c48 = arith.constant 48 : index
    %c0_18 = arith.constant 0 : index
    %41 = vector.load %arg8[%c48, %c0_18] : memref<216x1024xf32, #tpu.memory_space<vmem>>, vector<8x1024xf32>
    tpu.vector_store %arg8[%c48, %c0_18], %40 {strides = array<i32>} : memref<216x1024xf32, #tpu.memory_space<vmem>>, vector<8x1024xf32>,
    %c56_i32 = arith.constant 56 : i32
    %42 = tpu.dynamic_rotate %0 by %c56_i32 dim 1 : vector<8x1024xf32>, i32 -> vector<8x1024xf32>
    %c7 = arith.constant 7 : index
    %c0_19 = arith.constant 0 : index
    %43 = vector.load %arg2[%c7, %c0_19] : memref<27x1024xf32, #tpu.memory_space<vmem>>, vector<1x1024xf32>
    %44 = vector.broadcast %43 : vector<1x1024xf32> to vector<8x1024xf32>
    %45 = arith.mulf %42, %44 : vector<8x1024xf32>
    %c56 = arith.constant 56 : index
    %c0_20 = arith.constant 0 : index
    %46 = vector.load %arg8[%c56, %c0_20] : memref<216x1024xf32, #tpu.memory_space<vmem>>, vector<8x1024xf32>
    tpu.vector_store %arg8[%c56, %c0_20], %45 {strides = array<i32>} : memref<216x1024xf32, #tpu.memory_space<vmem>>, vector<8x1024xf32>,
    %c55_i32 = arith.constant 55 : i32
    %47 = tpu.dynamic_rotate %0 by %c55_i32 dim 1 : vector<8x1024xf32>, i32 -> vector<8x1024xf32>
    %c8_21 = arith.constant 8 : index
    %c0_22 = arith.constant 0 : index
    %48 = vector.load %arg2[%c8_21, %c0_22] : memref<27x1024xf32, #tpu.memory_space<vmem>>, vector<1x1024xf32>
    %49 = vector.broadcast %48 : vector<1x1024xf32> to vector<8x1024xf32>
    %50 = arith.mulf %47, %49 : vector<8x1024xf32>
    %c64 = arith.constant 64 : index
    %c0_23 = arith.constant 0 : index
    %51 = vector.load %arg8[%c64, %c0_23] : memref<216x1024xf32, #tpu.memory_space<vmem>>, vector<8x1024xf32>
    tpu.vector_store %arg8[%c64, %c0_23], %50 {strides = array<i32>} : memref<216x1024xf32, #tpu.memory_space<vmem>>, vector<8x1024xf32>,
    %c9_i32 = arith.constant 9 : i32
    %52 = tpu.dynamic_rotate %0 by %c9_i32 dim 1 : vector<8x1024xf32>, i32 -> vector<8x1024xf32>
    %c9 = arith.constant 9 : index
    %c0_24 = arith.constant 0 : index
    %53 = vector.load %arg2[%c9, %c0_24] : memref<27x1024xf32, #tpu.memory_space<vmem>>, vector<1x1024xf32>
    %54 = vector.broadcast %53 : vector<1x1024xf32> to vector<8x1024xf32>
    %55 = arith.mulf %52, %54 : vector<8x1024xf32>
    %c72 = arith.constant 72 : index
    %c0_25 = arith.constant 0 : index
    %56 = vector.load %arg8[%c72, %c0_25] : memref<216x1024xf32, #tpu.memory_space<vmem>>, vector<8x1024xf32>
    tpu.vector_store %arg8[%c72, %c0_25], %55 {strides = array<i32>} : memref<216x1024xf32, #tpu.memory_space<vmem>>, vector<8x1024xf32>,
    %c8_i32 = arith.constant 8 : i32
    %57 = tpu.dynamic_rotate %0 by %c8_i32 dim 1 : vector<8x1024xf32>, i32 -> vector<8x1024xf32>
    %c10 = arith.constant 10 : index
    %c0_26 = arith.constant 0 : index
    %58 = vector.load %arg2[%c10, %c0_26] : memref<27x1024xf32, #tpu.memory_space<vmem>>, vector<1x1024xf32>
    %59 = vector.broadcast %58 : vector<1x1024xf32> to vector<8x1024xf32>
    %60 = arith.mulf %57, %59 : vector<8x1024xf32>
    %c80 = arith.constant 80 : index
    %c0_27 = arith.constant 0 : index
    %61 = vector.load %arg8[%c80, %c0_27] : memref<216x1024xf32, #tpu.memory_space<vmem>>, vector<8x1024xf32>
    tpu.vector_store %arg8[%c80, %c0_27], %60 {strides = array<i32>} : memref<216x1024xf32, #tpu.memory_space<vmem>>, vector<8x1024xf32>,
    %c7_i32 = arith.constant 7 : i32
    %62 = tpu.dynamic_rotate %0 by %c7_i32 dim 1 : vector<8x1024xf32>, i32 -> vector<8x1024xf32>
    %c11 = arith.constant 11 : index
    %c0_28 = arith.constant 0 : index
    %63 = vector.load %arg2[%c11, %c0_28] : memref<27x1024xf32, #tpu.memory_space<vmem>>, vector<1x1024xf32>
    %64 = vector.broadcast %63 : vector<1x1024xf32> to vector<8x1024xf32>
    %65 = arith.mulf %62, %64 : vector<8x1024xf32>
    %c88 = arith.constant 88 : index
    %c0_29 = arith.constant 0 : index
    %66 = vector.load %arg8[%c88, %c0_29] : memref<216x1024xf32, #tpu.memory_space<vmem>>, vector<8x1024xf32>
    tpu.vector_store %arg8[%c88, %c0_29], %65 {strides = array<i32>} : memref<216x1024xf32, #tpu.memory_space<vmem>>, vector<8x1024xf32>,
    %c1_i32 = arith.constant 1 : i32
    %67 = tpu.dynamic_rotate %0 by %c1_i32 dim 1 : vector<8x1024xf32>, i32 -> vector<8x1024xf32>
    %c12 = arith.constant 12 : index
    %c0_30 = arith.constant 0 : index
    %68 = vector.load %arg2[%c12, %c0_30] : memref<27x1024xf32, #tpu.memory_space<vmem>>, vector<1x1024xf32>
    %69 = vector.broadcast %68 : vector<1x1024xf32> to vector<8x1024xf32>
    %70 = arith.mulf %67, %69 : vector<8x1024xf32>
    %c96 = arith.constant 96 : index
    %c0_31 = arith.constant 0 : index
    %71 = vector.load %arg8[%c96, %c0_31] : memref<216x1024xf32, #tpu.memory_space<vmem>>, vector<8x1024xf32>
    tpu.vector_store %arg8[%c96, %c0_31], %70 {strides = array<i32>} : memref<216x1024xf32, #tpu.memory_space<vmem>>, vector<8x1024xf32>,
    %c104 = arith.constant 104 : index
    %c0_32 = arith.constant 0 : index
    %72 = vector.load %arg8[%c104, %c0_32] : memref<216x1024xf32, #tpu.memory_space<vmem>>, vector<8x1024xf32>
    tpu.vector_store %arg8[%c104, %c0_32], %0 {strides = array<i32>} : memref<216x1024xf32, #tpu.memory_space<vmem>>, vector<8x1024xf32>,
    %c1023_i32 = arith.constant 1023 : i32
    %73 = tpu.dynamic_rotate %0 by %c1023_i32 dim 1 : vector<8x1024xf32>, i32 -> vector<8x1024xf32>
    %c14 = arith.constant 14 : index
    %c0_33 = arith.constant 0 : index
    %74 = vector.load %arg2[%c14, %c0_33] : memref<27x1024xf32, #tpu.memory_space<vmem>>, vector<1x1024xf32>
    %75 = vector.broadcast %74 : vector<1x1024xf32> to vector<8x1024xf32>
    %76 = arith.mulf %73, %75 : vector<8x1024xf32>
    %c112 = arith.constant 112 : index
    %c0_34 = arith.constant 0 : index
    %77 = vector.load %arg8[%c112, %c0_34] : memref<216x1024xf32, #tpu.memory_space<vmem>>, vector<8x1024xf32>
    tpu.vector_store %arg8[%c112, %c0_34], %76 {strides = array<i32>} : memref<216x1024xf32, #tpu.memory_space<vmem>>, vector<8x1024xf32>,
    %c1017_i32 = arith.constant 1017 : i32
    %78 = tpu.dynamic_rotate %0 by %c1017_i32 dim 1 : vector<8x1024xf32>, i32 -> vector<8x1024xf32>
    %c15 = arith.constant 15 : index
    %c0_35 = arith.constant 0 : index
    %79 = vector.load %arg2[%c15, %c0_35] : memref<27x1024xf32, #tpu.memory_space<vmem>>, vector<1x1024xf32>
    %80 = vector.broadcast %79 : vector<1x1024xf32> to vector<8x1024xf32>
    %81 = arith.mulf %78, %80 : vector<8x1024xf32>
    %c120 = arith.constant 120 : index
    %c0_36 = arith.constant 0 : index
    %82 = vector.load %arg8[%c120, %c0_36] : memref<216x1024xf32, #tpu.memory_space<vmem>>, vector<8x1024xf32>
    tpu.vector_store %arg8[%c120, %c0_36], %81 {strides = array<i32>} : memref<216x1024xf32, #tpu.memory_space<vmem>>, vector<8x1024xf32>,
    %c1016_i32 = arith.constant 1016 : i32
    %83 = tpu.dynamic_rotate %0 by %c1016_i32 dim 1 : vector<8x1024xf32>, i32 -> vector<8x1024xf32>
    %c16_37 = arith.constant 16 : index
    %c0_38 = arith.constant 0 : index
    %84 = vector.load %arg2[%c16_37, %c0_38] : memref<27x1024xf32, #tpu.memory_space<vmem>>, vector<1x1024xf32>
    %85 = vector.broadcast %84 : vector<1x1024xf32> to vector<8x1024xf32>
    %86 = arith.mulf %83, %85 : vector<8x1024xf32>
    %c128 = arith.constant 128 : index
    %c0_39 = arith.constant 0 : index
    %87 = vector.load %arg8[%c128, %c0_39] : memref<216x1024xf32, #tpu.memory_space<vmem>>, vector<8x1024xf32>
    tpu.vector_store %arg8[%c128, %c0_39], %86 {strides = array<i32>} : memref<216x1024xf32, #tpu.memory_space<vmem>>, vector<8x1024xf32>,
    %c1015_i32 = arith.constant 1015 : i32
    %88 = tpu.dynamic_rotate %0 by %c1015_i32 dim 1 : vector<8x1024xf32>, i32 -> vector<8x1024xf32>
    %c17 = arith.constant 17 : index
    %c0_40 = arith.constant 0 : index
    %89 = vector.load %arg2[%c17, %c0_40] : memref<27x1024xf32, #tpu.memory_space<vmem>>, vector<1x1024xf32>
    %90 = vector.broadcast %89 : vector<1x1024xf32> to vector<8x1024xf32>
    %91 = arith.mulf %88, %90 : vector<8x1024xf32>
    %c136 = arith.constant 136 : index
    %c0_41 = arith.constant 0 : index
    %92 = vector.load %arg8[%c136, %c0_41] : memref<216x1024xf32, #tpu.memory_space<vmem>>, vector<8x1024xf32>
    tpu.vector_store %arg8[%c136, %c0_41], %91 {strides = array<i32>} : memref<216x1024xf32, #tpu.memory_space<vmem>>, vector<8x1024xf32>,
    %c969_i32 = arith.constant 969 : i32
    %93 = tpu.dynamic_rotate %0 by %c969_i32 dim 1 : vector<8x1024xf32>, i32 -> vector<8x1024xf32>
    %c18 = arith.constant 18 : index
    %c0_42 = arith.constant 0 : index
    %94 = vector.load %arg2[%c18, %c0_42] : memref<27x1024xf32, #tpu.memory_space<vmem>>, vector<1x1024xf32>
    %95 = vector.broadcast %94 : vector<1x1024xf32> to vector<8x1024xf32>
    %96 = arith.mulf %93, %95 : vector<8x1024xf32>
    %c144 = arith.constant 144 : index
    %c0_43 = arith.constant 0 : index
    %97 = vector.load %arg8[%c144, %c0_43] : memref<216x1024xf32, #tpu.memory_space<vmem>>, vector<8x1024xf32>
    tpu.vector_store %arg8[%c144, %c0_43], %96 {strides = array<i32>} : memref<216x1024xf32, #tpu.memory_space<vmem>>, vector<8x1024xf32>,
    %c968_i32 = arith.constant 968 : i32
    %98 = tpu.dynamic_rotate %0 by %c968_i32 dim 1 : vector<8x1024xf32>, i32 -> vector<8x1024xf32>
    %c19 = arith.constant 19 : index
    %c0_44 = arith.constant 0 : index
    %99 = vector.load %arg2[%c19, %c0_44] : memref<27x1024xf32, #tpu.memory_space<vmem>>, vector<1x1024xf32>
    %100 = vector.broadcast %99 : vector<1x1024xf32> to vector<8x1024xf32>
    %101 = arith.mulf %98, %100 : vector<8x1024xf32>
    %c152 = arith.constant 152 : index
    %c0_45 = arith.constant 0 : index
    %102 = vector.load %arg8[%c152, %c0_45] : memref<216x1024xf32, #tpu.memory_space<vmem>>, vector<8x1024xf32>
    tpu.vector_store %arg8[%c152, %c0_45], %101 {strides = array<i32>} : memref<216x1024xf32, #tpu.memory_space<vmem>>, vector<8x1024xf32>,
    %c967_i32 = arith.constant 967 : i32
    %103 = tpu.dynamic_rotate %0 by %c967_i32 dim 1 : vector<8x1024xf32>, i32 -> vector<8x1024xf32>
    %c20 = arith.constant 20 : index
    %c0_46 = arith.constant 0 : index
    %104 = vector.load %arg2[%c20, %c0_46] : memref<27x1024xf32, #tpu.memory_space<vmem>>, vector<1x1024xf32>
    %105 = vector.broadcast %104 : vector<1x1024xf32> to vector<8x1024xf32>
    %106 = arith.mulf %103, %105 : vector<8x1024xf32>
    %c160 = arith.constant 160 : index
    %c0_47 = arith.constant 0 : index
    %107 = vector.load %arg8[%c160, %c0_47] : memref<216x1024xf32, #tpu.memory_space<vmem>>, vector<8x1024xf32>
    tpu.vector_store %arg8[%c160, %c0_47], %106 {strides = array<i32>} : memref<216x1024xf32, #tpu.memory_space<vmem>>, vector<8x1024xf32>,
    %c961_i32 = arith.constant 961 : i32
    %108 = tpu.dynamic_rotate %0 by %c961_i32 dim 1 : vector<8x1024xf32>, i32 -> vector<8x1024xf32>
    %c21 = arith.constant 21 : index
    %c0_48 = arith.constant 0 : index
    %109 = vector.load %arg2[%c21, %c0_48] : memref<27x1024xf32, #tpu.memory_space<vmem>>, vector<1x1024xf32>
    %110 = vector.broadcast %109 : vector<1x1024xf32> to vector<8x1024xf32>
    %111 = arith.mulf %108, %110 : vector<8x1024xf32>
    %c168 = arith.constant 168 : index
    %c0_49 = arith.constant 0 : index
    %112 = vector.load %arg8[%c168, %c0_49] : memref<216x1024xf32, #tpu.memory_space<vmem>>, vector<8x1024xf32>
    tpu.vector_store %arg8[%c168, %c0_49], %111 {strides = array<i32>} : memref<216x1024xf32, #tpu.memory_space<vmem>>, vector<8x1024xf32>,
    %c960_i32 = arith.constant 960 : i32
    %113 = tpu.dynamic_rotate %0 by %c960_i32 dim 1 : vector<8x1024xf32>, i32 -> vector<8x1024xf32>
    %c22 = arith.constant 22 : index
    %c0_50 = arith.constant 0 : index
    %114 = vector.load %arg2[%c22, %c0_50] : memref<27x1024xf32, #tpu.memory_space<vmem>>, vector<1x1024xf32>
    %115 = vector.broadcast %114 : vector<1x1024xf32> to vector<8x1024xf32>
    %116 = arith.mulf %113, %115 : vector<8x1024xf32>
    %c176 = arith.constant 176 : index
    %c0_51 = arith.constant 0 : index
    %117 = vector.load %arg8[%c176, %c0_51] : memref<216x1024xf32, #tpu.memory_space<vmem>>, vector<8x1024xf32>
    tpu.vector_store %arg8[%c176, %c0_51], %116 {strides = array<i32>} : memref<216x1024xf32, #tpu.memory_space<vmem>>, vector<8x1024xf32>,
    %c959_i32 = arith.constant 959 : i32
    %118 = tpu.dynamic_rotate %0 by %c959_i32 dim 1 : vector<8x1024xf32>, i32 -> vector<8x1024xf32>
    %c23 = arith.constant 23 : index
    %c0_52 = arith.constant 0 : index
    %119 = vector.load %arg2[%c23, %c0_52] : memref<27x1024xf32, #tpu.memory_space<vmem>>, vector<1x1024xf32>
    %120 = vector.broadcast %119 : vector<1x1024xf32> to vector<8x1024xf32>
    %121 = arith.mulf %118, %120 : vector<8x1024xf32>
    %c184 = arith.constant 184 : index
    %c0_53 = arith.constant 0 : index
    %122 = vector.load %arg8[%c184, %c0_53] : memref<216x1024xf32, #tpu.memory_space<vmem>>, vector<8x1024xf32>
    tpu.vector_store %arg8[%c184, %c0_53], %121 {strides = array<i32>} : memref<216x1024xf32, #tpu.memory_space<vmem>>, vector<8x1024xf32>,
    %c953_i32 = arith.constant 953 : i32
    %123 = tpu.dynamic_rotate %0 by %c953_i32 dim 1 : vector<8x1024xf32>, i32 -> vector<8x1024xf32>
    %c24_54 = arith.constant 24 : index
    %c0_55 = arith.constant 0 : index
    %124 = vector.load %arg2[%c24_54, %c0_55] : memref<27x1024xf32, #tpu.memory_space<vmem>>, vector<1x1024xf32>
    %125 = vector.broadcast %124 : vector<1x1024xf32> to vector<8x1024xf32>
    %126 = arith.mulf %123, %125 : vector<8x1024xf32>
    %c192 = arith.constant 192 : index
    %c0_56 = arith.constant 0 : index
    %127 = vector.load %arg8[%c192, %c0_56] : memref<216x1024xf32, #tpu.memory_space<vmem>>, vector<8x1024xf32>
    tpu.vector_store %arg8[%c192, %c0_56], %126 {strides = array<i32>} : memref<216x1024xf32, #tpu.memory_space<vmem>>, vector<8x1024xf32>,
    %c952_i32 = arith.constant 952 : i32
    %128 = tpu.dynamic_rotate %0 by %c952_i32 dim 1 : vector<8x1024xf32>, i32 -> vector<8x1024xf32>
    %c25 = arith.constant 25 : index
    %c0_57 = arith.constant 0 : index
    %129 = vector.load %arg2[%c25, %c0_57] : memref<27x1024xf32, #tpu.memory_space<vmem>>, vector<1x1024xf32>
    %130 = vector.broadcast %129 : vector<1x1024xf32> to vector<8x1024xf32>
    %131 = arith.mulf %128, %130 : vector<8x1024xf32>
    %c200 = arith.constant 200 : index
    %c0_58 = arith.constant 0 : index
    %132 = vector.load %arg8[%c200, %c0_58] : memref<216x1024xf32, #tpu.memory_space<vmem>>, vector<8x1024xf32>
    tpu.vector_store %arg8[%c200, %c0_58], %131 {strides = array<i32>} : memref<216x1024xf32, #tpu.memory_space<vmem>>, vector<8x1024xf32>,
    %c951_i32 = arith.constant 951 : i32
    %133 = tpu.dynamic_rotate %0 by %c951_i32 dim 1 : vector<8x1024xf32>, i32 -> vector<8x1024xf32>
    %c26 = arith.constant 26 : index
    %c0_59 = arith.constant 0 : index
    %134 = vector.load %arg2[%c26, %c0_59] : memref<27x1024xf32, #tpu.memory_space<vmem>>, vector<1x1024xf32>
    %135 = vector.broadcast %134 : vector<1x1024xf32> to vector<8x1024xf32>
    %136 = arith.mulf %133, %135 : vector<8x1024xf32>
    %c208 = arith.constant 208 : index
    %c0_60 = arith.constant 0 : index
    %137 = vector.load %arg8[%c208, %c0_60] : memref<216x1024xf32, #tpu.memory_space<vmem>>, vector<8x1024xf32>
    tpu.vector_store %arg8[%c208, %c0_60], %136 {strides = array<i32>} : memref<216x1024xf32, #tpu.memory_space<vmem>>, vector<8x1024xf32>,
    %c0_61 = arith.constant 0 : index
    %c0_62 = arith.constant 0 : index
    %138 = vector.load %arg3[%c0_61, %c0_62] : memref<8x216xf32, #tpu.memory_space<vmem>>, vector<8x216xf32>
    %c0_63 = arith.constant 0 : index
    %c0_64 = arith.constant 0 : index
    %139 = vector.load %arg8[%c0_63, %c0_64] : memref<216x1024xf32, #tpu.memory_space<vmem>>, vector<216x1024xf32>
    %cst = arith.constant dense<0.000000e+00> : vector<8x1024xf32>
    %140 = tpu.matmul %138, %139, %cst {dimension_numbers = #tpu.dot_dimension_numbers<[1], [0], [0], [1], [0, 0, 1, 1], [], []>} : vector<8x216xf32>, vector<216x1024xf32>, vector<8x1024xf32> -> vector<8x1024xf32>
    %141 = vector.extract_strided_slice %140 {offsets = [0, 0], sizes = [8, 512], strides = [1, 1]} : vector<8x1024xf32> to vector<8x512xf32>
    %cst_65 = arith.constant dense<0.000000e+00> : vector<8xf32>
    %142 = vector.multi_reduction <add>, %141, %cst_65 [1] : vector<8x512xf32> to vector<8xf32>
    %143 = vector.shape_cast %142 : vector<8xf32> to vector<8x1xf32>
    %cst_66 = arith.constant 0.001953125 : f32
    %144 = vector.broadcast %cst_66 : f32 to vector<8x1xf32>
    %145 = arith.mulf %143, %144 : vector<8x1xf32>
    %146 = arith.mulf %141, %141 : vector<8x512xf32>
    %cst_67 = arith.constant dense<0.000000e+00> : vector<8xf32>
    %147 = vector.multi_reduction <add>, %146, %cst_67 [1] : vector<8x512xf32> to vector<8xf32>
    %148 = vector.shape_cast %147 : vector<8xf32> to vector<8x1xf32>
    %cst_68 = arith.constant 0.001953125 : f32
    %149 = vector.broadcast %cst_68 : f32 to vector<8x1xf32>
    %150 = arith.mulf %148, %149 : vector<8x1xf32>
    %151 = arith.mulf %145, %145 : vector<8x1xf32>
    %152 = arith.subf %150, %151 : vector<8x1xf32>
    %cst_69 = arith.constant 9.99999974E-6 : f32
    %153 = vector.broadcast %cst_69 : f32 to vector<8x1xf32>
    %154 = arith.addf %152, %153 : vector<8x1xf32>
    %155 = math.rsqrt %154 : vector<8x1xf32>
    %156 = vector.broadcast %145 : vector<8x1xf32> to vector<8x512xf32>
    %157 = arith.subf %141, %156 : vector<8x512xf32>
    %158 = vector.broadcast %155 : vector<8x1xf32> to vector<8x512xf32>
    %159 = arith.mulf %157, %158 : vector<8x512xf32>
    %160 = vector.broadcast %2 : vector<8x1xf32> to vector<8x512xf32>
    %161 = arith.mulf %159, %160 : vector<8x512xf32>
    %162 = vector.broadcast %3 : vector<8x1xf32> to vector<8x512xf32>
    %163 = arith.addf %161, %162 : vector<8x512xf32>
    %cst_70 = arith.constant 0.000000e+00 : f32
    %164 = vector.broadcast %cst_70 : f32 to vector<8x512xf32>
    %165 = arith.maximumf %163, %164 : vector<8x512xf32>
    %c0_71 = arith.constant 0 : index
    %c0_72 = arith.constant 0 : index
    %166 = vector.load %arg9[%c0_71, %c0_72] : memref<8x1024xf32, #tpu.memory_space<vmem>>, vector<8x512xf32>
    tpu.vector_store %arg9[%c0_71, %c0_72], %165 {strides = array<i32>} : memref<8x1024xf32, #tpu.memory_space<vmem>>, vector<8x512xf32>,
    %167 = vector.extract_strided_slice %140 {offsets = [0, 512], sizes = [8, 512], strides = [1, 1]} : vector<8x1024xf32> to vector<8x512xf32>
    %cst_73 = arith.constant dense<0.000000e+00> : vector<8xf32>
    %168 = vector.multi_reduction <add>, %167, %cst_73 [1] : vector<8x512xf32> to vector<8xf32>
    %169 = vector.shape_cast %168 : vector<8xf32> to vector<8x1xf32>
    %cst_74 = arith.constant 0.001953125 : f32
    %170 = vector.broadcast %cst_74 : f32 to vector<8x1xf32>
    %171 = arith.mulf %169, %170 : vector<8x1xf32>
    %172 = arith.mulf %167, %167 : vector<8x512xf32>
    %cst_75 = arith.constant dense<0.000000e+00> : vector<8xf32>
    %173 = vector.multi_reduction <add>, %172, %cst_75 [1] : vector<8x512xf32> to vector<8xf32>
    %174 = vector.shape_cast %173 : vector<8xf32> to vector<8x1xf32>
    %cst_76 = arith.constant 0.001953125 : f32
    %175 = vector.broadcast %cst_76 : f32 to vector<8x1xf32>
    %176 = arith.mulf %174, %175 : vector<8x1xf32>
    %177 = arith.mulf %171, %171 : vector<8x1xf32>
    %178 = arith.subf %176, %177 : vector<8x1xf32>
    %cst_77 = arith.constant 9.99999974E-6 : f32
    %179 = vector.broadcast %cst_77 : f32 to vector<8x1xf32>
    %180 = arith.addf %178, %179 : vector<8x1xf32>
    %181 = math.rsqrt %180 : vector<8x1xf32>
    %182 = vector.broadcast %171 : vector<8x1xf32> to vector<8x512xf32>
    %183 = arith.subf %167, %182 : vector<8x512xf32>
    %184 = vector.broadcast %181 : vector<8x1xf32> to vector<8x512xf32>
    %185 = arith.mulf %183, %184 : vector<8x512xf32>
    %186 = vector.broadcast %2 : vector<8x1xf32> to vector<8x512xf32>
    %187 = arith.mulf %185, %186 : vector<8x512xf32>
    %188 = vector.broadcast %3 : vector<8x1xf32> to vector<8x512xf32>
    %189 = arith.addf %187, %188 : vector<8x512xf32>
    %cst_78 = arith.constant 0.000000e+00 : f32
    %190 = vector.broadcast %cst_78 : f32 to vector<8x512xf32>
    %191 = arith.maximumf %189, %190 : vector<8x512xf32>
    %c0_79 = arith.constant 0 : index
    %c512 = arith.constant 512 : index
    %192 = vector.load %arg9[%c0_79, %c512] : memref<8x1024xf32, #tpu.memory_space<vmem>>, vector<8x512xf32>
    tpu.vector_store %arg9[%c0_79, %c512], %191 {strides = array<i32>} : memref<8x1024xf32, #tpu.memory_space<vmem>>, vector<8x512xf32>,
    %c0_80 = arith.constant 0 : index
    %c0_81 = arith.constant 0 : index
    %193 = vector.load %arg9[%c0_80, %c0_81] : memref<8x1024xf32, #tpu.memory_space<vmem>>, vector<8x1024xf32>
    %c73_i32_82 = arith.constant 73 : i32
    %194 = tpu.dynamic_rotate %193 by %c73_i32_82 dim 1 : vector<8x1024xf32>, i32 -> vector<8x1024xf32>
    %c0_83 = arith.constant 0 : index
    %c0_84 = arith.constant 0 : index
    %195 = vector.load %arg2[%c0_83, %c0_84] : memref<27x1024xf32, #tpu.memory_space<vmem>>, vector<1x1024xf32>
    %196 = vector.broadcast %195 : vector<1x1024xf32> to vector<8x1024xf32>
    %197 = arith.mulf %194, %196 : vector<8x1024xf32>
    %c0_85 = arith.constant 0 : index
    %c0_86 = arith.constant 0 : index
    %198 = vector.load %arg8[%c0_85, %c0_86] : memref<216x1024xf32, #tpu.memory_space<vmem>>, vector<8x1024xf32>
    tpu.vector_store %arg8[%c0_85, %c0_86], %197 {strides = array<i32>} : memref<216x1024xf32, #tpu.memory_space<vmem>>, vector<8x1024xf32>,
    %c72_i32_87 = arith.constant 72 : i32
    %199 = tpu.dynamic_rotate %193 by %c72_i32_87 dim 1 : vector<8x1024xf32>, i32 -> vector<8x1024xf32>
    %c1_88 = arith.constant 1 : index
    %c0_89 = arith.constant 0 : index
    %200 = vector.load %arg2[%c1_88, %c0_89] : memref<27x1024xf32, #tpu.memory_space<vmem>>, vector<1x1024xf32>
    %201 = vector.broadcast %200 : vector<1x1024xf32> to vector<8x1024xf32>
    %202 = arith.mulf %199, %201 : vector<8x1024xf32>
    %c8_90 = arith.constant 8 : index
    %c0_91 = arith.constant 0 : index
    %203 = vector.load %arg8[%c8_90, %c0_91] : memref<216x1024xf32, #tpu.memory_space<vmem>>, vector<8x1024xf32>
    tpu.vector_store %arg8[%c8_90, %c0_91], %202 {strides = array<i32>} : memref<216x1024xf32, #tpu.memory_space<vmem>>, vector<8x1024xf32>,
    %c71_i32_92 = arith.constant 71 : i32
    %204 = tpu.dynamic_rotate %193 by %c71_i32_92 dim 1 : vector<8x1024xf32>, i32 -> vector<8x1024xf32>
    %c2_93 = arith.constant 2 : index
    %c0_94 = arith.constant 0 : index
    %205 = vector.load %arg2[%c2_93, %c0_94] : memref<27x1024xf32, #tpu.memory_space<vmem>>, vector<1x1024xf32>
    %206 = vector.broadcast %205 : vector<1x1024xf32> to vector<8x1024xf32>
    %207 = arith.mulf %204, %206 : vector<8x1024xf32>
    %c16_95 = arith.constant 16 : index
    %c0_96 = arith.constant 0 : index
    %208 = vector.load %arg8[%c16_95, %c0_96] : memref<216x1024xf32, #tpu.memory_space<vmem>>, vector<8x1024xf32>
    tpu.vector_store %arg8[%c16_95, %c0_96], %207 {strides = array<i32>} : memref<216x1024xf32, #tpu.memory_space<vmem>>, vector<8x1024xf32>,
    %c65_i32_97 = arith.constant 65 : i32
    %209 = tpu.dynamic_rotate %193 by %c65_i32_97 dim 1 : vector<8x1024xf32>, i32 -> vector<8x1024xf32>
    %c3_98 = arith.constant 3 : index
    %c0_99 = arith.constant 0 : index
    %210 = vector.load %arg2[%c3_98, %c0_99] : memref<27x1024xf32, #tpu.memory_space<vmem>>, vector<1x1024xf32>
    %211 = vector.broadcast %210 : vector<1x1024xf32> to vector<8x1024xf32>
    %212 = arith.mulf %209, %211 : vector<8x1024xf32>
    %c24_100 = arith.constant 24 : index
    %c0_101 = arith.constant 0 : index
    %213 = vector.load %arg8[%c24_100, %c0_101] : memref<216x1024xf32, #tpu.memory_space<vmem>>, vector<8x1024xf32>
    tpu.vector_store %arg8[%c24_100, %c0_101], %212 {strides = array<i32>} : memref<216x1024xf32, #tpu.memory_space<vmem>>, vector<8x1024xf32>,
    %c64_i32_102 = arith.constant 64 : i32
    %214 = tpu.dynamic_rotate %193 by %c64_i32_102 dim 1 : vector<8x1024xf32>, i32 -> vector<8x1024xf32>
    %c4_103 = arith.constant 4 : index
    %c0_104 = arith.constant 0 : index
    %215 = vector.load %arg2[%c4_103, %c0_104] : memref<27x1024xf32, #tpu.memory_space<vmem>>, vector<1x1024xf32>
    %216 = vector.broadcast %215 : vector<1x1024xf32> to vector<8x1024xf32>
    %217 = arith.mulf %214, %216 : vector<8x1024xf32>
    %c32_105 = arith.constant 32 : index
    %c0_106 = arith.constant 0 : index
    %218 = vector.load %arg8[%c32_105, %c0_106] : memref<216x1024xf32, #tpu.memory_space<vmem>>, vector<8x1024xf32>
    tpu.vector_store %arg8[%c32_105, %c0_106], %217 {strides = array<i32>} : memref<216x1024xf32, #tpu.memory_space<vmem>>, vector<8x1024xf32>,
    %c63_i32_107 = arith.constant 63 : i32
    %219 = tpu.dynamic_rotate %193 by %c63_i32_107 dim 1 : vector<8x1024xf32>, i32 -> vector<8x1024xf32>
    %c5_108 = arith.constant 5 : index
    %c0_109 = arith.constant 0 : index
    %220 = vector.load %arg2[%c5_108, %c0_109] : memref<27x1024xf32, #tpu.memory_space<vmem>>, vector<1x1024xf32>
    %221 = vector.broadcast %220 : vector<1x1024xf32> to vector<8x1024xf32>
    %222 = arith.mulf %219, %221 : vector<8x1024xf32>
    %c40_110 = arith.constant 40 : index
    %c0_111 = arith.constant 0 : index
    %223 = vector.load %arg8[%c40_110, %c0_111] : memref<216x1024xf32, #tpu.memory_space<vmem>>, vector<8x1024xf32>
    tpu.vector_store %arg8[%c40_110, %c0_111], %222 {strides = array<i32>} : memref<216x1024xf32, #tpu.memory_space<vmem>>, vector<8x1024xf32>,
    %c57_i32_112 = arith.constant 57 : i32
    %224 = tpu.dynamic_rotate %193 by %c57_i32_112 dim 1 : vector<8x1024xf32>, i32 -> vector<8x1024xf32>
    %c6_113 = arith.constant 6 : index
    %c0_114 = arith.constant 0 : index
    %225 = vector.load %arg2[%c6_113, %c0_114] : memref<27x1024xf32, #tpu.memory_space<vmem>>, vector<1x1024xf32>
    %226 = vector.broadcast %225 : vector<1x1024xf32> to vector<8x1024xf32>
    %227 = arith.mulf %224, %226 : vector<8x1024xf32>
    %c48_115 = arith.constant 48 : index
    %c0_116 = arith.constant 0 : index
    %228 = vector.load %arg8[%c48_115, %c0_116] : memref<216x1024xf32, #tpu.memory_space<vmem>>, vector<8x1024xf32>
    tpu.vector_store %arg8[%c48_115, %c0_116], %227 {strides = array<i32>} : memref<216x1024xf32, #tpu.memory_space<vmem>>, vector<8x1024xf32>,
    %c56_i32_117 = arith.constant 56 : i32
    %229 = tpu.dynamic_rotate %193 by %c56_i32_117 dim 1 : vector<8x1024xf32>, i32 -> vector<8x1024xf32>
    %c7_118 = arith.constant 7 : index
    %c0_119 = arith.constant 0 : index
    %230 = vector.load %arg2[%c7_118, %c0_119] : memref<27x1024xf32, #tpu.memory_space<vmem>>, vector<1x1024xf32>
    %231 = vector.broadcast %230 : vector<1x1024xf32> to vector<8x1024xf32>
    %232 = arith.mulf %229, %231 : vector<8x1024xf32>
    %c56_120 = arith.constant 56 : index
    %c0_121 = arith.constant 0 : index
    %233 = vector.load %arg8[%c56_120, %c0_121] : memref<216x1024xf32, #tpu.memory_space<vmem>>, vector<8x1024xf32>
    tpu.vector_store %arg8[%c56_120, %c0_121], %232 {strides = array<i32>} : memref<216x1024xf32, #tpu.memory_space<vmem>>, vector<8x1024xf32>,
    %c55_i32_122 = arith.constant 55 : i32
    %234 = tpu.dynamic_rotate %193 by %c55_i32_122 dim 1 : vector<8x1024xf32>, i32 -> vector<8x1024xf32>
    %c8_123 = arith.constant 8 : index
    %c0_124 = arith.constant 0 : index
    %235 = vector.load %arg2[%c8_123, %c0_124] : memref<27x1024xf32, #tpu.memory_space<vmem>>, vector<1x1024xf32>
    %236 = vector.broadcast %235 : vector<1x1024xf32> to vector<8x1024xf32>
    %237 = arith.mulf %234, %236 : vector<8x1024xf32>
    %c64_125 = arith.constant 64 : index
    %c0_126 = arith.constant 0 : index
    %238 = vector.load %arg8[%c64_125, %c0_126] : memref<216x1024xf32, #tpu.memory_space<vmem>>, vector<8x1024xf32>
    tpu.vector_store %arg8[%c64_125, %c0_126], %237 {strides = array<i32>} : memref<216x1024xf32, #tpu.memory_space<vmem>>, vector<8x1024xf32>,
    %c9_i32_127 = arith.constant 9 : i32
    %239 = tpu.dynamic_rotate %193 by %c9_i32_127 dim 1 : vector<8x1024xf32>, i32 -> vector<8x1024xf32>
    %c9_128 = arith.constant 9 : index
    %c0_129 = arith.constant 0 : index
    %240 = vector.load %arg2[%c9_128, %c0_129] : memref<27x1024xf32, #tpu.memory_space<vmem>>, vector<1x1024xf32>
    %241 = vector.broadcast %240 : vector<1x1024xf32> to vector<8x1024xf32>
    %242 = arith.mulf %239, %241 : vector<8x1024xf32>
    %c72_130 = arith.constant 72 : index
    %c0_131 = arith.constant 0 : index
    %243 = vector.load %arg8[%c72_130, %c0_131] : memref<216x1024xf32, #tpu.memory_space<vmem>>, vector<8x1024xf32>
    tpu.vector_store %arg8[%c72_130, %c0_131], %242 {strides = array<i32>} : memref<216x1024xf32, #tpu.memory_space<vmem>>, vector<8x1024xf32>,
    %c8_i32_132 = arith.constant 8 : i32
    %244 = tpu.dynamic_rotate %193 by %c8_i32_132 dim 1 : vector<8x1024xf32>, i32 -> vector<8x1024xf32>
    %c10_133 = arith.constant 10 : index
    %c0_134 = arith.constant 0 : index
    %245 = vector.load %arg2[%c10_133, %c0_134] : memref<27x1024xf32, #tpu.memory_space<vmem>>, vector<1x1024xf32>
    %246 = vector.broadcast %245 : vector<1x1024xf32> to vector<8x1024xf32>
    %247 = arith.mulf %244, %246 : vector<8x1024xf32>
    %c80_135 = arith.constant 80 : index
    %c0_136 = arith.constant 0 : index
    %248 = vector.load %arg8[%c80_135, %c0_136] : memref<216x1024xf32, #tpu.memory_space<vmem>>, vector<8x1024xf32>
    tpu.vector_store %arg8[%c80_135, %c0_136], %247 {strides = array<i32>} : memref<216x1024xf32, #tpu.memory_space<vmem>>, vector<8x1024xf32>,
    %c7_i32_137 = arith.constant 7 : i32
    %249 = tpu.dynamic_rotate %193 by %c7_i32_137 dim 1 : vector<8x1024xf32>, i32 -> vector<8x1024xf32>
    %c11_138 = arith.constant 11 : index
    %c0_139 = arith.constant 0 : index
    %250 = vector.load %arg2[%c11_138, %c0_139] : memref<27x1024xf32, #tpu.memory_space<vmem>>, vector<1x1024xf32>
    %251 = vector.broadcast %250 : vector<1x1024xf32> to vector<8x1024xf32>
    %252 = arith.mulf %249, %251 : vector<8x1024xf32>
    %c88_140 = arith.constant 88 : index
    %c0_141 = arith.constant 0 : index
    %253 = vector.load %arg8[%c88_140, %c0_141] : memref<216x1024xf32, #tpu.memory_space<vmem>>, vector<8x1024xf32>
    tpu.vector_store %arg8[%c88_140, %c0_141], %252 {strides = array<i32>} : memref<216x1024xf32, #tpu.memory_space<vmem>>, vector<8x1024xf32>,
    %c1_i32_142 = arith.constant 1 : i32
    %254 = tpu.dynamic_rotate %193 by %c1_i32_142 dim 1 : vector<8x1024xf32>, i32 -> vector<8x1024xf32>
    %c12_143 = arith.constant 12 : index
    %c0_144 = arith.constant 0 : index
    %255 = vector.load %arg2[%c12_143, %c0_144] : memref<27x1024xf32, #tpu.memory_space<vmem>>, vector<1x1024xf32>
    %256 = vector.broadcast %255 : vector<1x1024xf32> to vector<8x1024xf32>
    %257 = arith.mulf %254, %256 : vector<8x1024xf32>
    %c96_145 = arith.constant 96 : index
    %c0_146 = arith.constant 0 : index
    %258 = vector.load %arg8[%c96_145, %c0_146] : memref<216x1024xf32, #tpu.memory_space<vmem>>, vector<8x1024xf32>
    tpu.vector_store %arg8[%c96_145, %c0_146], %257 {strides = array<i32>} : memref<216x1024xf32, #tpu.memory_space<vmem>>, vector<8x1024xf32>,
    %c104_147 = arith.constant 104 : index
    %c0_148 = arith.constant 0 : index
    %259 = vector.load %arg8[%c104_147, %c0_148] : memref<216x1024xf32, #tpu.memory_space<vmem>>, vector<8x1024xf32>
    tpu.vector_store %arg8[%c104_147, %c0_148], %193 {strides = array<i32>} : memref<216x1024xf32, #tpu.memory_space<vmem>>, vector<8x1024xf32>,
    %c1023_i32_149 = arith.constant 1023 : i32
    %260 = tpu.dynamic_rotate %193 by %c1023_i32_149 dim 1 : vector<8x1024xf32>, i32 -> vector<8x1024xf32>
    %c14_150 = arith.constant 14 : index
    %c0_151 = arith.constant 0 : index
    %261 = vector.load %arg2[%c14_150, %c0_151] : memref<27x1024xf32, #tpu.memory_space<vmem>>, vector<1x1024xf32>
    %262 = vector.broadcast %261 : vector<1x1024xf32> to vector<8x1024xf32>
    %263 = arith.mulf %260, %262 : vector<8x1024xf32>
    %c112_152 = arith.constant 112 : index
    %c0_153 = arith.constant 0 : index
    %264 = vector.load %arg8[%c112_152, %c0_153] : memref<216x1024xf32, #tpu.memory_space<vmem>>, vector<8x1024xf32>
    tpu.vector_store %arg8[%c112_152, %c0_153], %263 {strides = array<i32>} : memref<216x1024xf32, #tpu.memory_space<vmem>>, vector<8x1024xf32>,
    %c1017_i32_154 = arith.constant 1017 : i32
    %265 = tpu.dynamic_rotate %193 by %c1017_i32_154 dim 1 : vector<8x1024xf32>, i32 -> vector<8x1024xf32>
    %c15_155 = arith.constant 15 : index
    %c0_156 = arith.constant 0 : index
    %266 = vector.load %arg2[%c15_155, %c0_156] : memref<27x1024xf32, #tpu.memory_space<vmem>>, vector<1x1024xf32>
    %267 = vector.broadcast %266 : vector<1x1024xf32> to vector<8x1024xf32>
    %268 = arith.mulf %265, %267 : vector<8x1024xf32>
    %c120_157 = arith.constant 120 : index
    %c0_158 = arith.constant 0 : index
    %269 = vector.load %arg8[%c120_157, %c0_158] : memref<216x1024xf32, #tpu.memory_space<vmem>>, vector<8x1024xf32>
    tpu.vector_store %arg8[%c120_157, %c0_158], %268 {strides = array<i32>} : memref<216x1024xf32, #tpu.memory_space<vmem>>, vector<8x1024xf32>,
    %c1016_i32_159 = arith.constant 1016 : i32
    %270 = tpu.dynamic_rotate %193 by %c1016_i32_159 dim 1 : vector<8x1024xf32>, i32 -> vector<8x1024xf32>
    %c16_160 = arith.constant 16 : index
    %c0_161 = arith.constant 0 : index
    %271 = vector.load %arg2[%c16_160, %c0_161] : memref<27x1024xf32, #tpu.memory_space<vmem>>, vector<1x1024xf32>
    %272 = vector.broadcast %271 : vector<1x1024xf32> to vector<8x1024xf32>
    %273 = arith.mulf %270, %272 : vector<8x1024xf32>
    %c128_162 = arith.constant 128 : index
    %c0_163 = arith.constant 0 : index
    %274 = vector.load %arg8[%c128_162, %c0_163] : memref<216x1024xf32, #tpu.memory_space<vmem>>, vector<8x1024xf32>
    tpu.vector_store %arg8[%c128_162, %c0_163], %273 {strides = array<i32>} : memref<216x1024xf32, #tpu.memory_space<vmem>>, vector<8x1024xf32>,
    %c1015_i32_164 = arith.constant 1015 : i32
    %275 = tpu.dynamic_rotate %193 by %c1015_i32_164 dim 1 : vector<8x1024xf32>, i32 -> vector<8x1024xf32>
    %c17_165 = arith.constant 17 : index
    %c0_166 = arith.constant 0 : index
    %276 = vector.load %arg2[%c17_165, %c0_166] : memref<27x1024xf32, #tpu.memory_space<vmem>>, vector<1x1024xf32>
    %277 = vector.broadcast %276 : vector<1x1024xf32> to vector<8x1024xf32>
    %278 = arith.mulf %275, %277 : vector<8x1024xf32>
    %c136_167 = arith.constant 136 : index
    %c0_168 = arith.constant 0 : index
    %279 = vector.load %arg8[%c136_167, %c0_168] : memref<216x1024xf32, #tpu.memory_space<vmem>>, vector<8x1024xf32>
    tpu.vector_store %arg8[%c136_167, %c0_168], %278 {strides = array<i32>} : memref<216x1024xf32, #tpu.memory_space<vmem>>, vector<8x1024xf32>,
    %c969_i32_169 = arith.constant 969 : i32
    %280 = tpu.dynamic_rotate %193 by %c969_i32_169 dim 1 : vector<8x1024xf32>, i32 -> vector<8x1024xf32>
    %c18_170 = arith.constant 18 : index
    %c0_171 = arith.constant 0 : index
    %281 = vector.load %arg2[%c18_170, %c0_171] : memref<27x1024xf32, #tpu.memory_space<vmem>>, vector<1x1024xf32>
    %282 = vector.broadcast %281 : vector<1x1024xf32> to vector<8x1024xf32>
    %283 = arith.mulf %280, %282 : vector<8x1024xf32>
    %c144_172 = arith.constant 144 : index
    %c0_173 = arith.constant 0 : index
    %284 = vector.load %arg8[%c144_172, %c0_173] : memref<216x1024xf32, #tpu.memory_space<vmem>>, vector<8x1024xf32>
    tpu.vector_store %arg8[%c144_172, %c0_173], %283 {strides = array<i32>} : memref<216x1024xf32, #tpu.memory_space<vmem>>, vector<8x1024xf32>,
    %c968_i32_174 = arith.constant 968 : i32
    %285 = tpu.dynamic_rotate %193 by %c968_i32_174 dim 1 : vector<8x1024xf32>, i32 -> vector<8x1024xf32>
    %c19_175 = arith.constant 19 : index
    %c0_176 = arith.constant 0 : index
    %286 = vector.load %arg2[%c19_175, %c0_176] : memref<27x1024xf32, #tpu.memory_space<vmem>>, vector<1x1024xf32>
    %287 = vector.broadcast %286 : vector<1x1024xf32> to vector<8x1024xf32>
    %288 = arith.mulf %285, %287 : vector<8x1024xf32>
    %c152_177 = arith.constant 152 : index
    %c0_178 = arith.constant 0 : index
    %289 = vector.load %arg8[%c152_177, %c0_178] : memref<216x1024xf32, #tpu.memory_space<vmem>>, vector<8x1024xf32>
    tpu.vector_store %arg8[%c152_177, %c0_178], %288 {strides = array<i32>} : memref<216x1024xf32, #tpu.memory_space<vmem>>, vector<8x1024xf32>,
    %c967_i32_179 = arith.constant 967 : i32
    %290 = tpu.dynamic_rotate %193 by %c967_i32_179 dim 1 : vector<8x1024xf32>, i32 -> vector<8x1024xf32>
    %c20_180 = arith.constant 20 : index
    %c0_181 = arith.constant 0 : index
    %291 = vector.load %arg2[%c20_180, %c0_181] : memref<27x1024xf32, #tpu.memory_space<vmem>>, vector<1x1024xf32>
    %292 = vector.broadcast %291 : vector<1x1024xf32> to vector<8x1024xf32>
    %293 = arith.mulf %290, %292 : vector<8x1024xf32>
    %c160_182 = arith.constant 160 : index
    %c0_183 = arith.constant 0 : index
    %294 = vector.load %arg8[%c160_182, %c0_183] : memref<216x1024xf32, #tpu.memory_space<vmem>>, vector<8x1024xf32>
    tpu.vector_store %arg8[%c160_182, %c0_183], %293 {strides = array<i32>} : memref<216x1024xf32, #tpu.memory_space<vmem>>, vector<8x1024xf32>,
    %c961_i32_184 = arith.constant 961 : i32
    %295 = tpu.dynamic_rotate %193 by %c961_i32_184 dim 1 : vector<8x1024xf32>, i32 -> vector<8x1024xf32>
    %c21_185 = arith.constant 21 : index
    %c0_186 = arith.constant 0 : index
    %296 = vector.load %arg2[%c21_185, %c0_186] : memref<27x1024xf32, #tpu.memory_space<vmem>>, vector<1x1024xf32>
    %297 = vector.broadcast %296 : vector<1x1024xf32> to vector<8x1024xf32>
    %298 = arith.mulf %295, %297 : vector<8x1024xf32>
    %c168_187 = arith.constant 168 : index
    %c0_188 = arith.constant 0 : index
    %299 = vector.load %arg8[%c168_187, %c0_188] : memref<216x1024xf32, #tpu.memory_space<vmem>>, vector<8x1024xf32>
    tpu.vector_store %arg8[%c168_187, %c0_188], %298 {strides = array<i32>} : memref<216x1024xf32, #tpu.memory_space<vmem>>, vector<8x1024xf32>,
    %c960_i32_189 = arith.constant 960 : i32
    %300 = tpu.dynamic_rotate %193 by %c960_i32_189 dim 1 : vector<8x1024xf32>, i32 -> vector<8x1024xf32>
    %c22_190 = arith.constant 22 : index
    %c0_191 = arith.constant 0 : index
    %301 = vector.load %arg2[%c22_190, %c0_191] : memref<27x1024xf32, #tpu.memory_space<vmem>>, vector<1x1024xf32>
    %302 = vector.broadcast %301 : vector<1x1024xf32> to vector<8x1024xf32>
    %303 = arith.mulf %300, %302 : vector<8x1024xf32>
    %c176_192 = arith.constant 176 : index
    %c0_193 = arith.constant 0 : index
    %304 = vector.load %arg8[%c176_192, %c0_193] : memref<216x1024xf32, #tpu.memory_space<vmem>>, vector<8x1024xf32>
    tpu.vector_store %arg8[%c176_192, %c0_193], %303 {strides = array<i32>} : memref<216x1024xf32, #tpu.memory_space<vmem>>, vector<8x1024xf32>,
    %c959_i32_194 = arith.constant 959 : i32
    %305 = tpu.dynamic_rotate %193 by %c959_i32_194 dim 1 : vector<8x1024xf32>, i32 -> vector<8x1024xf32>
    %c23_195 = arith.constant 23 : index
    %c0_196 = arith.constant 0 : index
    %306 = vector.load %arg2[%c23_195, %c0_196] : memref<27x1024xf32, #tpu.memory_space<vmem>>, vector<1x1024xf32>
    %307 = vector.broadcast %306 : vector<1x1024xf32> to vector<8x1024xf32>
    %308 = arith.mulf %305, %307 : vector<8x1024xf32>
    %c184_197 = arith.constant 184 : index
    %c0_198 = arith.constant 0 : index
    %309 = vector.load %arg8[%c184_197, %c0_198] : memref<216x1024xf32, #tpu.memory_space<vmem>>, vector<8x1024xf32>
    tpu.vector_store %arg8[%c184_197, %c0_198], %308 {strides = array<i32>} : memref<216x1024xf32, #tpu.memory_space<vmem>>, vector<8x1024xf32>,
    %c953_i32_199 = arith.constant 953 : i32
    %310 = tpu.dynamic_rotate %193 by %c953_i32_199 dim 1 : vector<8x1024xf32>, i32 -> vector<8x1024xf32>
    %c24_200 = arith.constant 24 : index
    %c0_201 = arith.constant 0 : index
    %311 = vector.load %arg2[%c24_200, %c0_201] : memref<27x1024xf32, #tpu.memory_space<vmem>>, vector<1x1024xf32>
    %312 = vector.broadcast %311 : vector<1x1024xf32> to vector<8x1024xf32>
    %313 = arith.mulf %310, %312 : vector<8x1024xf32>
    %c192_202 = arith.constant 192 : index
    %c0_203 = arith.constant 0 : index
    %314 = vector.load %arg8[%c192_202, %c0_203] : memref<216x1024xf32, #tpu.memory_space<vmem>>, vector<8x1024xf32>
    tpu.vector_store %arg8[%c192_202, %c0_203], %313 {strides = array<i32>} : memref<216x1024xf32, #tpu.memory_space<vmem>>, vector<8x1024xf32>,
    %c952_i32_204 = arith.constant 952 : i32
    %315 = tpu.dynamic_rotate %193 by %c952_i32_204 dim 1 : vector<8x1024xf32>, i32 -> vector<8x1024xf32>
    %c25_205 = arith.constant 25 : index
    %c0_206 = arith.constant 0 : index
    %316 = vector.load %arg2[%c25_205, %c0_206] : memref<27x1024xf32, #tpu.memory_space<vmem>>, vector<1x1024xf32>
    %317 = vector.broadcast %316 : vector<1x1024xf32> to vector<8x1024xf32>
    %318 = arith.mulf %315, %317 : vector<8x1024xf32>
    %c200_207 = arith.constant 200 : index
    %c0_208 = arith.constant 0 : index
    %319 = vector.load %arg8[%c200_207, %c0_208] : memref<216x1024xf32, #tpu.memory_space<vmem>>, vector<8x1024xf32>
    tpu.vector_store %arg8[%c200_207, %c0_208], %318 {strides = array<i32>} : memref<216x1024xf32, #tpu.memory_space<vmem>>, vector<8x1024xf32>,
    %c951_i32_209 = arith.constant 951 : i32
    %320 = tpu.dynamic_rotate %193 by %c951_i32_209 dim 1 : vector<8x1024xf32>, i32 -> vector<8x1024xf32>
    %c26_210 = arith.constant 26 : index
    %c0_211 = arith.constant 0 : index
    %321 = vector.load %arg2[%c26_210, %c0_211] : memref<27x1024xf32, #tpu.memory_space<vmem>>, vector<1x1024xf32>
    %322 = vector.broadcast %321 : vector<1x1024xf32> to vector<8x1024xf32>
    %323 = arith.mulf %320, %322 : vector<8x1024xf32>
    %c208_212 = arith.constant 208 : index
    %c0_213 = arith.constant 0 : index
    %324 = vector.load %arg8[%c208_212, %c0_213] : memref<216x1024xf32, #tpu.memory_space<vmem>>, vector<8x1024xf32>
    tpu.vector_store %arg8[%c208_212, %c0_213], %323 {strides = array<i32>} : memref<216x1024xf32, #tpu.memory_space<vmem>>, vector<8x1024xf32>,
    %c0_214 = arith.constant 0 : index
    %c0_215 = arith.constant 0 : index
    %325 = vector.load %arg4[%c0_214, %c0_215] : memref<8x216xf32, #tpu.memory_space<vmem>>, vector<8x216xf32>
    %c0_216 = arith.constant 0 : index
    %c0_217 = arith.constant 0 : index
    %326 = vector.load %arg8[%c0_216, %c0_217] : memref<216x1024xf32, #tpu.memory_space<vmem>>, vector<216x1024xf32>
    %cst_218 = arith.constant dense<0.000000e+00> : vector<8x1024xf32>
    %327 = tpu.matmul %325, %326, %cst_218 {dimension_numbers = #tpu.dot_dimension_numbers<[1], [0], [0], [1], [0, 0, 1, 1], [], []>} : vector<8x216xf32>, vector<216x1024xf32>, vector<8x1024xf32> -> vector<8x1024xf32>
    %c0_219 = arith.constant 0 : index
    %c0_220 = arith.constant 0 : index
    %328 = vector.load %arg5[%c0_219, %c0_220] : memref<8x8xf32, #tpu.memory_space<vmem>>, vector<8x8xf32>
    %cst_221 = arith.constant dense<0.000000e+00> : vector<8x1024xf32>
    %329 = tpu.matmul %328, %0, %cst_221 {dimension_numbers = #tpu.dot_dimension_numbers<[1], [0], [0], [1], [0, 0, 1, 1], [], []>} : vector<8x8xf32>, vector<8x1024xf32>, vector<8x1024xf32> -> vector<8x1024xf32>
    %330 = vector.broadcast %6 : vector<8x1xf32> to vector<8x1024xf32>
    %331 = arith.addf %329, %330 : vector<8x1024xf32>
    %332 = vector.extract_strided_slice %327 {offsets = [0, 0], sizes = [8, 512], strides = [1, 1]} : vector<8x1024xf32> to vector<8x512xf32>
    %cst_222 = arith.constant dense<0.000000e+00> : vector<8xf32>
    %333 = vector.multi_reduction <add>, %332, %cst_222 [1] : vector<8x512xf32> to vector<8xf32>
    %334 = vector.shape_cast %333 : vector<8xf32> to vector<8x1xf32>
    %cst_223 = arith.constant 0.001953125 : f32
    %335 = vector.broadcast %cst_223 : f32 to vector<8x1xf32>
    %336 = arith.mulf %334, %335 : vector<8x1xf32>
    %337 = arith.mulf %332, %332 : vector<8x512xf32>
    %cst_224 = arith.constant dense<0.000000e+00> : vector<8xf32>
    %338 = vector.multi_reduction <add>, %337, %cst_224 [1] : vector<8x512xf32> to vector<8xf32>
    %339 = vector.shape_cast %338 : vector<8xf32> to vector<8x1xf32>
    %cst_225 = arith.constant 0.001953125 : f32
    %340 = vector.broadcast %cst_225 : f32 to vector<8x1xf32>
    %341 = arith.mulf %339, %340 : vector<8x1xf32>
    %342 = arith.mulf %336, %336 : vector<8x1xf32>
    %343 = arith.subf %341, %342 : vector<8x1xf32>
    %cst_226 = arith.constant 9.99999974E-6 : f32
    %344 = vector.broadcast %cst_226 : f32 to vector<8x1xf32>
    %345 = arith.addf %343, %344 : vector<8x1xf32>
    %346 = math.rsqrt %345 : vector<8x1xf32>
    %347 = vector.broadcast %336 : vector<8x1xf32> to vector<8x512xf32>
    %348 = arith.subf %332, %347 : vector<8x512xf32>
    %349 = vector.broadcast %346 : vector<8x1xf32> to vector<8x512xf32>
    %350 = arith.mulf %348, %349 : vector<8x512xf32>
    %351 = vector.broadcast %4 : vector<8x1xf32> to vector<8x512xf32>
    %352 = arith.mulf %350, %351 : vector<8x512xf32>
    %353 = vector.broadcast %5 : vector<8x1xf32> to vector<8x512xf32>
    %354 = arith.addf %352, %353 : vector<8x512xf32>
    %355 = vector.extract_strided_slice %331 {offsets = [0, 0], sizes = [8, 512], strides = [1, 1]} : vector<8x1024xf32> to vector<8x512xf32>
    %356 = arith.addf %354, %355 : vector<8x512xf32>
    %cst_227 = arith.constant 0.000000e+00 : f32
    %357 = vector.broadcast %cst_227 : f32 to vector<8x512xf32>
    %358 = arith.maximumf %356, %357 : vector<8x512xf32>
    %c0_228 = arith.constant 0 : index
    %c0_229 = arith.constant 0 : index
    %359 = vector.load %arg7[%c0_228, %c0_229] : memref<8x1024xf32, #tpu.memory_space<vmem>>, vector<8x512xf32>
    tpu.vector_store %arg7[%c0_228, %c0_229], %358 {strides = array<i32>} : memref<8x1024xf32, #tpu.memory_space<vmem>>, vector<8x512xf32>,
    %360 = vector.extract_strided_slice %327 {offsets = [0, 512], sizes = [8, 512], strides = [1, 1]} : vector<8x1024xf32> to vector<8x512xf32>
    %cst_230 = arith.constant dense<0.000000e+00> : vector<8xf32>
    %361 = vector.multi_reduction <add>, %360, %cst_230 [1] : vector<8x512xf32> to vector<8xf32>
    %362 = vector.shape_cast %361 : vector<8xf32> to vector<8x1xf32>
    %cst_231 = arith.constant 0.001953125 : f32
    %363 = vector.broadcast %cst_231 : f32 to vector<8x1xf32>
    %364 = arith.mulf %362, %363 : vector<8x1xf32>
    %365 = arith.mulf %360, %360 : vector<8x512xf32>
    %cst_232 = arith.constant dense<0.000000e+00> : vector<8xf32>
    %366 = vector.multi_reduction <add>, %365, %cst_232 [1] : vector<8x512xf32> to vector<8xf32>
    %367 = vector.shape_cast %366 : vector<8xf32> to vector<8x1xf32>
    %cst_233 = arith.constant 0.001953125 : f32
    %368 = vector.broadcast %cst_233 : f32 to vector<8x1xf32>
    %369 = arith.mulf %367, %368 : vector<8x1xf32>
    %370 = arith.mulf %364, %364 : vector<8x1xf32>
    %371 = arith.subf %369, %370 : vector<8x1xf32>
    %cst_234 = arith.constant 9.99999974E-6 : f32
    %372 = vector.broadcast %cst_234 : f32 to vector<8x1xf32>
    %373 = arith.addf %371, %372 : vector<8x1xf32>
    %374 = math.rsqrt %373 : vector<8x1xf32>
    %375 = vector.broadcast %364 : vector<8x1xf32> to vector<8x512xf32>
    %376 = arith.subf %360, %375 : vector<8x512xf32>
    %377 = vector.broadcast %374 : vector<8x1xf32> to vector<8x512xf32>
    %378 = arith.mulf %376, %377 : vector<8x512xf32>
    %379 = vector.broadcast %4 : vector<8x1xf32> to vector<8x512xf32>
    %380 = arith.mulf %378, %379 : vector<8x512xf32>
    %381 = vector.broadcast %5 : vector<8x1xf32> to vector<8x512xf32>
    %382 = arith.addf %380, %381 : vector<8x512xf32>
    %383 = vector.extract_strided_slice %331 {offsets = [0, 512], sizes = [8, 512], strides = [1, 1]} : vector<8x1024xf32> to vector<8x512xf32>
    %384 = arith.addf %382, %383 : vector<8x512xf32>
    %cst_235 = arith.constant 0.000000e+00 : f32
    %385 = vector.broadcast %cst_235 : f32 to vector<8x512xf32>
    %386 = arith.maximumf %384, %385 : vector<8x512xf32>
    %c0_236 = arith.constant 0 : index
    %c512_237 = arith.constant 512 : index
    %387 = vector.load %arg7[%c0_236, %c512_237] : memref<8x1024xf32, #tpu.memory_space<vmem>>, vector<8x512xf32>
    tpu.vector_store %arg7[%c0_236, %c512_237], %386 {strides = array<i32>} : memref<8x1024xf32, #tpu.memory_space<vmem>>, vector<8x512xf32>,
    return
  }
  func.func @transform_0(%arg0: i32) -> (i32, i32) {
    %c0_i32 = arith.constant 0 : i32
    %c0_i32_0 = arith.constant 0 : i32
    return %c0_i32, %arg0 : i32, i32
  }
  func.func @transform_1(%arg0: i32) -> (i32, i32) {
    %c0_i32 = arith.constant 0 : i32
    %c0_i32_0 = arith.constant 0 : i32
    %c0_i32_1 = arith.constant 0 : i32
    return %c0_i32, %c0_i32_0 : i32, i32
  }
  func.func @transform_2(%arg0: i32) -> (i32, i32) {
    %c0_i32 = arith.constant 0 : i32
    %c0_i32_0 = arith.constant 0 : i32
    %c0_i32_1 = arith.constant 0 : i32
    return %c0_i32, %c0_i32_0 : i32, i32
  }
  func.func @transform_3(%arg0: i32) -> (i32, i32) {
    %c0_i32 = arith.constant 0 : i32
    %c0_i32_0 = arith.constant 0 : i32
    %c0_i32_1 = arith.constant 0 : i32
    return %c0_i32, %c0_i32_0 : i32, i32
  }
  func.func @transform_4(%arg0: i32) -> (i32, i32) {
    %c0_i32 = arith.constant 0 : i32
    %c0_i32_0 = arith.constant 0 : i32
    %c0_i32_1 = arith.constant 0 : i32
    return %c0_i32, %c0_i32_0 : i32, i32
  }
  func.func @transform_5(%arg0: i32) -> (i32, i32) {
    %c0_i32 = arith.constant 0 : i32
    %c0_i32_0 = arith.constant 0 : i32
    %c0_i32_1 = arith.constant 0 : i32
    return %c0_i32, %c0_i32_0 : i32, i32
  }
  func.func @transform_6(%arg0: i32) -> (i32, i32) {
    %c0_i32 = arith.constant 0 : i32
    %c0_i32_0 = arith.constant 0 : i32
    return %c0_i32, %arg0 : i32, i32
  }
}

</mosaic_0001>

<bundles_post_ra>
// kernel: tpu_custom_call.1
= control target key start
LH: loop header
LB: loop body
LE: loop exit
PB: predicated region body
PF: predicated region fallthrough
CT: control target
= control target key end

     0   :  { %s10950_s0 = inlined_call_operand.hbm [shape: f32[8,2048], index: 0, kind: input, shape index: {}]   ;;  %s10951_s1 = inlined_call_operand.hbm [shape: f32[27,1024], index: 1, kind: input, shape index: {}]   ;;  %s10952_s2 = inlined_call_operand.hbm [shape: f32[8,216], index: 2, kind: input, shape index: {}]   ;;  %s10953_s3 = inlined_call_operand.hbm [shape: f32[8,216], index: 3, kind: input, shape index: {}]   ;;  %s10954_s4 = inlined_call_operand.vmem [shape: f32[8,8], index: 4, kind: input, shape index: {}]   ;;  %s10955_s5 = inlined_call_operand.vmem [shape: f32[8,8], index: 5, kind: input, shape index: {}]   ;;  %s10956_s6 = inlined_call_operand.hbm [shape: f32[8,2048], index: 6, kind: output, shape index: {}]  }
   0x1   :  { %11221 = sst [smem:[#allocation116_spill]] %s10950_s0 }
   0x2   :  { %11222 = sst [smem:[#allocation117_spill]] %s10951_s1 }
   0x3   :  { %11 = vsyncpa [#allocation5], 0 }
   0x4   :  { %13 = vsyncpa [#allocation5 + $0x1], 0 }
   0x5   :  { %14 = vsyncpa [#allocation8], 0 }
   0x6   :  { %15 = vsyncpa [#allocation11], 0 }
   0x7   :  { %16 = vsyncpa [#allocation6], 0 }
   0x8   :  { %18 = vsyncpa [#allocation6 + $0x1], 0  ;;  %s6781_s21 = smov 0   ;;  %s6783_s22 = smov 0  }
   0x9   :  { %s6785_s23 = smov 0   ;;  %s6787_s24 = smov 0  }
   0xa LB: > { %s6802_s25 = sadd.s32 4294967295, %s6714_s24   ;;  %s5942_s26 = sadd.s32 4294967294, %s6714_s24   ;;  %s6714_s24 = sphi %s6787_s24, %s11870_s24   ;;  %s6710_s23 = sphi %s6785_s23, %s11869_s23   ;;  %s6706_s22 = sphi %s6783_s22, %s11868_s22   ;;  %s6702_s21 = sphi %s6781_s21, %s11867_s21  }
   0xb   : > { %p44_p0 = scmp.ne.s32.totalorder %s6706_s22, %s6702_s21  ;;  %p10957_p1 = scmp.eq.s32.totalorder %s6802_s25, 0 }
   0xc   : > { %p179_p3 = scmp.eq.s32.totalorder %s5942_s26, 1  ;;  %p5943_p5 = scmp.ge.s32.totalorder %s6714_s24, 1 }
   0xd   : > { %p6811_p4 = por %p10957_p1, %p44_p0  ;;  %p186_p7 = scmp.lt.s32.totalorder %s6714_s24, 3 }
   0xe   : > { %p6816_p6 = por %p179_p3, %p44_p0  ;;  %s6716_s30 = smov [#allocation7]  }
   0xf   : > { %s11223_s27 = scalar_select %p6811_p4, 1, 0 }
  0x10   : > { %s11224_s28 = scalar_select %p6816_p6, 1, 0 }
  0x11   : > { %p6821_p8 = pnand %p5943_p5, %p186_p7  ;;  %s198_s7 = sshll.u32 %s6716_s30, 4  ;;  %s6825_s7 = int_to_ptr.vmem [resolvable:$true] %s198_s7 }
  0x12   : > { %s6717_s9 = smov [#allocation9]   ;;  %s6718_s11 = smov [#allocation10]  }
  0x13   : > { %s11225_s29 = scalar_select %p6821_p8, 1, 0 }
  0x14   : > { %p6408_p9 = pneg %p6821_p8  ;;  %s212_s10 = sshll.u32 %s6717_s9, 4  ;;  %s6836_s10 = int_to_ptr.vmem [resolvable:$true] %s212_s10 }
  0x15   : > { %s6838_s12 = sshll.u32 %s6718_s11, 4  ;;  %s11227_s1 = sld [smem:[#allocation117_spill]]  ;;  %s224_s12 = int_to_ptr.vmem [resolvable:$true] %s6838_s12 }
  0x16   : > { %p6832_p11 = pnand %p6408_p9, %p10957_p1 }
  0x18   : > { %p6848_p13 = pneg %p6832_p11 }
  0x1b   : > { %s6526_s15 = scalar_lea.hbm %s11227_s1, 4096 }
  0x1c   : > { %p6527_p12 = scmp.ne.s32.totalorder %s11227_s1, %s6526_s15  ;;  %p6533_p5 = scmp.lt.u32.totalorder %s6526_s15, %s11227_s1 }
  0x1e   : > { %p6529_p0 = pnand %p6848_p13, %p6527_p12 }
  0x20   : > { %p6530_p3 = pneg %p6529_p0 }
  0x22   : > { %p6535_p7 = pnand %p6533_p5, %p6530_p3 }
  0x24   : > { %6538 = shalt.err (!%p6535_p7)
}
  0x25   : > { %s6539_s26 = scalar_lea.vmem %s6825_s7, 4096  ;;  %p6547_p2 = scmp.lt.s32.totalorder %s6825_s7, %s6825_s7 }
  0x26   : > { %p6540_p9 = scmp.ne.s32.totalorder %s6825_s7, %s6539_s26  ;;  %p6548_p6 = scmp.lt.s32.totalorder %s6539_s26, %s6539_s26 }
  0x28   : > { %p6542_p10 = pnand %p6540_p9, %p6848_p13  ;;  %p6549_p12 = por %p6548_p6, %p6547_p2 }
  0x2a   : > { %p6543_p1 = pneg %p6542_p10 }
  0x2c   : > { %p6550_p0 = pnand %p6549_p12, %p6543_p1 }
  0x2e   : > { %6553 = shalt.err (!%p6550_p0)
}
  0x2f   : > { %s6719_s30 = smov 1024   ;;  %s6720_s9 = smov 64  }
  0x30   : > { %6411 = dma.hbm_to_vmem [thread:$0]  (!%p6832_p11), %s11227_s1, 4096, %s6825_s7, [#allocation8], %s6719_s30, %s6719_s30, %s6720_s9  }
  0x31   : > { %s6554_s16 = scalar_lea.hbm %s10952_s2, 256 }
  0x32   : > { %p6555_p2 = scmp.ne.s32.totalorder %s10952_s2, %s6554_s16  ;;  %p6561_p10 = scmp.lt.u32.totalorder %s6554_s16, %s10952_s2 }
  0x34   : > { %p6557_p1 = pnand %p6555_p2, %p6848_p13 }
  0x36   : > { %p6558_p6 = pneg %p6557_p1 }
  0x38   : > { %p6563_p3 = pnand %p6561_p10, %p6558_p6 }
  0x3a   : > { %6566 = shalt.err (!%p6563_p3)
}
  0x3b   : > { %s6567_s7 = scalar_lea.vmem %s6836_s10, 256  ;;  %p6575_p12 = scmp.lt.s32.totalorder %s6836_s10, %s6836_s10 }
  0x3c   : > { %p6568_p5 = scmp.ne.s32.totalorder %s6836_s10, %s6567_s7  ;;  %p6576_p0 = scmp.lt.s32.totalorder %s6567_s7, %s6567_s7 }
  0x3e   : > { %p6570_p7 = pnand %p6568_p5, %p6848_p13  ;;  %p6577_p2 = por %p6576_p0, %p6575_p12 }
  0x40   : > { %p6571_p9 = pneg %p6570_p7 }
  0x42   : > { %p6578_p1 = pnand %p6577_p2, %p6571_p9 }
  0x44   : > { %6581 = shalt.err (!%p6578_p1)
}
  0x45   : > { %6414 = dma.hbm_to_vmem [thread:$0]  (!%p6832_p11), %s10952_s2, 256, %s6836_s10, [#allocation8]  }
  0x46   : > { %s6582_s14 = scalar_lea.hbm %s10953_s3, 256 }
  0x47   : > { %p6583_p6 = scmp.ne.s32.totalorder %s10953_s3, %s6582_s14  ;;  %p6589_p5 = scmp.lt.u32.totalorder %s6582_s14, %s10953_s3 }
  0x49   : > { %p6585_p10 = pnand %p6583_p6, %p6848_p13 }
  0x4b   : > { %p6586_p3 = pneg %p6585_p10 }
  0x4d   : > { %p6591_p7 = pnand %p6589_p5, %p6586_p3 }
  0x4f   : > { %6594 = shalt.err (!%p6591_p7)
}
  0x50   : > { %s6595_s20 = scalar_lea.vmem %s224_s12, 256  ;;  %p6603_p2 = scmp.lt.s32.totalorder %s224_s12, %s224_s12 }
  0x51   : > { %p6596_p9 = scmp.ne.s32.totalorder %s224_s12, %s6595_s20  ;;  %p6604_p1 = scmp.lt.s32.totalorder %s6595_s20, %s6595_s20 }
  0x53   : > { %p6598_p12 = pnand %p6596_p9, %p6848_p13  ;;  %p6605_p4 = por %p6604_p1, %p6603_p2 }
  0x55   : > { %p6599_p0 = pneg %p6598_p12 }
  0x57   : > { %p6606_p8 = pnand %p6605_p4, %p6599_p0 }
  0x59   : > { %6609 = shalt.err (!%p6606_p8)
}
  0x5a   : > { %6417 = dma.hbm_to_vmem [thread:$0]  (!%p6832_p11), %s10953_s3, 256, %s224_s12, [#allocation11]  }
  0x5b   : > { %s6912_s18 = sadd.s32 1, %s6714_s24   ;;  %s31_s8 = sadd.s32 1, %s6710_s23 }
  0x5c   : > { %s28_s7 = ssub.s32 %s6714_s24, %s6912_s18  ;;  %p38_p8 = scmp.ne.s32.totalorder %s6710_s23, %s6706_s22 }
  0x5d   : > { %p29_p4 = scmp.eq.s32.totalorder %s28_s7, 0  ;;  %p39_p13 = scmp.eq.s32.totalorder %s6714_s24, 0 }
  0x5e   : > { %p6429_p6 = scmp.lt.s32.totalorder %s6714_s24, 2  ;;  %p11229_p3 = scmp.eq.s32.totalorder %s6802_s25, 1 }
  0x5f   : > { %s6922_s30 = scalar_select %p29_p4, %s6710_s23, %s31_s8  }
  0x60   : > { %p40_p10 = por %p39_p13, %p38_p8  ;;  %p6926_p5 = por %p11229_p3, %p38_p8 }
  0x61   : > { %s240_s11 = sand.u32 1, %s6710_s23   ;;  %s5974_s13 = sshll.u32 %s6714_s24, 10 }
  0x62   : > { %s5948_s12 = sshll.u32 %s240_s11, 6  ;;  %s11231_s0 = sld [smem:[#allocation116_spill]] }
  0x63   : > { %s244_s17 = scalar_lea.vmem [#allocation4], %s5948_s12  ;;  %p6937_p11 = pnand %p6429_p6, %p40_p10 }
  0x64   : > { %s252_s19 = sshll.u32 %s244_s17, 4  ;;  %s241_s10 = scalar_lea.sflag [#allocation5], %s240_s11  ;;  %s6941_s19 = int_to_ptr.vmem [resolvable:$true] %s252_s19 }
  0x65   : > { %p6612_p9 = pneg %p6937_p11 }
  0x68   : > { %s6935_s16 = scalar_lea.hbm %s11231_s0, %s5974_s13  ;;  %s6615_s13 = scalar_lea.hbm %s11231_s0, 2048 }
  0x69   : > { %s6610_s26 = scalar_lea.hbm %s6935_s16, 1024  ;;  %p6616_p2 = scmp.lt.u32.totalorder %s6935_s16, %s11231_s0 }
  0x6a   : > { %p6611_p7 = scmp.ne.s32.totalorder %s6935_s16, %s6610_s26  ;;  %p6617_p1 = scmp.lt.u32.totalorder %s6615_s13, %s6610_s26 }
  0x6b   : > { %p6619_p8 = scmp.lt.u32.totalorder %s6610_s26, %s6935_s16 }
  0x6c   : > { %p6613_p12 = pnand %p6612_p9, %p6611_p7  ;;  %p6618_p4 = por %p6617_p1, %p6616_p2 }
  0x6e   : > { %p6614_p0 = pneg %p6613_p12  ;;  %p6620_p13 = por %p6619_p8, %p6618_p4 }
  0x70   : > { %p6621_p6 = pnand %p6620_p13, %p6614_p0 }
  0x72   : > { %6624 = shalt.err (!%p6621_p6)
}
  0x73   : > { %s6625_s11 = scalar_lea.vmem %s6941_s19, 1024  ;;  %s6721_s15 = smov [#allocation4]  }
  0x74   : > { %p6626_p10 = scmp.ne.s32.totalorder %s6941_s19, %s6625_s11  ;;  %s6630_s17 = sshll.u32 %s6721_s15, 4  ;;  %s6631_s17 = int_to_ptr.vmem [resolvable:$false] %s6630_s17 }
  0x75   : > { %s6632_s7 = scalar_lea.vmem %s6631_s17, 2048  ;;  %p6633_p12 = scmp.lt.s32.totalorder %s6941_s19, %s6631_s17 }
  0x76   : > { %p6628_p3 = pnand %p6626_p10, %p6612_p9  ;;  %p6634_p2 = scmp.lt.s32.totalorder %s6632_s7, %s6625_s11 }
  0x78   : > { %p6629_p7 = pneg %p6628_p3  ;;  %p6635_p1 = por %p6634_p2, %p6633_p12 }
  0x7a   : > { %p6636_p4 = pnand %p6635_p1, %p6629_p7 }
  0x7c   : > { %6639 = shalt.err (!%p6636_p4)
}
  0x7d   : > { %6421 = dma.hbm_to_vmem [thread:$0]  (!%p6937_p11), %s6935_s16, 1024, %s6941_s19, %s241_s10  }
  0x7e   : > { %p11233_p0 = scmp.ne.s32.totalorder %s11225_s29, 0 }
  0x80   : > { %261 = sbr.rel (%p11233_p0) target bundleno = 1690 (0x69a), region = 44 }
  0x87   : > { %s6971_s26 = sand.u32 1, %s6706_s22   ;;  %p11234_p9 = scmp.ne.s32.totalorder %s11223_s27, 0 }
  0x88   : > { %s10960_s8 = sshll.u32 %s6971_s26, 6  ;;  %s264_s13 = scalar_lea.sflag [#allocation5], %s6971_s26 }
  0x89   : > { %s6977_s12 = scalar_lea.vmem [#allocation4], %s10960_s8 }
  0x8a   : > { %6685 = dma.done.wait (%p11234_p9), %s264_s13, 1024  }
  0x8b   : > { %6687 = vsyncadd (%p11234_p9), %s264_s13, 4294966272  ;;  %p11235_p11 = scmp.eq.s32.totalorder %s6802_s25, 0 }
  0x8d   : > { %6689 = dma.done.wait (%p11235_p11), [#allocation8], 4352   ;;  %p11236_p8 = pmov %p11235_p11 }
  0x8f   : > { %6691 = vsyncadd (%p11236_p8), [#allocation8], 4294962944  ;;  %p11237_p13 = pmov %p11236_p8 }
  0x90   : > { %p11238_p6 = pmov %p11236_p8 }
  0x91   : > { %6693 = dma.done.wait (%p11237_p13), [#allocation11], 256  }
  0x92   : > { %6695 = vsyncadd (%p11238_p6), [#allocation11], 4294967040  ;;  %v6992_v0 = vld [vmem:[%s6977_s12] sm:$0xff]  ;;  %s11077_s27 = smov 72   ;;  %s11071_s29 = smov 73   ;;  %v6999_v1 = vld [vmem:[%s6977_s12 + $0x8] sm:$0xff]  ;;  %v335_v5 = vlaneseq }
  0x93   : > { %406 = vrot.lane.b32.xlu1 %v6992_v0, %s11077_s27  ;;  %319 = vrot.lane.b32.xlu0 %v6992_v0, %s11071_s29  ;;  %v7006_v2 = vld [vmem:[%s6977_s12 + $0x38] sm:$0xff]  ;;  %v7016_v4 = vld [vmem:[%s6977_s12 + $0x10] sm:$0xff]  ;;  %s11092_s16 = smov 71   ;;  %s11073_s19 = smov 65   ;;  %vm11070_vm8 = vcmask 719872  }
  0x94   : > { %v7013_v3 = vld [vmem:[%s6977_s12 + $0x18] sm:$0xff]  ;;  %s11090_s20 = smov 64   ;;  %s11075_s10 = smov 63   ;;  %v7114_v6 = vshrl.u32 %v335_v5, 7  ;;  %v7124_v15 = vand.u32 127, %v335_v5 }
  0x95   : > { %s11088_s14 = smov 57   ;;  %s11028_s11 = smov 56   ;;  %v1852_v7 = vld [vmem:[#allocation7 + $0x83] ss:$8 sm:$0xf] }
  0x96   : > { %s11026_s15 = smov 55   ;;  %s11016_s17 = smov 9   ;;  %v1853_v8 = vld [vmem:[#allocation7 + $0x83] ss:$8 sm:$0xf0]  ;;  %v7129_v17 = vsub.s32 1, %v7114_v6 }
  0x97   : > { %408 = vrot.lane.b32.xlu1 %v6999_v1, %s11077_s27  ;;  %321 = vrot.lane.b32.xlu0 %v6999_v1, %s11071_s29  ;;  %s11024_s7 = smov 8   ;;  %s10961_s13 = smov 7   ;;  %v346_v9 = vld [vmem:[#allocation7] ss:$8 sm:$0xf]  ;;  %v7133_v19 = vor.u32 %v1853_v8, %v1852_v7  ;;  %v7138_v21 = vsub.s32 0, %v7114_v6 }
  0x98   : > { %v347_v10 = vld [vmem:[#allocation7] ss:$8 sm:$0xf0]  ;;  %v432_v11 = vld [vmem:[#allocation7 + $0x1] ss:$8 sm:$0xf] }
  0x99   : > { %v433_v12 = vld [vmem:[#allocation7 + $0x1] ss:$8 sm:$0xf0]  ;;  %v1791_v13 = vld [vmem:[#allocation7 + $0x82] ss:$8 sm:$0xf]  ;;  %v7126_v16 = vor.u32 %v347_v10, %v346_v9  ;;  %v1859_v28 = vrot.slane %v7133_v19, %v7138_v21  ;;  %v1863_v60 = vrot.slane %v7133_v19, %v7129_v17 }
  0x9a   : > { %v1792_v14 = vld [vmem:[#allocation7 + $0x82] ss:$8 sm:$0xf0]  ;;  %11239 = vst [vmem:[#allocation17_spill] sm:$0xff] %v7129_v17  ;;  %v7131_v18 = vor.u32 %v433_v12, %v432_v11  ;;  %11240 = vst [vmem:[#allocation18_spill] sm:$0xff] %v7138_v21  ;;  %v7141_v24 = vsub.s32 7, %v7114_v6 }
  0x9b   : > { %420 = vrot.lane.b32.xlu1 %v7006_v2, %s11077_s27  ;;  %333 = vrot.lane.b32.xlu0 %v7006_v2, %s11071_s29  ;;  %v7135_v20 = vor.u32 %v1792_v14, %v1791_v13  ;;  %vm422_vm0 = vcmp.lt.s32.totalorder %v7124_v15, 72  ;;  %vm337_vm1 = vcmp.lt.s32.totalorder %v7124_v15, 73  ;;  %v357_v25 = vrot.slane %v7126_v16, %v7129_v17  ;;  %s10963_s8 = smov 1   ;;  %v518_v51 = vld [vmem:[#allocation7 + $0x2] ss:$8 sm:$0xf] }
  0x9c   : > { %11241 = vst [vmem:[#allocation19_spill] sm:$0xff] %v7141_v24  ;;  %v443_v26 = vrot.slane %v7131_v18, %v7129_v17  ;;  %v1887_v31 = vrot.slane %v7133_v19, %v7141_v24  ;;  %v353_v37 = vrot.slane %v7126_v16, %v7138_v21  ;;  %v439_v40 = vrot.slane %v7131_v18, %v7138_v21  ;;  %v519_v52 = vld [vmem:[#allocation7 + $0x2] ss:$8 sm:$0xf0]  ;;  %s11492_s0 = smov 63   ;;  %s11514_s1 = smov 64  }
  0x9d   : > { %v1798_v27 = vrot.slane %v7135_v20, %v7138_v21  ;;  %v1826_v32 = vrot.slane %v7135_v20, %v7141_v24  ;;  %v7191_v46 = vsub.s32 2, %v7114_v6  ;;  %v7194_v47 = vsub.s32 3, %v7114_v6  ;;  %v1913_v54 = vld [vmem:[#allocation7 + $0x84] ss:$8 sm:$0xf] }
  0x9e   : > { %v1914_v55 = vld [vmem:[#allocation7 + $0x84] ss:$8 sm:$0xf0]  ;;  %v1802_v58 = vrot.slane %v7135_v20, %v7129_v17  ;;  %v604_v61 = vld [vmem:[#allocation7 + $0x3] ss:$8 sm:$0xf]  ;;  %v7231_v14 = vor.u32 %v519_v52, %v518_v51 }
  0x9f   : > { %325 = vrot.lane.b32.xlu1 %v7013_v3, %s11071_s29  ;;  %323 = vrot.lane.b32.xlu0 %v7016_v4, %s11071_s29  ;;  %11244 = vst [vmem:[#allocation22_spill] sm:$0xff] %v7191_v46  ;;  %11245 = vst [vmem:[#allocation23_spill] sm:$0xff] %v7194_v47  ;;  %v605_v62 = vld [vmem:[#allocation7 + $0x3] ss:$8 sm:$0xf0]  ;;  %v365_v7 = vrot.slane %v7126_v16, %v7194_v47  ;;  %v1806_v8 = vrot.slane %v7135_v20, %v7191_v46  ;;  %vm508_vm2 = vcmp.lt.s32.totalorder %v7124_v15, 71 }
  0xa0   : > { %v1974_v9 = vld [vmem:[#allocation7 + $0x85] ss:$8 sm:$0xf]  ;;  %v451_v12 = vrot.slane %v7131_v18, %v7194_v47  ;;  %v1867_v13 = vrot.slane %v7133_v19, %v7191_v46  ;;  %vm594_vm3 = vcmp.lt.s32.totalorder %v7124_v15, 65  ;;  %vm680_vm4 = vcmp.lt.s32.totalorder %v7124_v15, 64 }
  0xa1   : > { %v1975_v10 = vld [vmem:[#allocation7 + $0x85] ss:$8 sm:$0xf0]  ;;  %vm766_vm5 = vcmp.lt.s32.totalorder %v7124_v15, 63  ;;  %vm852_vm6 = vcmp.lt.s32.totalorder %v7124_v15, 57  ;;  %vm938_vm7 = vcmp.lt.s32.totalorder %v7124_v15, 56 }
  0xa2   : > { %vm1024_vm9 = vcmp.lt.s32.totalorder %v7124_v15, 55  ;;  %vm1110_vm10 = vcmp.lt.s32.totalorder %v7124_v15, 9  ;;  %vm11067_vm11 = vcmp.lt.s32.totalorder %v7124_v15, 8  ;;  %vm11069_vm12 = vcmp.lt.s32.totalorder %v7124_v15, 7 }
  0xa3   : > { %412 = vrot.lane.b32.xlu1 %v7013_v3, %s11077_s27  ;;  %410 = vrot.lane.b32.xlu0 %v7016_v4, %s11077_s27  ;;  %vm11068_vm13 = vcmp.lt.s32.totalorder %v7124_v15, 1  ;;  %vm11043_vm14 = vcmp.lt.s32.totalorder %v7124_v15, 127  ;;  %vm11044_vm15 = vcmp.lt.s32.totalorder %v7124_v15, 121 }
  0xa7   : > { %494 = vrot.lane.b32.xlu1 %v6999_v1, %s11092_s16  ;;  %492 = vrot.lane.b32.xlu0 %v6992_v0, %s11092_s16 }
  0xab   : > { %580 = vrot.lane.b32.xlu1 %v6999_v1, %s11073_s19  ;;  %578 = vrot.lane.b32.xlu0 %v6992_v0, %s11073_s19 }
  0xaf   : > { %592 = vrot.lane.b32.xlu1 %v7006_v2, %s11073_s19  ;;  %506 = vrot.lane.b32.xlu0 %v7006_v2, %s11092_s16 }
  0xb3   : > { %498 = vrot.lane.b32.xlu1 %v7013_v3, %s11092_s16  ;;  %496 = vrot.lane.b32.xlu0 %v7016_v4, %s11092_s16 }
  0xb7   : > { %584 = vrot.lane.b32.xlu1 %v7013_v3, %s11073_s19  ;;  %582 = vrot.lane.b32.xlu0 %v7016_v4, %s11073_s19 }
  0xbb   : > { %666 = vrot.lane.b32.xlu1 %v6999_v1, %s11090_s20  ;;  %664 = vrot.lane.b32.xlu0 %v6992_v0, %s11090_s20 }
  0xbf   : > { %752 = vrot.lane.b32.xlu1 %v6999_v1, %s11075_s10  ;;  %750 = vrot.lane.b32.xlu0 %v6992_v0, %s11075_s10 }
  0xc3   : > { %764 = vrot.lane.b32.xlu1 %v7006_v2, %s11075_s10  ;;  %678 = vrot.lane.b32.xlu0 %v7006_v2, %s11090_s20 }
  0xc7   : > { %670 = vrot.lane.b32.xlu1 %v7013_v3, %s11090_s20  ;;  %668 = vrot.lane.b32.xlu0 %v7016_v4, %s11090_s20 }
  0xcb   : > { %756 = vrot.lane.b32.xlu1 %v7013_v3, %s11075_s10  ;;  %754 = vrot.lane.b32.xlu0 %v7016_v4, %s11075_s10 }
  0xcf   : > { %838 = vrot.lane.b32.xlu1 %v6999_v1, %s11088_s14  ;;  %836 = vrot.lane.b32.xlu0 %v6992_v0, %s11088_s14 }
  0xd3   : > { %924 = vrot.lane.b32.xlu1 %v6999_v1, %s11028_s11  ;;  %922 = vrot.lane.b32.xlu0 %v6992_v0, %s11028_s11 }
  0xd7   : > { %936 = vrot.lane.b32.xlu1 %v7006_v2, %s11028_s11  ;;  %850 = vrot.lane.b32.xlu0 %v7006_v2, %s11088_s14 }
  0xdb   : > { %842 = vrot.lane.b32.xlu1 %v7013_v3, %s11088_s14  ;;  %840 = vrot.lane.b32.xlu0 %v7016_v4, %s11088_s14 }
  0xdf   : > { %928 = vrot.lane.b32.xlu1 %v7013_v3, %s11028_s11  ;;  %926 = vrot.lane.b32.xlu0 %v7016_v4, %s11028_s11 }
  0xe3   : > { %1010 = vrot.lane.b32.xlu1 %v6999_v1, %s11026_s15  ;;  %1008 = vrot.lane.b32.xlu0 %v6992_v0, %s11026_s15 }
  0xe7   : > { %1096 = vrot.lane.b32.xlu1 %v6999_v1, %s11016_s17  ;;  %1094 = vrot.lane.b32.xlu0 %v6992_v0, %s11016_s17 }
  0xeb   : > { %1108 = vrot.lane.b32.xlu1 %v7006_v2, %s11016_s17  ;;  %1022 = vrot.lane.b32.xlu0 %v7006_v2, %s11026_s15 }
  0xef   : > { %1014 = vrot.lane.b32.xlu1 %v7013_v3, %s11026_s15  ;;  %1012 = vrot.lane.b32.xlu0 %v7016_v4, %s11026_s15 }
  0xf3   : > { %1100 = vrot.lane.b32.xlu1 %v7013_v3, %s11016_s17  ;;  %1098 = vrot.lane.b32.xlu0 %v7016_v4, %s11016_s17 }
  0xf7   : > { %1182 = vrot.lane.b32.xlu1 %v6999_v1, %s11024_s7  ;;  %1180 = vrot.lane.b32.xlu0 %v6992_v0, %s11024_s7 }
  0xfb   : > { %1268 = vrot.lane.b32.xlu1 %v6999_v1, %s10961_s13  ;;  %1266 = vrot.lane.b32.xlu0 %v6992_v0, %s10961_s13 }
  0xff   : > { %1280 = vrot.lane.b32.xlu1 %v7006_v2, %s10961_s13  ;;  %1194 = vrot.lane.b32.xlu0 %v7006_v2, %s11024_s7 }
 0x103   : > { %1186 = vrot.lane.b32.xlu1 %v7013_v3, %s11024_s7  ;;  %1184 = vrot.lane.b32.xlu0 %v7016_v4, %s11024_s7 }
 0x105   : > { %v407_v22 = vpop.permute.xlu1 %406  ;;  %v320_v23 = vpop.permute.xlu0 %319 }
 0x107   : > { %1272 = vrot.lane.b32.xlu1 %v7013_v3, %s10961_s13  ;;  %1270 = vrot.lane.b32.xlu0 %v7016_v4, %s10961_s13  ;;  %s10965_s13 = smov 127  }
 0x109   : > { %v7157_v29 = vpop.permute.xlu1 %408  ;;  %v322_v30 = vpop.permute.xlu0 %321 }
 0x10a   : > { %v344_v33 = vsel %vm337_vm1, %v320_v23, %v322_v30  ;;  %v429_v34 = vsel %vm422_vm0, %v407_v22, %v7157_v29 }
 0x10b   : > { %1354 = vrot.lane.b32.xlu1 %v6999_v1, %s10963_s8  ;;  %1352 = vrot.lane.b32.xlu0 %v6992_v0, %s10963_s8  ;;  %v391_v35 = vmul.f32 %v357_v25, %v344_v33  ;;  %v477_v36 = vmul.f32 %v443_v26, %v429_v34  ;;  %v7174_v38 = vmul.f32 %v1798_v27, %v344_v33 }
 0x10c   : > { %v7176_v39 = vmul.f32 %v1859_v28, %v429_v34  ;;  %v7241_v28 = vor.u32 %v1914_v55, %v1913_v54 }
 0x10d   : > { %v7180_v41 = vpop.permute.xlu1 %420  ;;  %v7182_v42 = vpop.permute.xlu0 %333  ;;  %v5976_v43 = vpack.c.bf16 %v477_v36, %v391_v35 }
 0x10e   : > { %11242 = vst [vmem:[#allocation20_spill] sm:$0xff] %v7180_v41  ;;  %11243 = vst [vmem:[#allocation21_spill] sm:$0xff] %v7182_v42  ;;  %v430_v44 = vsel %vm422_vm0, %v7180_v41, %v407_v22  ;;  %v345_v45 = vsel %vm337_vm1, %v7182_v42, %v320_v23  ;;  %v361_v22 = vrot.slane %v7126_v16, %v7191_v46 }
 0x10f   : > { %v7196_v48 = vmul.f32 %v1887_v31, %v430_v44  ;;  %v7198_v49 = vmul.f32 %v1826_v32, %v345_v45  ;;  %1356 = vrot.lane.b32.xlu1 %v7016_v4, %s10963_s8  ;;  %1366 = vrot.lane.b32.xlu0 %v7006_v2, %s10963_s8  ;;  %v390_v50 = vmul.f32 %v353_v37, %v345_v45 }
 0x110   : > { %5977 = vmatprep.subr.bf16.mxu0 %v5976_v43  ;;  %v476_v53 = vmul.f32 %v439_v40, %v430_v44  ;;  %v447_v23 = vrot.slane %v7131_v18, %v7191_v46  ;;  %v7245_v31 = vor.u32 %v1975_v10, %v1974_v9  ;;  %v1920_v54 = vrot.slane %v7241_v28, %v7138_v21 }
 0x111   : > { %11246 = vst [vmem:[#allocation24_spill] sm:$0xff] %v7196_v48  ;;  %11247 = vst [vmem:[#allocation25_spill] sm:$0xff] %v7198_v49  ;;  %v7206_v57 = vpop.permute.xlu1 %325  ;;  %v324_v59 = vpop.permute.xlu0 %323  ;;  %v525_v9 = vrot.slane %v7231_v14, %v7138_v21  ;;  %v1948_v10 = vrot.slane %v7241_v28, %v7141_v24  ;;  %v1924_v63 = vrot.slane %v7241_v28, %v7129_v17 }
 0x112   : > { %v343_v2 = vsel %vm337_vm1, %v322_v30, %v324_v59  ;;  %v5978_v5 = vpack.c.bf16 %v476_v53, %v390_v50  ;;  %v342_v11 = vsel %vm337_vm1, %v324_v59, %v7206_v57  ;;  %v7243_v30 = vor.u32 %v605_v62, %v604_v61 }
 0x113   : > { %1448 = vrot.lane.b32.xlu1 %v6999_v1, %s10965_s13  ;;  %1358 = vrot.lane.b32.xlu0 %v7013_v3, %s10963_s8  ;;  %v7237_v25 = vmul.f32 %v1802_v58, %v343_v2  ;;  %v393_v33 = vmul.f32 %v365_v7, %v342_v11  ;;  %v7253_v35 = vmul.f32 %v1806_v8, %v342_v11  ;;  %s10973_s8 = smov 121  }
 0x114   : > { %5979 = vmatpush1.bf16.msra.mxu0 %v5978_v5  ;;  %v529_v53 = vrot.slane %v7231_v14, %v7129_v17  ;;  %v615_v59 = vrot.slane %v7243_v30, %v7129_v17  ;;  %v2009_v5 = vrot.slane %v7245_v31, %v7141_v24  ;;  %v1928_v52 = vrot.slane %v7241_v28, %v7191_v46 }
 0x115   : > { %v7239_v26 = vpop.permute.xlu1 %412  ;;  %v411_v27 = vpop.permute.xlu0 %410  ;;  %11248 = vst [vmem:[#allocation26_spill] sm:$0xff] %v7253_v35 }
 0x116   : > { %v428_v32 = vsel %vm422_vm0, %v7157_v29, %v411_v27  ;;  %v427_v34 = vsel %vm422_vm0, %v411_v27, %v7239_v26  ;;  %v392_v29 = vmul.f32 %v361_v22, %v343_v2  ;;  %v611_v2 = vrot.slane %v7243_v30, %v7138_v21  ;;  %v7309_v27 = vld [vmem:[%s6977_s12 + $0x20] sm:$0xff] }
 0x117   : > { %v7255_v36 = vmul.f32 %v1863_v60, %v428_v32  ;;  %1534 = vrot.lane.b32.xlu1 %v6999_v1, %s10973_s8  ;;  %1450 = vrot.lane.b32.xlu0 %v7016_v4, %s10965_s13  ;;  %v479_v37 = vmul.f32 %v451_v12, %v427_v34  ;;  %v7261_v40 = vmul.f32 %v1867_v13, %v427_v34 }
 0x118   : > { %v478_v43 = vmul.f32 %v447_v23, %v428_v32  ;;  %v1981_v60 = vrot.slane %v7245_v31, %v7138_v21 }
 0x119   : > { %11249 = vst [vmem:[#allocation27_spill] sm:$0xff] %v7261_v40  ;;  %v495_v44 = vpop.permute.xlu1 %494  ;;  %v493_v45 = vpop.permute.xlu0 %492  ;;  %v6028_v50 = vpack.c.bf16 %v479_v37, %v393_v33 }
 0x11a   : > { %v6030_v55 = vpack.c.bf16 %v478_v43, %v392_v29  ;;  %v515_v58 = vsel %vm508_vm2, %v493_v45, %v495_v44 }
 0x11b   : > { %1446 = vrot.lane.b32.xlu1 %v6992_v0, %s10965_s13  ;;  %1536 = vrot.lane.b32.xlu0 %v7016_v4, %s10973_s8  ;;  %v563_v7 = vmul.f32 %v529_v53, %v515_v58  ;;  %v7296_v11 = vmul.f32 %v1920_v54, %v515_v58  ;;  %v690_v54 = vld [vmem:[#allocation7 + $0x4] ss:$8 sm:$0xf]  ;;  %v2035_v58 = vld [vmem:[#allocation7 + $0x86] ss:$8 sm:$0xf] }
 0x11c   : > { %6029 = vmatprep.subr.bf16.mxu1 %v6028_v50 }
 0x11d   : > { %6031 = vmatpush1.bf16.msra.mxu1 %v6030_v55  ;;  %v7283_v61 = vpop.permute.xlu1 %580  ;;  %v579_v62 = vpop.permute.xlu0 %578  ;;  %v691_v55 = vld [vmem:[#allocation7 + $0x4] ss:$8 sm:$0xf0] }
 0x11e   : > { %v601_v8 = vsel %vm594_vm3, %v579_v62, %v7283_v61  ;;  %v7358_v33 = vor.u32 %v691_v55, %v690_v54 }
 0x11f   : > { %v649_v12 = vmul.f32 %v615_v59, %v601_v8  ;;  %v7298_v13 = vmul.f32 %v1981_v60, %v601_v8  ;;  %1452 = vrot.lane.b32.xlu1 %v7013_v3, %s10965_s13  ;;  %1532 = vrot.lane.b32.xlu0 %v6992_v0, %s10973_s8  ;;  %v2036_v59 = vld [vmem:[#allocation7 + $0x86] ss:$8 sm:$0xf0]  ;;  %v533_v8 = vrot.slane %v7231_v14, %v7191_v46 }
 0x120   : > { %v7360_v56 = vor.u32 %v2036_v59, %v2035_v58 }
 0x121   : > { %v7304_v22 = vpop.permute.xlu1 %592  ;;  %v7306_v23 = vpop.permute.xlu0 %506  ;;  %v5980_v32 = vpack.c.bf16 %v649_v12, %v563_v7  ;;  %v623_v12 = vrot.slane %v7243_v30, %v7194_v47  ;;  %v1989_v7 = vrot.slane %v7245_v31, %v7191_v46 }
 0x122   : > { %11250 = vst [vmem:[#allocation28_spill] sm:$0xff] %v7304_v22  ;;  %11251 = vst [vmem:[#allocation29_spill] sm:$0xff] %v7306_v23  ;;  %v602_v34 = vsel %vm594_vm3, %v7304_v22, %v579_v62  ;;  %v516_v37 = vsel %vm508_vm2, %v7306_v23, %v493_v45 }
 0x123   : > { %v648_v29 = vmul.f32 %v611_v2, %v602_v34  ;;  %v7319_v43 = vmul.f32 %v2009_v5, %v602_v34  ;;  %v562_v50 = vmul.f32 %v525_v9, %v516_v37  ;;  %v7321_v53 = vmul.f32 %v1948_v10, %v516_v37  ;;  %1538 = vrot.lane.b32.xlu1 %v7013_v3, %s10973_s8  ;;  %v776_v2 = vld [vmem:[#allocation7 + $0x5] ss:$8 sm:$0xf]  ;;  %v2097_v34 = vld [vmem:[#allocation7 + $0x87] ss:$8 sm:$0xf0] }
 0x124   : > { %1454 = vrot.lane.b32.xlu0 %v7309_v27, %s10965_s13  ;;  %5981 = vmatprep.subr.bf16.mxu0 %v5980_v32  ;;  %v777_v5 = vld [vmem:[#allocation7 + $0x5] ss:$8 sm:$0xf0]  ;;  %v537_v9 = vrot.slane %v7231_v14, %v7194_v47  ;;  %v619_v10 = vrot.slane %v7243_v30, %v7191_v46  ;;  %v2096_v32 = vld [vmem:[#allocation7 + $0x87] ss:$8 sm:$0xf] }
 0x125   : > { %11252 = vst [vmem:[#allocation30_spill] sm:$0xff] %v7319_v43  ;;  %11253 = vst [vmem:[#allocation31_spill] sm:$0xff] %v7321_v53  ;;  %v7327_v60 = vpop.permute.xlu1 %498  ;;  %v497_v45 = vpop.permute.xlu0 %496  ;;  %v5982_v62 = vpack.c.bf16 %v648_v29, %v562_v50  ;;  %s11049_s13 = smov 120   ;;  %v1985_v50 = vrot.slane %v7245_v31, %v7129_v17  ;;  %v7362_v51 = vor.u32 %v777_v5, %v776_v2 }
 0x126   : > { %v513_v37 = vsel %vm508_vm2, %v497_v45, %v7327_v60  ;;  %v514_v29 = vsel %vm508_vm2, %v495_v44, %v497_v45  ;;  %v7364_v53 = vor.u32 %v2097_v34, %v2096_v32  ;;  %v697_v32 = vrot.slane %v7358_v33, %v7138_v21 }
 0x127   : > { %1620 = vrot.lane.b32.xlu1 %v6999_v1, %s11049_s13  ;;  %5983 = vmatpush1.bf16.msra.mxu0 %v5982_v62  ;;  %v564_v43 = vmul.f32 %v533_v8, %v514_v29  ;;  %v565_v49 = vmul.f32 %v537_v9, %v513_v37  ;;  %v7378_v58 = vmul.f32 %v1924_v63, %v514_v29 }
 0x128   : > { %1540 = vrot.lane.b32.xlu0 %v7309_v27, %s10973_s8  ;;  %s11047_s8 = smov 119   ;;  %v7380_v59 = vmul.f32 %v1928_v52, %v513_v37  ;;  %v2042_v63 = vrot.slane %v7360_v56, %v7138_v21  ;;  %v2103_v52 = vrot.slane %v7364_v53, %v7138_v21  ;;  %v783_v9 = vrot.slane %v7362_v51, %v7138_v21 }
 0x129   : > { %v7356_v44 = vpop.permute.xlu1 %584  ;;  %v583_v45 = vpop.permute.xlu0 %582 }
 0x12a   : > { %11254 = vst [vmem:[#allocation32_spill] sm:$0xff] %v7356_v44  ;;  %v599_v48 = vsel %vm594_vm3, %v583_v45, %v7356_v44  ;;  %v600_v62 = vsel %vm594_vm3, %v7283_v61, %v583_v45  ;;  %11256 = vst [vmem:[#allocation34_spill] sm:$0xff] %v7380_v59 }
 0x12b   : > { %v650_v23 = vmul.f32 %v619_v10, %v600_v62  ;;  %v651_v22 = vmul.f32 %v623_v12, %v599_v48  ;;  %v7372_v54 = vmul.f32 %v1985_v50, %v600_v62  ;;  %v7374_v55 = vmul.f32 %v1989_v7, %v599_v48  ;;  %1706 = vrot.lane.b32.xlu1 %v6999_v1, %s11047_s8 }
 0x12c   : > { %1622 = vrot.lane.b32.xlu0 %v7016_v4, %s11049_s13  ;;  %v701_v48 = vrot.slane %v7358_v33, %v7129_v17  ;;  %v2131_v12 = vrot.slane %v7364_v53, %v7141_v24 }
 0x12d   : > { %11255 = vst [vmem:[#allocation33_spill] sm:$0xff] %v7374_v55  ;;  %v667_v2 = vpop.permute.xlu1 %666  ;;  %v665_v61 = vpop.permute.xlu0 %664  ;;  %v6032_v5 = vpack.c.bf16 %v651_v22, %v565_v49  ;;  %v6034_v8 = vpack.c.bf16 %v650_v23, %v564_v43  ;;  %v787_v49 = vrot.slane %v7362_v51, %v7129_v17 }
 0x12e   : > { %v687_v22 = vsel %vm680_vm4, %v665_v61, %v667_v2 }
 0x12f   : > { %1618 = vrot.lane.b32.xlu1 %v6992_v0, %s11049_s13  ;;  %6033 = vmatprep.subr.bf16.mxu1 %v6032_v5  ;;  %v735_v34 = vmul.f32 %v701_v48, %v687_v22  ;;  %v7417_v37 = vmul.f32 %v2042_v63, %v687_v22 }
 0x130   : > { %1708 = vrot.lane.b32.xlu0 %v7016_v4, %s11047_s8  ;;  %6035 = vmatpush1.bf16.msra.mxu1 %v6034_v8  ;;  %v2070_v4 = vrot.slane %v7360_v56, %v7141_v24 }
 0x131   : > { %v7404_v23 = vpop.permute.xlu1 %752  ;;  %v751_v43 = vpop.permute.xlu0 %750  ;;  %11257 = vst [vmem:[#allocation35_spill] sm:$0xff] %v7417_v37 }
 0x132   : > { %v773_v10 = vsel %vm766_vm5, %v751_v43, %v7404_v23 }
 0x133   : > { %v821_v29 = vmul.f32 %v787_v49, %v773_v10  ;;  %v7419_v50 = vmul.f32 %v2103_v52, %v773_v10  ;;  %1624 = vrot.lane.b32.xlu1 %v7013_v3, %s11049_s13  ;;  %v862_v10 = vld [vmem:[#allocation7 + $0x6] ss:$8 sm:$0xf] }
 0x134   : > { %1704 = vrot.lane.b32.xlu0 %v6992_v0, %s11047_s8 }
 0x135   : > { %11258 = vst [vmem:[#allocation36_spill] sm:$0xff] %v7419_v50  ;;  %v7425_v45 = vpop.permute.xlu1 %764  ;;  %v7427_v62 = vpop.permute.xlu0 %678  ;;  %v5984_v5 = vpack.c.bf16 %v821_v29, %v735_v34  ;;  %v863_v34 = vld [vmem:[#allocation7 + $0x6] ss:$8 sm:$0xf0] }
 0x136   : > { %11259 = vst [vmem:[#allocation37_spill] sm:$0xff] %v7425_v45  ;;  %11260 = vst [vmem:[#allocation38_spill] sm:$0xff] %v7427_v62  ;;  %v774_v48 = vsel %vm766_vm5, %v7425_v45, %v751_v43  ;;  %v688_v63 = vsel %vm680_vm4, %v7427_v62, %v665_v61  ;;  %v2157_v43 = vld [vmem:[#allocation7 + $0xc0] ss:$8 sm:$0xf]  ;;  %v705_v61 = vrot.slane %v7358_v33, %v7191_v46 }
 0x137   : > { %v820_v49 = vmul.f32 %v783_v9, %v774_v48  ;;  %v7437_v52 = vmul.f32 %v2131_v12, %v774_v48  ;;  %v734_v0 = vmul.f32 %v697_v32, %v688_v63  ;;  %v7439_v22 = vmul.f32 %v2070_v4, %v688_v63  ;;  %1710 = vrot.lane.b32.xlu1 %v7013_v3, %s11047_s8  ;;  %v2158_v29 = vld [vmem:[#allocation7 + $0xc0] ss:$8 sm:$0xf0]  ;;  %v948_v4 = vld [vmem:[#allocation7 + $0x7] ss:$8 sm:$0xf] }
 0x138   : > { %1626 = vrot.lane.b32.xlu0 %v7309_v27, %s11049_s13  ;;  %5985 = vmatprep.subr.bf16.mxu0 %v5984_v5  ;;  %v709_v9 = vrot.slane %v7358_v33, %v7194_v47  ;;  %v949_v3 = vld [vmem:[#allocation7 + $0x7] ss:$8 sm:$0xf0]  ;;  %v2046_v5 = vrot.slane %v7360_v56, %v7129_v17  ;;  %v2050_v63 = vrot.slane %v7360_v56, %v7191_v46  ;;  %v2218_v62 = vld [vmem:[#allocation7 + $0xc1] ss:$8 sm:$0xf] }
 0x139   : > { %11261 = vst [vmem:[#allocation39_spill] sm:$0xff] %v7437_v52  ;;  %11262 = vst [vmem:[#allocation40_spill] sm:$0xff] %v7439_v22  ;;  %v7445_v1 = vpop.permute.xlu1 %670  ;;  %v669_v12 = vpop.permute.xlu0 %668  ;;  %v5986_v32 = vpack.c.bf16 %v820_v49, %v734_v0  ;;  %v2219_v49 = vld [vmem:[#allocation7 + $0xc1] ss:$8 sm:$0xf0]  ;;  %v791_v0 = vrot.slane %v7362_v51, %v7191_v46  ;;  %v795_v48 = vrot.slane %v7362_v51, %v7194_v47 }
 0x13a   : > { %11263 = vst [vmem:[#allocation41_spill] sm:$0xff] %v7445_v1  ;;  %v685_v8 = vsel %vm680_vm4, %v669_v12, %v7445_v1  ;;  %v686_v7 = vsel %vm680_vm4, %v667_v2, %v669_v12  ;;  %v2107_v22 = vrot.slane %v7364_v53, %v7129_v17  ;;  %v2111_v52 = vrot.slane %v7364_v53, %v7191_v46 }
 0x13b   : > { %327 = vrot.lane.b32.xlu1 %v7309_v27, %s11071_s29  ;;  %5987 = vmatpush1.bf16.msra.mxu0 %v5986_v32  ;;  %v7474_v2 = vor.u32 %v863_v34, %v862_v10  ;;  %v7476_v12 = vor.u32 %v2158_v29, %v2157_v43  ;;  %v736_v45 = vmul.f32 %v705_v61, %v686_v7 }
 0x13c   : > { %1712 = vrot.lane.b32.xlu0 %v7309_v27, %s11047_s8  ;;  %v737_v41 = vmul.f32 %v709_v9, %v685_v8  ;;  %v7480_v55 = vor.u32 %v949_v3, %v948_v4  ;;  %v7482_v35 = vor.u32 %v2219_v49, %v2218_v62  ;;  %v7484_v40 = vmul.f32 %v2046_v5, %v686_v7 }
 0x13d   : > { %v7478_v42 = vpop.permute.xlu1 %756  ;;  %v755_v59 = vpop.permute.xlu0 %754  ;;  %v7486_v1 = vmul.f32 %v2050_v63, %v685_v8 }
 0x13e   : > { %11264 = vst [vmem:[#allocation42_spill] sm:$0xff] %v7478_v42  ;;  %v771_v10 = vsel %vm766_vm5, %v755_v59, %v7478_v42  ;;  %v772_v34 = vsel %vm766_vm5, %v7404_v23, %v755_v59  ;;  %v955_v5 = vrot.slane %v7480_v55, %v7138_v21  ;;  %v2253_v49 = vrot.slane %v7482_v35, %v7141_v24  ;;  %v7546_v23 = vld [vmem:[#allocation9 + $0x8] sm:$0xff] }
 0x13f   : > { %11265 = vst [vmem:[#allocation43_spill] sm:$0xff] %v7486_v1  ;;  %v822_v43 = vmul.f32 %v791_v0, %v772_v34  ;;  %v823_v29 = vmul.f32 %v795_v48, %v771_v10  ;;  %v7494_v61 = vmul.f32 %v2107_v22, %v772_v34  ;;  %v7496_v9 = vmul.f32 %v2111_v52, %v771_v10 }
 0x140   : > { %500 = vrot.lane.b32.xlu1 %v7309_v27, %s11092_s16  ;;  %414 = vrot.lane.b32.xlu0 %v7309_v27, %s11077_s27  ;;  %v873_v52 = vrot.slane %v7474_v2, %v7129_v17  ;;  %v2164_v22 = vrot.slane %v7476_v12, %v7138_v21  ;;  %v869_v0 = vrot.slane %v7474_v2, %v7138_v21 }
 0x141   : > { %11266 = vst [vmem:[#allocation44_spill] sm:$0xff] %v7496_v9  ;;  %v839_v7 = vpop.permute.xlu1 %838  ;;  %v837_v62 = vpop.permute.xlu0 %836  ;;  %v6036_v8 = vpack.c.bf16 %v823_v29, %v737_v41  ;;  %v6038_v32 = vpack.c.bf16 %v822_v43, %v736_v45  ;;  %v959_v41 = vrot.slane %v7480_v55, %v7129_v17  ;;  %v2225_v45 = vrot.slane %v7482_v35, %v7138_v21  ;;  %v1120_v9 = vld [vmem:[#allocation7 + $0x41] ss:$8 sm:$0xf] }
 0x142   : > { %v859_v4 = vsel %vm852_vm6, %v837_v62, %v839_v7  ;;  %v2192_v10 = vrot.slane %v7476_v12, %v7141_v24  ;;  %11269 = vst [vmem:[#allocation47_spill] sm:$0xff] %v7546_v23  ;;  %5957 = vmatprep.mubr.msk.f32.mxu0 %vm11070_vm8, %v7546_v23  ;;  %5958 = vmatprep.mubr.msk.f32.mxu1 %vm11070_vm8, %v7546_v23 }
 0x143   : > { %6037 = vmatprep.subr.bf16.mxu1 %v6036_v8  ;;  %v907_v34 = vmul.f32 %v873_v52, %v859_v4  ;;  %v7535_v43 = vmul.f32 %v2164_v22, %v859_v4 }
 0x144   : > { %672 = vrot.lane.b32.xlu1 %v7309_v27, %s11090_s20  ;;  %586 = vrot.lane.b32.xlu0 %v7309_v27, %s11073_s19 }
 0x145   : > { %6039 = vmatpush1.bf16.msra.mxu1 %v6038_v32  ;;  %v7522_v3 = vpop.permute.xlu1 %924  ;;  %v923_v48 = vpop.permute.xlu0 %922  ;;  %11267 = vst [vmem:[#allocation45_spill] sm:$0xff] %v7535_v43  ;;  %v7544_v32 = vld [vmem:[%s6977_s12 + $0x28] sm:$0xff] }
 0x146   : > { %v945_v63 = vsel %vm938_vm7, %v923_v48, %v7522_v3 }
 0x147   : > { %v993_v29 = vmul.f32 %v959_v41, %v945_v63  ;;  %v7537_v8 = vmul.f32 %v2225_v45, %v945_v63  ;;  %v7573_v41 = vld [vmem:[%s6977_s12 + $0x30] sm:$0xff] }
 0x148   : > { %844 = vrot.lane.b32.xlu1 %v7309_v27, %s11088_s14  ;;  %758 = vrot.lane.b32.xlu0 %v7309_v27, %s11075_s10 }
 0x149   : > { %11268 = vst [vmem:[#allocation46_spill] sm:$0xff] %v7537_v8  ;;  %v7548_v59 = vpop.permute.xlu1 %936  ;;  %v7550_v52 = vpop.permute.xlu0 %850  ;;  %v5988_v22 = vpack.c.bf16 %v993_v29, %v907_v34 }
 0x14a   : > { %11270 = vst [vmem:[#allocation48_spill] sm:$0xff] %v7548_v59  ;;  %11271 = vst [vmem:[#allocation49_spill] sm:$0xff] %v7550_v52  ;;  %v946_v45 = vsel %vm938_vm7, %v7548_v59, %v923_v48  ;;  %v860_v4 = vsel %vm852_vm6, %v7550_v52, %v837_v62  ;;  %v877_v62 = vrot.slane %v7474_v2, %v7191_v46 }
 0x14b   : > { %v992_v63 = vmul.f32 %v955_v5, %v946_v45  ;;  %v7564_v1 = vmul.f32 %v2253_v49, %v946_v45  ;;  %v906_v34 = vmul.f32 %v869_v0, %v860_v4  ;;  %v7566_v29 = vmul.f32 %v2192_v10, %v860_v4  ;;  %5989 = vmatprep.subr.bf16.mxu0 %v5988_v22  ;;  %v1034_v10 = vld [vmem:[#allocation7 + $0x40] ss:$8 sm:$0xf] }
 0x14c   : > { %329 = vrot.lane.b32.xlu1 %v7544_v32, %s11071_s29  ;;  %930 = vrot.lane.b32.xlu0 %v7309_v27, %s11028_s11  ;;  %v881_v5 = vrot.slane %v7474_v2, %v7194_v47  ;;  %v1035_v45 = vld [vmem:[#allocation7 + $0x40] ss:$8 sm:$0xf0]  ;;  %v2168_v22 = vrot.slane %v7476_v12, %v7129_v17  ;;  %v2172_v52 = vrot.slane %v7476_v12, %v7191_v46 }
 0x14d   : > { %11272 = vst [vmem:[#allocation50_spill] sm:$0xff] %v7564_v1  ;;  %11273 = vst [vmem:[#allocation51_spill] sm:$0xff] %v7566_v29  ;;  %v7575_v48 = vpop.permute.xlu1 %842  ;;  %v841_v49 = vpop.permute.xlu0 %840  ;;  %v5990_v0 = vpack.c.bf16 %v992_v63, %v906_v34  ;;  %v1121_v63 = vld [vmem:[#allocation7 + $0x41] ss:$8 sm:$0xf0]  ;;  %v963_v34 = vrot.slane %v7480_v55, %v7191_v46  ;;  %v967_v4 = vrot.slane %v7480_v55, %v7194_v47 }
 0x14e   : > { %11274 = vst [vmem:[#allocation52_spill] sm:$0xff] %v7575_v48  ;;  %v857_v59 = vsel %vm852_vm6, %v841_v49, %v7575_v48  ;;  %v858_v23 = vsel %vm852_vm6, %v839_v7, %v841_v49  ;;  %v2229_v29 = vrot.slane %v7482_v35, %v7129_v17  ;;  %v2233_v1 = vrot.slane %v7482_v35, %v7191_v46 }
 0x14f   : > { %5991 = vmatpush1.bf16.msra.mxu0 %v5990_v0  ;;  %v908_v7 = vmul.f32 %v877_v62, %v858_v23  ;;  %v909_v49 = vmul.f32 %v881_v5, %v857_v59  ;;  %v7606_v8 = vor.u32 %v1035_v45, %v1034_v10  ;;  %v7608_v42 = vor.u32 %v1121_v63, %v1120_v9 }
 0x150   : > { %331 = vrot.lane.b32.xlu1 %v7573_v41, %s11071_s29  ;;  %416 = vrot.lane.b32.xlu0 %v7544_v32, %s11077_s27  ;;  %v7610_v37 = vmul.f32 %v2168_v22, %v858_v23  ;;  %v7612_v50 = vmul.f32 %v2172_v52, %v857_v59 }
 0x151   : > { %v7604_v48 = vpop.permute.xlu1 %928  ;;  %v927_v43 = vpop.permute.xlu0 %926  ;;  %11276 = vst [vmem:[#allocation54_spill] sm:$0xff] %v7606_v8  ;;  %11277 = vst [vmem:[#allocation55_spill] sm:$0xff] %v7608_v42 }
 0x152   : > { %11275 = vst [vmem:[#allocation53_spill] sm:$0xff] %v7604_v48  ;;  %11278 = vst [vmem:[#allocation56_spill] sm:$0xff] %v7612_v50  ;;  %v943_v24 = vsel %vm938_vm7, %v927_v43, %v7604_v48  ;;  %v944_v62 = vsel %vm938_vm7, %v7522_v3, %v927_v43  ;;  %v1206_v43 = vld [vmem:[#allocation7 + $0x42] ss:$8 sm:$0xf] }
 0x153   : > { %v994_v5 = vmul.f32 %v963_v34, %v944_v62  ;;  %v995_v0 = vmul.f32 %v967_v4, %v943_v24  ;;  %v7620_v44 = vmul.f32 %v2229_v29, %v944_v62  ;;  %v7622_v10 = vmul.f32 %v2233_v1, %v943_v24 }
 0x154   : > { %1016 = vrot.lane.b32.xlu1 %v7309_v27, %s11026_s15  ;;  %418 = vrot.lane.b32.xlu0 %v7573_v41, %s11077_s27  ;;  %v1045_v24 = vrot.slane %v7606_v8, %v7129_v17  ;;  %v1131_v1 = vrot.slane %v7608_v42, %v7129_v17 }
 0x155   : > { %11279 = vst [vmem:[#allocation57_spill] sm:$0xff] %v7622_v10  ;;  %v1011_v9 = vpop.permute.xlu1 %1010  ;;  %v1009_v59 = vpop.permute.xlu0 %1008  ;;  %v6040_v23 = vpack.c.bf16 %v995_v0, %v909_v49  ;;  %v6042_v52 = vpack.c.bf16 %v994_v5, %v908_v7  ;;  %v1127_v7 = vrot.slane %v7608_v42, %v7138_v21  ;;  %v1041_v49 = vrot.slane %v7606_v8, %v7138_v21 }
 0x156   : > { %v7642_v29 = vsel %vm1024_vm9, %v1009_v59, %v1011_v9 }
 0x157   : > { %6041 = vmatprep.subr.bf16.mxu1 %v6040_v23  ;;  %v1079_v63 = vmul.f32 %v1045_v24, %v7642_v29 }
 0x158   : > { %588 = vrot.lane.b32.xlu1 %v7544_v32, %s11073_s19  ;;  %502 = vrot.lane.b32.xlu0 %v7544_v32, %s11092_s16 }
 0x159   : > { %6043 = vmatpush1.bf16.msra.mxu1 %v6042_v52  ;;  %v1097_v45 = vpop.permute.xlu1 %1096  ;;  %v1095_v4 = vpop.permute.xlu0 %1094 }
 0x15a   : > { %v1117_v22 = vsel %vm1110_vm10, %v1095_v4, %v1097_v45 }
 0x15b   : > { %v1165_v34 = vmul.f32 %v1131_v1, %v1117_v22 }
 0x15c   : > { %590 = vrot.lane.b32.xlu1 %v7573_v41, %s11073_s19  ;;  %504 = vrot.lane.b32.xlu0 %v7573_v41, %s11092_s16 }
 0x15d   : > { %v7657_v62 = vpop.permute.xlu1 %1108  ;;  %v7659_v5 = vpop.permute.xlu0 %1022  ;;  %v5992_v0 = vpack.c.bf16 %v1165_v34, %v1079_v63 }
 0x15e   : > { %11280 = vst [vmem:[#allocation58_spill] sm:$0xff] %v7657_v62  ;;  %11281 = vst [vmem:[#allocation59_spill] sm:$0xff] %v7659_v5  ;;  %v1118_v23 = vsel %vm1110_vm10, %v7657_v62, %v1095_v4  ;;  %v7667_v52 = vsel %vm1024_vm9, %v7659_v5, %v1009_v59  ;;  %v1049_v4 = vrot.slane %v7606_v8, %v7191_v46  ;;  %v1207_v59 = vld [vmem:[#allocation7 + $0x42] ss:$8 sm:$0xf0] }
 0x15f   : > { %11282 = vst [vmem:[#allocation60_spill] sm:$0xff] %v7667_v52  ;;  %v1164_v24 = vmul.f32 %v1127_v7, %v1118_v23  ;;  %v1078_v1 = vmul.f32 %v1041_v49, %v7667_v52  ;;  %5993 = vmatprep.subr.bf16.mxu0 %v5992_v0  ;;  %v1053_v7 = vrot.slane %v7606_v8, %v7194_v47  ;;  %v1292_v23 = vld [vmem:[#allocation7 + $0x43] ss:$8 sm:$0xf] }
 0x160   : > { %760 = vrot.lane.b32.xlu1 %v7544_v32, %s11075_s10  ;;  %674 = vrot.lane.b32.xlu0 %v7544_v32, %s11090_s20  ;;  %v1135_v49 = vrot.slane %v7608_v42, %v7191_v46  ;;  %v1139_v0 = vrot.slane %v7608_v42, %v7194_v47  ;;  %v7704_v8 = vor.u32 %v1207_v59, %v1206_v43 }
 0x161   : > { %v7674_v22 = vpop.permute.xlu1 %1014  ;;  %v1013_v63 = vpop.permute.xlu0 %1012  ;;  %v5994_v34 = vpack.c.bf16 %v1164_v24, %v1078_v1  ;;  %v1293_v24 = vld [vmem:[#allocation7 + $0x43] ss:$8 sm:$0xf0] }
 0x162   : > { %11283 = vst [vmem:[#allocation61_spill] sm:$0xff] %v7674_v22  ;;  %v7689_v1 = vsel %vm1024_vm9, %v1013_v63, %v7674_v22  ;;  %v7693_v3 = vsel %vm1024_vm9, %v1011_v9, %v1013_v63  ;;  %11286 = vst [vmem:[#allocation64_spill] sm:$0xff] %v7704_v8  ;;  %v7706_v42 = vor.u32 %v1293_v24, %v1292_v23 }
 0x163   : > { %5995 = vmatpush1.bf16.msra.mxu0 %v5994_v34  ;;  %11284 = vst [vmem:[#allocation62_spill] sm:$0xff] %v7689_v1  ;;  %v1080_v9 = vmul.f32 %v1049_v4, %v7693_v3  ;;  %v1081_v63 = vmul.f32 %v1053_v7, %v7689_v1  ;;  %v1217_v59 = vrot.slane %v7704_v8, %v7129_v17 }
 0x164   : > { %762 = vrot.lane.b32.xlu1 %v7573_v41, %s11075_s10  ;;  %676 = vrot.lane.b32.xlu0 %v7573_v41, %s11090_s20  ;;  %11287 = vst [vmem:[#allocation65_spill] sm:$0xff] %v7706_v42  ;;  %v1213_v23 = vrot.slane %v7704_v8, %v7138_v21 }
 0x165   : > { %v7697_v34 = vpop.permute.xlu1 %1100  ;;  %v1099_v52 = vpop.permute.xlu0 %1098 }
 0x166   : > { %11285 = vst [vmem:[#allocation63_spill] sm:$0xff] %v7697_v34  ;;  %v1115_v62 = vsel %vm1110_vm10, %v1099_v52, %v7697_v34  ;;  %v1116_v5 = vsel %vm1110_vm10, %v1097_v45, %v1099_v52 }
 0x167   : > { %v1166_v22 = vmul.f32 %v1135_v49, %v1116_v5  ;;  %v1167_v50 = vmul.f32 %v1139_v0, %v1115_v62  ;;  %v1303_v62 = vrot.slane %v7706_v42, %v7129_v17  ;;  %v1299_v0 = vrot.slane %v7706_v42, %v7138_v21 }
 0x168   : > { %932 = vrot.lane.b32.xlu1 %v7544_v32, %s11028_s11  ;;  %846 = vrot.lane.b32.xlu0 %v7544_v32, %s11088_s14 }
 0x169   : > { %v1183_v34 = vpop.permute.xlu1 %1182  ;;  %v1181_v45 = vpop.permute.xlu0 %1180  ;;  %v6044_v43 = vpack.c.bf16 %v1167_v50, %v1081_v63  ;;  %v6046_v52 = vpack.c.bf16 %v1166_v22, %v1080_v9 }
 0x16a   : > { %v1203_v5 = vsel %vm11067_vm11, %v1181_v45, %v1183_v34 }
 0x16b   : > { %6045 = vmatprep.subr.bf16.mxu1 %v6044_v43  ;;  %v1251_v7 = vmul.f32 %v1217_v59, %v1203_v5  ;;  %v1378_v5 = vld [vmem:[#allocation7 + $0x44] ss:$8 sm:$0xf] }
 0x16c   : > { %934 = vrot.lane.b32.xlu1 %v7573_v41, %s11028_s11  ;;  %848 = vrot.lane.b32.xlu0 %v7573_v41, %s11088_s14  ;;  %s11301_s11 = smov 121  }
 0x16d   : > { %6047 = vmatpush1.bf16.msra.mxu1 %v6046_v52  ;;  %v1269_v50 = vpop.permute.xlu1 %1268  ;;  %v1267_v22 = vpop.permute.xlu0 %1266 }
 0x16e   : > { %v1289_v4 = vsel %vm11069_vm12, %v1267_v22, %v1269_v50 }
 0x16f   : > { %v1337_v49 = vmul.f32 %v1303_v62, %v1289_v4  ;;  %v1379_v4 = vld [vmem:[#allocation7 + $0x44] ss:$8 sm:$0xf0] }
 0x170   : > { %1102 = vrot.lane.b32.xlu1 %v7309_v27, %s11016_s17  ;;  %1018 = vrot.lane.b32.xlu0 %v7544_v32, %s11026_s15 }
 0x171   : > { %v7736_v24 = vpop.permute.xlu1 %1280  ;;  %v7738_v9 = vpop.permute.xlu0 %1194  ;;  %v5996_v63 = vpack.c.bf16 %v1337_v49, %v1251_v7 }
 0x172   : > { %11288 = vst [vmem:[#allocation66_spill] sm:$0xff] %v7736_v24  ;;  %11289 = vst [vmem:[#allocation67_spill] sm:$0xff] %v7738_v9  ;;  %v1290_v43 = vsel %vm11069_vm12, %v7736_v24, %v1267_v22  ;;  %v1204_v52 = vsel %vm11067_vm11, %v7738_v9, %v1181_v45  ;;  %v1221_v22 = vrot.slane %v7704_v8, %v7191_v46 }
 0x173   : > { %v1336_v59 = vmul.f32 %v1299_v0, %v1290_v43  ;;  %v1250_v62 = vmul.f32 %v1213_v23, %v1204_v52  ;;  %5997 = vmatprep.subr.bf16.mxu0 %v5996_v63  ;;  %v7754_v24 = vor.u32 %v1379_v4, %v1378_v5  ;;  %v1225_v45 = vrot.slane %v7704_v8, %v7194_v47 }
 0x174   : > { %1020 = vrot.lane.b32.xlu1 %v7573_v41, %s11026_s15  ;;  %1104 = vrot.lane.b32.xlu0 %v7544_v32, %s11016_s17  ;;  %v1307_v0 = vrot.slane %v7706_v42, %v7191_v46  ;;  %v1311_v23 = vrot.slane %v7706_v42, %v7194_v47  ;;  %s11299_s15 = smov 127  }
 0x175   : > { %v7750_v7 = vpop.permute.xlu1 %1186  ;;  %v1185_v49 = vpop.permute.xlu0 %1184  ;;  %v5998_v10 = vpack.c.bf16 %v1336_v59, %v1250_v62  ;;  %11291 = vst [vmem:[#allocation69_spill] sm:$0xff] %v7754_v24  ;;  %v1389_v5 = vrot.slane %v7754_v24, %v7129_v17 }
 0x176   : > { %11290 = vst [vmem:[#allocation68_spill] sm:$0xff] %v7750_v7  ;;  %v1201_v63 = vsel %vm11067_vm11, %v1185_v49, %v7750_v7  ;;  %v1202_v43 = vsel %vm11067_vm11, %v1183_v34, %v1185_v49 }
 0x177   : > { %5999 = vmatpush1.bf16.msra.mxu0 %v5998_v10  ;;  %v1252_v4 = vmul.f32 %v1221_v22, %v1202_v43  ;;  %v1253_v34 = vmul.f32 %v1225_v45, %v1201_v63  ;;  %v1385_v22 = vrot.slane %v7754_v24, %v7138_v21  ;;  %v1393_v63 = vrot.slane %v7754_v24, %v7191_v46 }
 0x178   : > { %1188 = vrot.lane.b32.xlu1 %v7309_v27, %s11024_s7  ;;  %1106 = vrot.lane.b32.xlu0 %v7573_v41, %s11016_s17  ;;  %s11293_s17 = smov 7  }
 0x179   : > { %v7771_v52 = vpop.permute.xlu1 %1272  ;;  %v1271_v59 = vpop.permute.xlu0 %1270 }
 0x17a   : > { %11292 = vst [vmem:[#allocation70_spill] sm:$0xff] %v7771_v52  ;;  %v1287_v10 = vsel %vm11069_vm12, %v1271_v59, %v7771_v52  ;;  %v1288_v62 = vsel %vm11069_vm12, %v1269_v50, %v1271_v59 }
 0x17b   : > { %v1338_v49 = vmul.f32 %v1307_v0, %v1288_v62  ;;  %v1339_v9 = vmul.f32 %v1311_v23, %v1287_v10  ;;  %v1397_v62 = vrot.slane %v7754_v24, %v7194_v47 }
 0x17c   : > { %1274 = vrot.lane.b32.xlu1 %v7309_v27, %s11293_s17  ;;  %1190 = vrot.lane.b32.xlu0 %v7544_v32, %s11024_s7 }
 0x17d   : > { %v1355_v7 = vpop.permute.xlu1 %1354  ;;  %v1353_v52 = vpop.permute.xlu0 %1352  ;;  %v6048_v42 = vpack.c.bf16 %v1339_v9, %v1253_v34  ;;  %v6050_v50 = vpack.c.bf16 %v1338_v49, %v1252_v4  ;;  %v6508_v9 = vld [vmem:[%s6977_s12 + $0x8] sm:$0xff] }
 0x17e   : > { %v1375_v59 = vsel %vm11068_vm13, %v1353_v52, %v1355_v7  ;;  %v1558_v4 = vld [vmem:[#allocation7 + $0x47] ss:$8 sm:$0xf] }
 0x17f   : > { %v1423_v8 = vmul.f32 %v1389_v5, %v1375_v59  ;;  %6049 = vmatprep.subr.bf16.mxu1 %v6048_v42  ;;  %v1472_v5 = vld [vmem:[#allocation7 + $0x46] ss:$8 sm:$0xf]  ;;  %v1559_v34 = vld [vmem:[#allocation7 + $0x47] ss:$8 sm:$0xf0] }
 0x180   : > { %1192 = vrot.lane.b32.xlu1 %v7573_v41, %s11024_s7  ;;  %1276 = vrot.lane.b32.xlu0 %v7544_v32, %s11293_s17  ;;  %s11295_s7 = smov 1  }
 0x181   : > { %6051 = vmatpush1.bf16.msra.mxu1 %v6050_v50  ;;  %v1357_v45 = vpop.permute.xlu1 %1356  ;;  %v7793_v0 = vpop.permute.xlu0 %1366  ;;  %v6000_v23 = vpack.c.bf16 %v6508_v9, %v1423_v8  ;;  %v1473_v8 = vld [vmem:[#allocation7 + $0x46] ss:$8 sm:$0xf0] }
 0x182   : > { %11294 = vst [vmem:[#allocation71_spill] sm:$0xff] %v7793_v0  ;;  %v1376_v42 = vsel %vm11068_vm13, %v7793_v0, %v1353_v52  ;;  %v1374_v43 = vsel %vm11068_vm13, %v1355_v7, %v1357_v45  ;;  %v6509_v7 = vld [vmem:[%s6977_s12] sm:$0xff]  ;;  %v7817_v9 = vor.u32 %v1473_v8, %v1472_v5  ;;  %v7858_v0 = vld [vmem:[%s6977_s12 + $0x38] sm:$0xff] }
 0x183   : > { %v1422_v10 = vmul.f32 %v1385_v22, %v1376_v42  ;;  %6001 = vmatprep.subr.bf16.mxu0 %v6000_v23  ;;  %v1424_v59 = vmul.f32 %v1393_v63, %v1374_v43  ;;  %v7819_v23 = vor.u32 %v1559_v34, %v1558_v4  ;;  %v6510_v43 = vld [vmem:[%s6977_s12 + $0x18] sm:$0xff] }
 0x184   : > { %1360 = vrot.lane.b32.xlu1 %v7309_v27, %s11295_s7  ;;  %1278 = vrot.lane.b32.xlu0 %v7573_v41, %s11293_s17  ;;  %11297 = vst [vmem:[#allocation73_spill] sm:$0xff] %v7817_v9 }
 0x185   : > { %v1449_v52 = vpop.permute.xlu1 %1448  ;;  %v7809_v49 = vpop.permute.xlu0 %1358  ;;  %v6002_v50 = vpack.c.bf16 %v6509_v7, %v1422_v10  ;;  %11298 = vst [vmem:[#allocation74_spill] sm:$0xff] %v7819_v23  ;;  %v6511_v7 = vld [vmem:[%s6977_s12 + $0x10] sm:$0xff]  ;;  %v1569_v5 = vrot.slane %v7819_v23, %v7129_v17 }
 0x186   : > { %11296 = vst [vmem:[#allocation72_spill] sm:$0xff] %v7809_v49  ;;  %v1373_v27 = vsel %vm11068_vm13, %v1357_v45, %v7809_v49  ;;  %v6054_v45 = vpack.c.bf16 %v6511_v7, %v1424_v59 }
 0x187   : > { %v1425_v22 = vmul.f32 %v1397_v62, %v1373_v27  ;;  %6003 = vmatpush1.bf16.msra.mxu0 %v6002_v50  ;;  %v1483_v62 = vrot.slane %v7817_v9, %v7129_v17  ;;  %v1479_v27 = vrot.slane %v7817_v9, %v7138_v21 }
 0x188   : > { %1364 = vrot.lane.b32.xlu1 %v7573_v41, %s11295_s7  ;;  %1362 = vrot.lane.b32.xlu0 %v7544_v32, %s11295_s7 }
 0x189   : > { %v1535_v42 = vpop.permute.xlu1 %1534  ;;  %v1451_v63 = vpop.permute.xlu0 %1450  ;;  %v6052_v10 = vpack.c.bf16 %v6510_v43, %v1425_v22  ;;  %v1565_v43 = vrot.slane %v7819_v23, %v7138_v21 }
 0x18a   : > { %v1468_v8 = vsel %vm11043_vm14, %v1449_v52, %v1451_v63 }
 0x18b   : > { %6053 = vmatprep.subr.bf16.mxu1 %v6052_v10  ;;  %v1517_v59 = vmul.f32 %v1483_v62, %v1468_v8 }
 0x18c   : > { %1458 = vrot.lane.b32.xlu1 %v7573_v41, %s11299_s15  ;;  %1456 = vrot.lane.b32.xlu0 %v7544_v32, %s11299_s15 }
 0x18d   : > { %6055 = vmatpush1.bf16.msra.mxu1 %v6054_v45  ;;  %v7837_v4 = vpop.permute.xlu1 %1446  ;;  %v1537_v34 = vpop.permute.xlu0 %1536 }
 0x18e   : > { %11300 = vst [vmem:[#allocation75_spill] sm:$0xff] %v7837_v4  ;;  %v1554_v50 = vsel %vm11044_vm15, %v1535_v42, %v1537_v34  ;;  %v1469_v10 = vsel %vm11043_vm14, %v7837_v4, %v1449_v52 }
 0x18f   : > { %v1603_v22 = vmul.f32 %v1569_v5, %v1554_v50  ;;  %v1516_v8 = vmul.f32 %v1479_v27, %v1469_v10  ;;  %v1491_v27 = vrot.slane %v7817_v9, %v7194_v47  ;;  %v1645_v10 = vld [vmem:[#allocation7 + $0x80] ss:$8 sm:$0xf0] }
 0x190   : > { %1544 = vrot.lane.b32.xlu1 %v7573_v41, %s11301_s11  ;;  %1542 = vrot.lane.b32.xlu0 %v7544_v32, %s11301_s11 }
 0x191   : > { %v1453_v7 = vpop.permute.xlu1 %1452  ;;  %v7852_v45 = vpop.permute.xlu0 %1532  ;;  %v6004_v62 = vpack.c.bf16 %v1603_v22, %v1517_v59  ;;  %v1573_v59 = vrot.slane %v7819_v23, %v7191_v46  ;;  %v1577_v22 = vrot.slane %v7819_v23, %v7194_v47 }
 0x192   : > { %11302 = vst [vmem:[#allocation76_spill] sm:$0xff] %v7852_v45  ;;  %v1555_v5 = vsel %vm11044_vm15, %v7852_v45, %v1535_v42 }
 0x193   : > { %v1602_v50 = vmul.f32 %v1565_v43, %v1555_v5  ;;  %6005 = vmatprep.subr.bf16.mxu0 %v6004_v62  ;;  %v1644_v43 = vld [vmem:[#allocation7 + $0x80] ss:$8 sm:$0xf]  ;;  %v1487_v62 = vrot.slane %v7817_v9, %v7191_v46 }
 0x194   : > { %1546 = vrot.lane.b32.xlu1 %v7858_v0, %s11301_s11  ;;  %1460 = vrot.lane.b32.xlu0 %v7858_v0, %s11299_s15 }
 0x195   : > { %v1539_v52 = vpop.permute.xlu1 %1538  ;;  %v6006_v4 = vpack.c.bf16 %v1602_v50, %v1516_v8  ;;  %v1731_v8 = vld [vmem:[#allocation7 + $0x81] ss:$8 sm:$0xf0]  ;;  %v1467_v50 = vsel %vm11043_vm14, %v1451_v63, %v1453_v7 }
 0x196   : > { %v7864_v49 = vpop.permute.xlu0 %1454  ;;  %v1553_v42 = vsel %vm11044_vm15, %v1537_v34, %v1539_v52  ;;  %v1730_v34 = vld [vmem:[#allocation7 + $0x81] ss:$8 sm:$0xf]  ;;  %v1518_v63 = vmul.f32 %v1487_v62, %v1467_v50 }
 0x197   : > { %11303 = vst [vmem:[#allocation77_spill] sm:$0xff] %v7864_v49  ;;  %6007 = vmatpush1.bf16.msra.mxu0 %v6006_v4  ;;  %v1466_v4 = vsel %vm11043_vm14, %v1453_v7, %v7864_v49  ;;  %v1604_v24 = vmul.f32 %v1573_v59, %v1553_v42  ;;  %v7894_v49 = vor.u32 %v1645_v10, %v1644_v43  ;;  %vm1634_vm14 = vcmp.lt.s32.totalorder %v7124_v15, 120 }
 0x198   : > { %1630 = vrot.lane.b32.xlu1 %v7573_v41, %s11049_s13  ;;  %1628 = vrot.lane.b32.xlu0 %v7544_v32, %s11049_s13  ;;  %v1519_v9 = vmul.f32 %v1491_v27, %v1466_v4  ;;  %v7896_v48 = vor.u32 %v1731_v8, %v1730_v34  ;;  %v2279_v34 = vld [vmem:[#allocation7 + $0xc2] ss:$8 sm:$0xf] }
 0x199   : > { %v1621_v5 = vpop.permute.xlu1 %1620  ;;  %v2280_v8 = vld [vmem:[#allocation7 + $0xc2] ss:$8 sm:$0xf0] }
 0x19a   : > { %v7885_v45 = vpop.permute.xlu0 %1540  ;;  %v1737_v10 = vrot.slane %v7896_v48, %v7138_v21 }
 0x19b   : > { %11304 = vst [vmem:[#allocation78_spill] sm:$0xff] %v7885_v45  ;;  %v1552_v23 = vsel %vm11044_vm15, %v1539_v52, %v7885_v45  ;;  %v6058_v52 = vpack.c.bf16 %v1604_v24, %v1518_v63  ;;  %vm1720_vm15 = vcmp.lt.s32.totalorder %v7124_v15, 119  ;;  %v7934_v45 = vsub.s32 5, %v7114_v6 }
 0x19c   : > { %1716 = vrot.lane.b32.xlu1 %v7573_v41, %s11047_s8  ;;  %v1605_v1 = vmul.f32 %v1577_v22, %v1552_v23  ;;  %1714 = vrot.lane.b32.xlu0 %v7544_v32, %s11047_s8  ;;  %v1655_v41 = vrot.slane %v7894_v49, %v7129_v17  ;;  %v1741_v32 = vrot.slane %v7896_v48, %v7129_v17 }
 0x19d   : > { %v1707_v7 = vpop.permute.xlu1 %1706  ;;  %v1651_v22 = vrot.slane %v7894_v49, %v7138_v21  ;;  %11308 = vst [vmem:[#allocation82_spill] sm:$0xff] %v7934_v45 }
 0x19e   : > { %v1623_v59 = vpop.permute.xlu0 %1622  ;;  %v6056_v42 = vpack.c.bf16 %v1605_v1, %v1519_v9 }
 0x19f   : > { %v1640_v23 = vsel %vm1634_vm14, %v1621_v5, %v1623_v59 }
 0x1a0   : > { %1718 = vrot.lane.b32.xlu1 %v7858_v0, %s11047_s8  ;;  %1632 = vrot.lane.b32.xlu0 %v7858_v0, %s11049_s13  ;;  %v1689_v27 = vmul.f32 %v1655_v41, %v1640_v23  ;;  %s11456_s8 = smov 56   ;;  %s11457_s13 = smov 55  }
 0x1a1   : > { %6057 = vmatprep.subr.bf16.mxu1 %v6056_v42  ;;  %v7910_v1 = vpop.permute.xlu1 %1618 }
 0x1a2   : > { %6059 = vmatpush1.bf16.msra.mxu1 %v6058_v52  ;;  %11305 = vst [vmem:[#allocation79_spill] sm:$0xff] %v7910_v1  ;;  %v1709_v9 = vpop.permute.xlu0 %1708  ;;  %v1641_v62 = vsel %vm1634_vm14, %v7910_v1, %v1621_v5 }
 0x1a3   : > { %v1726_v24 = vsel %vm1720_vm15, %v1707_v7, %v1709_v9  ;;  %v1688_v52 = vmul.f32 %v1651_v22, %v1641_v62  ;;  %v1663_v22 = vrot.slane %v7894_v49, %v7194_v47  ;;  %v1659_v62 = vrot.slane %v7894_v49, %v7191_v46 }
 0x1a4   : > { %v1775_v43 = vmul.f32 %v1741_v32, %v1726_v24  ;;  %v7926_v32 = vor.u32 %v2280_v8, %v2279_v34  ;;  %v7929_v24 = vsub.s32 4, %v7114_v6 }
 0x1a5   : > { %v1625_v4 = vpop.permute.xlu1 %1624 }
 0x1a6   : > { %v7921_v50 = vpop.permute.xlu0 %1704  ;;  %v6008_v63 = vpack.c.bf16 %v1775_v43, %v1689_v27  ;;  %11307 = vst [vmem:[#allocation81_spill] sm:$0xff] %v7929_v24  ;;  %v1745_v27 = vrot.slane %v7896_v48, %v7191_v46  ;;  %v1749_v43 = vrot.slane %v7896_v48, %v7194_v47 }
 0x1a7   : > { %11306 = vst [vmem:[#allocation80_spill] sm:$0xff] %v7921_v50  ;;  %v1727_v42 = vsel %vm1720_vm15, %v7921_v50, %v1707_v7 }
 0x1a8   : > { %v1774_v41 = vmul.f32 %v1737_v10, %v1727_v42  ;;  %6009 = vmatprep.subr.bf16.mxu0 %v6008_v63  ;;  %v1639_v42 = vsel %vm1634_vm14, %v1623_v59, %v1625_v4  ;;  %v6739_v63 = vmov 1   ;;  %v11320_v59 = vld [vmem:[#allocation35_spill] sm:$0xff] }
 0x1a9   : > { %v1711_v23 = vpop.permute.xlu1 %1710  ;;  %6495 = vset.pattern.permute.xlu0 %v6739_v63 }
 0x1aa   : > { %v7931_v5 = vpop.permute.xlu0 %1626  ;;  %v6010_v1 = vpack.c.bf16 %v1774_v41, %v1688_v52  ;;  %v1725_v7 = vsel %vm1720_vm15, %v1709_v9, %v1711_v23  ;;  %v11309_v9 = vpack.c.bf16 %v7255_v36, %v7237_v25  ;;  %v1810_v41 = vrot.slane %v7135_v20, %v7194_v47  ;;  %v7971_v25 = vld [vmem:[%s10955_s5] sm:$0xff] }
 0x1ab   : > { %v1638_v34 = vsel %vm1634_vm14, %v1625_v4, %v7931_v5  ;;  %11311 = vst [vmem:[#allocation84_spill] sm:$0xff] %v7971_v25  ;;  %v1776_v36 = vmul.f32 %v1745_v27, %v1725_v7  ;;  %v1932_v4 = vrot.slane %v7241_v28, %v7194_v47  ;;  %v7981_v52 = vsub.s32 6, %v7114_v6  ;;  %2883 = vperm.xlu0 %6495, %v7971_v25   ;;  %v11351_v25 = vld [vmem:[#allocation56_spill] sm:$0xff] }
 0x1ac   : > { %6011 = vmatpush1.bf16.msra.mxu0 %v6010_v1  ;;  %v1691_v1 = vmul.f32 %v1663_v22, %v1638_v34  ;;  %v11313_v27 = vpack.c.bf16 %v7176_v39, %v7174_v38  ;;  %v1690_v7 = vmul.f32 %v1659_v62, %v1639_v42  ;;  %v11314_v6 = vpack.c.bf16 %v7372_v54, %v7378_v58 }
 0x1ad   : > { %6013 = vmatprep.subr.bf16.mxu0 %v11309_v9  ;;  %v7954_v8 = vpop.permute.xlu1 %327  ;;  %11312 = vst [vmem:[#allocation85_spill] sm:$0xff] %v7981_v52  ;;  %v2054_v34 = vrot.slane %v7360_v56, %v7194_v47  ;;  %v1993_v54 = vrot.slane %v7245_v31, %v7194_v47 }
 0x1ae   : > { %v7966_v10 = vpop.permute.xlu0 %1712  ;;  %v7993_v63 = vsel %vm337_vm1, %v7206_v57, %v7954_v8  ;;  %v6062_v42 = vpack.c.bf16 %v1776_v36, %v1690_v7  ;;  %v11316_v7 = vpack.c.bf16 %v7494_v61, %v7484_v40  ;;  %v2237_v40 = vrot.slane %v7482_v35, %v7194_v47  ;;  %v11317_v61 = vld [vmem:[#allocation32_spill] sm:$0xff] }
 0x1af   : > { %11310 = vst [vmem:[#allocation83_spill] sm:$0xff] %v7966_v10  ;;  %v1724_v9 = vsel %vm1720_vm15, %v1711_v23, %v7966_v10  ;;  %v1871_v23 = vrot.slane %v7133_v19, %v7194_v47 }
 0x1b0   : > { %v1777_v50 = vmul.f32 %v1749_v43, %v1724_v9  ;;  %6015 = vmatpush1.bf16.msra.mxu0 %v11313_v27  ;;  %v11318_v9 = vld [vmem:[#allocation19_spill] sm:$0xff] }
 0x1b1   : > { %6017 = vmatprep.subr.bf16.mxu0 %v11314_v6  ;;  %v11315_v6 = vpack.c.bf16 %v7298_v13, %v7296_v11  ;;  %v2115_v11 = vrot.slane %v7364_v53, %v7194_v47 }
 0x1b2   : > { %v7998_v22 = vpop.permute.xlu1 %500  ;;  %v8004_v43 = vpop.permute.xlu0 %414  ;;  %v6060_v62 = vpack.c.bf16 %v1777_v50, %v1691_v1  ;;  %v2176_v50 = vrot.slane %v7476_v12, %v7194_v47  ;;  %v1838_v1 = vmul.f32 %v1810_v41, %v7993_v63 }
 0x1b3   : > { %v8016_v58 = vsel %vm422_vm0, %v7239_v26, %v8004_v43  ;;  %v8033_v36 = vsel %vm508_vm2, %v7327_v60, %v7998_v22  ;;  %v11319_v26 = vld [vmem:[#allocation36_spill] sm:$0xff]  ;;  %v11330_v60 = vld [vmem:[#allocation45_spill] sm:$0xff] }
 0x1b4   : > { %v1899_v27 = vmul.f32 %v1871_v23, %v8016_v58  ;;  %6019 = vmatpush1.bf16.msra.mxu0 %v11315_v6  ;;  %6061 = vmatprep.subr.bf16.mxu1 %v6060_v62  ;;  %v1960_v6 = vmul.f32 %v1932_v4, %v8033_v36  ;;  %v11321_v57 = vpack.c.bf16 %v11319_v26, %v11320_v59  ;;  %v11324_v4 = vld [vmem:[#allocation27_spill] sm:$0xff] }
 0x1b5   : > { %6021 = vmatprep.subr.bf16.mxu0 %v11316_v7  ;;  %6063 = vmatpush1.bf16.msra.mxu1 %v6062_v42  ;;  %v11322_v7 = vld [vmem:[#allocation41_spill] sm:$0xff]  ;;  %v1875_v26 = vrot.slane %v7133_v19, %v7929_v24 }
 0x1b6   : > { %v8038_v41 = vpop.permute.xlu1 %672  ;;  %v8044_v23 = vpop.permute.xlu0 %586  ;;  %v6064_v62 = vpack.c.bf16 %v1899_v27, %v1838_v1  ;;  %v11323_v27 = vpack.c.bf16 %v7620_v44, %v7610_v37 }
 0x1b7   : > { %v8056_v42 = vsel %vm594_vm3, %v11317_v61, %v8044_v23  ;;  %v8075_v1 = vsel %vm680_vm4, %v11322_v7, %v8038_v41  ;;  %v11329_v61 = vld [vmem:[#allocation46_spill] sm:$0xff] }
 0x1b8   : > { %v2021_v39 = vmul.f32 %v1993_v54, %v8056_v42  ;;  %6023 = vmatpush1.bf16.msra.mxu0 %v11321_v57  ;;  %6065 = vmatprep.subr.bf16.mxu1 %v6064_v62  ;;  %v11325_v54 = vld [vmem:[#allocation26_spill] sm:$0xff]  ;;  %v459_v57 = vrot.slane %v7131_v18, %v7934_v45  ;;  %v2082_v44 = vmul.f32 %v2054_v34, %v8075_v1 }
 0x1b9   : > { %6025 = vmatprep.subr.bf16.mxu0 %v11323_v27  ;;  %v11326_v13 = vpack.c.bf16 %v11324_v4, %v11325_v54  ;;  %v11328_v4 = vrot.slane %v7926_v32, %v7129_v17  ;;  %v11331_v38 = vpack.c.bf16 %v11329_v61, %v11330_v60  ;;  %v11333_v54 = vld [vmem:[#allocation33_spill] sm:$0xff] }
 0x1ba   : > { %v8083_v59 = vpop.permute.xlu1 %844  ;;  %v8089_v62 = vpop.permute.xlu0 %758  ;;  %v6068_v7 = vpack.c.bf16 %v2021_v39, %v1960_v6  ;;  %v11334_v6 = vld [vmem:[#allocation34_spill] sm:$0xff] }
 0x1bb   : > { %6067 = vmatpush1.bf16.msra.mxu1 %v11326_v13  ;;  %v11327_v13 = vld [vmem:[#allocation42_spill] sm:$0xff]  ;;  %v2324_v39 = vmul.f32 %v11328_v4, %v7693_v3  ;;  %v11332_v3 = vld [vmem:[#allocation52_spill] sm:$0xff]  ;;  %v11335_v34 = vpack.c.bf16 %v11333_v54, %v11334_v6 }
 0x1bc   : > { %v8101_v27 = vsel %vm766_vm5, %v11327_v13, %v8089_v62  ;;  %6027 = vmatpush1.bf16.msra.mxu0 %v11331_v38  ;;  %6069 = vmatprep.subr.bf16.mxu1 %v6068_v7  ;;  %v8122_v4 = vsel %vm852_vm6, %v11332_v3, %v8083_v59  ;;  %v11336_v7 = vrot.slane %v7926_v32, %v7138_v21  ;;  %v11340_v6 = vld [vmem:[#allocation44_spill] sm:$0xff]  ;;  %v11341_v21 = vld [vmem:[#allocation43_spill] sm:$0xff] }
 0x1bd   : > { %v2143_v37 = vmul.f32 %v2115_v11, %v8101_v27  ;;  %2613 = vmatprep.subr.mxu0 %v2324_v39  ;;  %v8137_v39 = vld [vmem:[#allocation9] sm:$0xff] }
 0x1be   : > { %v330_v11 = vpop.permute.xlu1 %329  ;;  %v8131_v61 = vpop.permute.xlu0 %930  ;;  %v2323_v3 = vmul.f32 %v11336_v7, %v7642_v29  ;;  %11337 = vst [vmem:[#allocation32_spill] sm:$0xff] %v8137_v39  ;;  %v11342_v29 = vpack.c.bf16 %v11340_v6, %v11341_v21  ;;  %v11343_v6 = vld [vmem:[#allocation47_spill] sm:$0xff] }
 0x1bf   : > { %6071 = vmatpush1.bf16.msra.mxu1 %v11335_v34  ;;  %v6072_v13 = vpack.c.bf16 %v2143_v37, %v2082_v44  ;;  %v11338_v34 = vld [vmem:[#allocation53_spill] sm:$0xff]  ;;  %v2204_v37 = vmul.f32 %v2176_v50, %v8122_v4  ;;  %v11347_v50 = vrot.slane %v7926_v32, %v7191_v46 }
 0x1c0   : > { %v8147_v38 = vsel %vm938_vm7, %v11338_v34, %v8131_v61  ;;  %2614 = vmatpush1.msra.mxu0 %v2323_v3  ;;  %v11339_v34 = vrot.slane %v7131_v18, %v7929_v24 }
 0x1c1   : > { %v2265_v7 = vmul.f32 %v2237_v40, %v8147_v38  ;;  %6073 = vmatprep.subr.bf16.mxu1 %v6072_v13  ;;  %2626 = vmatmul.mubr.f32.vlgmr.msra.gmra.mrb[0].mxu0 %v8137_v39  ;;  %v340_v13 = vsel %vm337_vm1, %v7954_v8, %v330_v11  ;;  %v11345_v40 = vld [vmem:[#allocation21_spill] sm:$0xff] }
 0x1c2   : > { %v480_v60 = vmul.f32 %v11339_v34, %v8016_v58  ;;  %v332_v17 = vpop.permute.xlu1 %331  ;;  %v417_v3 = vpop.permute.xlu0 %416  ;;  %5959 = vmatprep.mubr.msk.f32.mxu0 %vm11070_vm8, %v11343_v6  ;;  %v11346_v58 = vld [vmem:[#allocation62_spill] sm:$0xff] }
 0x1c3   : > { %6075 = vmatpush1.bf16.msra.mxu1 %v11342_v29  ;;  %v6076_v54 = vpack.c.bf16 %v2265_v7, %v2204_v37  ;;  %v11344_v29 = vrot.slane %v7126_v16, %v7929_v24  ;;  %v338_v8 = vsel %vm337_vm1, %v332_v17, %v11345_v40  ;;  %v339_v37 = vsel %vm337_vm1, %v330_v11, %v332_v17 }
 0x1c4   : > { %v425_v21 = vsel %vm422_vm0, %v8004_v43, %v417_v3  ;;  %v11348_v11 = vrot.slane %v7135_v20, %v7929_v24  ;;  %v11360_v40 = vrot.slane %v7131_v18, %v11318_v9 }
 0x1c5   : > { %v394_v34 = vmul.f32 %v11344_v29, %v7993_v63  ;;  %6077 = vmatprep.subr.bf16.mxu1 %v6076_v54  ;;  %v2325_v63 = vmul.f32 %v11347_v50, %v11346_v58  ;;  %v481_v44 = vmul.f32 %v459_v57, %v425_v21  ;;  %v8207_v43 = vmul.f32 %v1875_v26, %v425_v21  ;;  %v11350_v54 = vld [vmem:[#allocation57_spill] sm:$0xff] }
 0x1c6   : > { %v8205_v7 = vmul.f32 %v11348_v11, %v340_v13  ;;  %v11352_v10 = vpack.c.bf16 %v11350_v54, %v11351_v25  ;;  %v8212_v50 = vpop.permute.xlu1 %1016  ;;  %v11353_v58 = vrot.slane %v7126_v16, %v7934_v45  ;;  %v11355_v11 = vrot.slane %v7126_v16, %v11318_v9  ;;  %v11356_v26 = vld [vmem:[#allocation61_spill] sm:$0xff] }
 0x1c7   : > { %v6082_v17 = vpack.c.bf16 %v480_v60, %v394_v34  ;;  %v11354_v60 = vrot.slane %v7126_v16, %v7981_v52  ;;  %v8227_v25 = vsel %vm1024_vm9, %v11356_v26, %v8212_v50  ;;  %v11357_v21 = vrot.slane %v7135_v20, %v7981_v52 }
 0x1c8   : > { %11349 = vst [vmem:[#allocation19_spill] sm:$0xff] %v8205_v7  ;;  %6079 = vmatpush1.bf16.msra.mxu1 %v11352_v10  ;;  %v395_v29 = vmul.f32 %v11353_v58, %v340_v13  ;;  %v397_v57 = vmul.f32 %v11355_v11, %v338_v8  ;;  %v419_v10 = vpop.permute.xlu0 %418  ;;  %v11358_v58 = vld [vmem:[#allocation20_spill] sm:$0xff]  ;;  %v11359_v11 = vrot.slane %v7131_v18, %v7981_v52 }
 0x1c9   : > { %v396_v34 = vmul.f32 %v11354_v60, %v339_v37  ;;  %v8232_v54 = vmul.f32 %v11357_v21, %v338_v8  ;;  %v423_v16 = vsel %vm422_vm0, %v419_v10, %v11358_v58  ;;  %v424_v60 = vsel %vm422_vm0, %v417_v3, %v419_v10 }
 0x1ca   : > { %v482_v26 = vmul.f32 %v11359_v11, %v424_v60  ;;  %v483_v46 = vmul.f32 %v11360_v40, %v423_v16  ;;  %v11361_v8 = vrot.slane %v7133_v19, %v7934_v45  ;;  %v11362_v13 = vrot.slane %v7133_v19, %v7981_v52  ;;  %v589_v7 = vpop.permute.xlu1 %588 }
 0x1cb   : > { %v11363_v3 = vrot.slane %v7243_v30, %v7929_v24  ;;  %v11364_v11 = vrot.slane %v7135_v20, %v7934_v45  ;;  %v6080_v40 = vpack.c.bf16 %v481_v44, %v395_v29  ;;  %v11366_v20 = vrot.slane %v7243_v30, %v7934_v45 }
 0x1cc   : > { %v8250_v21 = vmul.f32 %v11361_v8, %v424_v60  ;;  %v8255_v58 = vmul.f32 %v11362_v13, %v423_v16  ;;  %v11365_v60 = vrot.slane %v7926_v32, %v7194_v47  ;;  %v6134_v19 = vpack.c.bf16 %v482_v26, %v396_v34  ;;  %v503_v16 = vpop.permute.xlu0 %502 }
 0x1cd   : > { %v652_v10 = vmul.f32 %v11363_v3, %v8056_v42  ;;  %v8264_v18 = vmul.f32 %v11364_v11, %v339_v37  ;;  %v597_v42 = vsel %vm594_vm3, %v8044_v23, %v589_v7  ;;  %v6132_v3 = vpack.c.bf16 %v483_v46, %v397_v57  ;;  %6081 = vmatprep.subr.bf16.mxu0 %v6080_v40 }
 0x1ce   : > { %v2326_v8 = vmul.f32 %v11365_v60, %v8227_v25  ;;  %v653_v44 = vmul.f32 %v11366_v20, %v597_v42  ;;  %v11367_v37 = vrot.slane %v7245_v31, %v7929_v24  ;;  %v511_v34 = vsel %vm508_vm2, %v7998_v22, %v503_v16  ;;  %6083 = vmatpush1.bf16.msra.mxu0 %v6082_v17  ;;  %v591_v22 = vpop.permute.xlu1 %590 }
 0x1cf   : > { %v11368_v23 = vrot.slane %v7231_v14, %v7934_v45  ;;  %v11369_v57 = vrot.slane %v7241_v28, %v7929_v24  ;;  %v11370_v40 = vrot.slane %v7231_v14, %v7929_v24  ;;  %v807_v17 = vrot.slane %v7362_v51, %v7981_v52 }
 0x1d0   : > { %v8281_v29 = vmul.f32 %v11367_v37, %v597_v42  ;;  %2684 = vmatprep.subr.mxu1 %v2326_v8  ;;  %v811_v8 = vrot.slane %v7362_v51, %v11318_v9  ;;  %v11371_v42 = vld [vmem:[#allocation28_spill] sm:$0xff]  ;;  %v505_v37 = vpop.permute.xlu0 %504 }
 0x1d1   : > { %v567_v46 = vmul.f32 %v11368_v23, %v511_v34  ;;  %v8292_v26 = vmul.f32 %v11369_v57, %v511_v34  ;;  %2685 = vmatpush1.msra.mxu1 %v2325_v63  ;;  %v566_v60 = vmul.f32 %v11370_v40, %v8033_v36  ;;  %v595_v20 = vsel %vm594_vm3, %v591_v22, %v11371_v42 }
 0x1d2   : > { %2697 = vmatmul.mubr.f32.vlgmr.msra.gmra.mrb[0].mxu1 %v8137_v39  ;;  %6133 = vmatprep.subr.bf16.mxu1 %v6132_v3  ;;  %v596_v36 = vsel %vm594_vm3, %v589_v7, %v591_v22  ;;  %v11372_v23 = vrot.slane %v7243_v30, %v7981_v52  ;;  %v11373_v40 = vrot.slane %v7245_v31, %v7981_v52 }
 0x1d3   : > { %6135 = vmatpush1.bf16.msra.mxu1 %v6134_v19  ;;  %v6084_v3 = vpack.c.bf16 %v653_v44, %v567_v46  ;;  %v6086_v34 = vpack.c.bf16 %v652_v10, %v566_v60  ;;  %v2127_v19 = vrot.slane %v7364_v53, %v7981_v52  ;;  %5960 = vmatprep.mubr.msk.f32.mxu1 %vm11070_vm8, %v11343_v6  ;;  %v11376_v60 = vld [vmem:[#allocation29_spill] sm:$0xff] }
 0x1d4   : > { %v654_v57 = vmul.f32 %v11372_v23, %v596_v36  ;;  %v8318_v13 = vmul.f32 %v11373_v40, %v595_v20  ;;  %v11374_v7 = vrot.slane %v7243_v30, %v11318_v9  ;;  %v11375_v10 = vrot.slane %v7245_v31, %v7934_v45 }
 0x1d5   : > { %v509_v22 = vsel %vm508_vm2, %v505_v37, %v11376_v60  ;;  %v510_v42 = vsel %vm508_vm2, %v503_v16, %v505_v37  ;;  %6085 = vmatprep.subr.bf16.mxu0 %v6084_v3  ;;  %v11377_v6 = vrot.slane %v7231_v14, %v7981_v52  ;;  %v11378_v30 = vrot.slane %v7231_v14, %v11318_v9  ;;  %v761_v16 = vpop.permute.xlu1 %760  ;;  %v675_v3 = vpop.permute.xlu0 %674 }
 0x1d6   : > { %v655_v44 = vmul.f32 %v11374_v7, %v595_v20  ;;  %v8330_v46 = vmul.f32 %v11375_v10, %v596_v36  ;;  %v11379_v31 = vrot.slane %v7241_v28, %v7934_v45  ;;  %v11380_v40 = vrot.slane %v7241_v28, %v7981_v52  ;;  %6087 = vmatpush1.bf16.msra.mxu0 %v6086_v34 }
 0x1d7   : > { %v568_v23 = vmul.f32 %v11377_v6, %v510_v42  ;;  %v569_v20 = vmul.f32 %v11378_v30, %v509_v22  ;;  %v769_v37 = vsel %vm766_vm5, %v8089_v62, %v761_v16  ;;  %v721_v14 = vrot.slane %v7358_v33, %v7981_v52 }
 0x1d8   : > { %v8346_v36 = vmul.f32 %v11379_v31, %v510_v42  ;;  %v8351_v7 = vmul.f32 %v11380_v40, %v509_v22  ;;  %v725_v10 = vrot.slane %v7358_v33, %v11318_v9  ;;  %v2066_v60 = vrot.slane %v7360_v56, %v7981_v52 }
 0x1d9   : > { %v6138_v42 = vpack.c.bf16 %v654_v57, %v568_v23  ;;  %v11382_v34 = vrot.slane %v7364_v53, %v7929_v24  ;;  %v975_v62 = vrot.slane %v7480_v55, %v7934_v45  ;;  %v11383_v6 = vrot.slane %v7362_v51, %v7934_v45  ;;  %v763_v11 = vpop.permute.xlu1 %762 }
 0x1da   : > { %11381 = vst [vmem:[#allocation36_spill] sm:$0xff] %v8351_v7  ;;  %v683_v31 = vsel %vm680_vm4, %v8038_v41, %v675_v3  ;;  %v6136_v57 = vpack.c.bf16 %v655_v44, %v569_v20  ;;  %v11384_v40 = vrot.slane %v7362_v51, %v7929_v24  ;;  %v11385_v28 = vrot.slane %v7358_v33, %v7934_v45  ;;  %v11387_v44 = vld [vmem:[#allocation37_spill] sm:$0xff] }
 0x1db   : > { %v8367_v22 = vmul.f32 %v11382_v34, %v769_v37  ;;  %v825_v30 = vmul.f32 %v11383_v6, %v769_v37  ;;  %v11386_v37 = vrot.slane %v7360_v56, %v7929_v24  ;;  %v2241_v41 = vrot.slane %v7482_v35, %v7929_v24 }
 0x1dc   : > { %v824_v34 = vmul.f32 %v11384_v40, %v8101_v27  ;;  %v739_v63 = vmul.f32 %v11385_v28, %v683_v31  ;;  %6137 = vmatprep.subr.bf16.mxu1 %v6136_v57  ;;  %v767_v20 = vsel %vm766_vm5, %v763_v11, %v11387_v44  ;;  %v8398_v51 = vsel %vm766_vm5, %v761_v16, %v763_v11  ;;  %v677_v27 = vpop.permute.xlu0 %676  ;;  %v11389_v16 = vld [vmem:[#allocation38_spill] sm:$0xff] }
 0x1dd   : > { %v8389_v6 = vmul.f32 %v11386_v37, %v683_v31  ;;  %v889_v28 = vrot.slane %v7474_v2, %v7934_v45  ;;  %v2180_v31 = vrot.slane %v7476_v12, %v7929_v24  ;;  %v11388_v40 = vrot.slane %v7358_v33, %v7929_v24  ;;  %6139 = vmatpush1.bf16.msra.mxu1 %v6138_v42 }
 0x1de   : > { %v826_v44 = vmul.f32 %v807_v17, %v8398_v51  ;;  %v827_v23 = vmul.f32 %v811_v8, %v767_v20  ;;  %v8411_v11 = vmul.f32 %v2127_v19, %v767_v20  ;;  %v681_v47 = vsel %vm680_vm4, %v677_v27, %v11389_v16  ;;  %v933_v17 = vpop.permute.xlu1 %932  ;;  %v11391_v16 = vld [vmem:[#allocation48_spill] sm:$0xff] }
 0x1df   : > { %v738_v57 = vmul.f32 %v11388_v40, %v8075_v1  ;;  %v8418_v39 = vsel %vm680_vm4, %v675_v3, %v677_v27  ;;  %v6088_v7 = vpack.c.bf16 %v825_v30, %v739_v63  ;;  %v741_v40 = vmul.f32 %v725_v10, %v681_v47 }
 0x1e0   : > { %v740_v1 = vmul.f32 %v721_v14, %v8418_v39  ;;  %v8421_v37 = vmul.f32 %v2066_v60, %v681_v47  ;;  %v941_v8 = vsel %vm938_vm7, %v8131_v61, %v933_v17  ;;  %v847_v19 = vpop.permute.xlu0 %846  ;;  %v979_v42 = vrot.slane %v7480_v55, %v7981_v52 }
 0x1e1   : > { %v6090_v33 = vpack.c.bf16 %v824_v34, %v738_v57  ;;  %6089 = vmatprep.subr.bf16.mxu0 %v6088_v7  ;;  %v983_v3 = vrot.slane %v7480_v55, %v11318_v9  ;;  %v2249_v63 = vrot.slane %v7482_v35, %v7981_v52  ;;  %v8434_v7 = vmul.f32 %v2241_v41, %v941_v8 }
 0x1e2   : > { %v6142_v14 = vpack.c.bf16 %v826_v44, %v740_v1  ;;  %v893_v61 = vrot.slane %v7474_v2, %v7981_v52  ;;  %v997_v10 = vmul.f32 %v975_v62, %v941_v8  ;;  %v855_v60 = vsel %vm852_vm6, %v8083_v59, %v847_v19  ;;  %v935_v44 = vpop.permute.xlu1 %934  ;;  %v11393_v8 = vld [vmem:[#allocation49_spill] sm:$0xff] }
 0x1e3   : > { %6091 = vmatpush1.bf16.msra.mxu0 %v6090_v33  ;;  %v6140_v30 = vpack.c.bf16 %v827_v23, %v741_v40  ;;  %v897_v34 = vrot.slane %v7474_v2, %v11318_v9  ;;  %v11390_v20 = vrot.slane %v7480_v55, %v7929_v24  ;;  %v911_v57 = vmul.f32 %v889_v28, %v855_v60 }
 0x1e4   : > { %v8447_v41 = vmul.f32 %v2180_v31, %v855_v60  ;;  %v2188_v62 = vrot.slane %v7476_v12, %v7981_v52  ;;  %v939_v59 = vsel %vm938_vm7, %v935_v44, %v11391_v16  ;;  %v8456_v23 = vsel %vm938_vm7, %v933_v17, %v935_v44  ;;  %v849_v33 = vpop.permute.xlu0 %848  ;;  %v11394_v16 = vld [vmem:[#allocation55_spill] sm:$0xff] }
 0x1e5   : > { %v996_v27 = vmul.f32 %v11390_v20, %v8147_v38  ;;  %6141 = vmatprep.subr.bf16.mxu1 %v6140_v30  ;;  %v11392_v55 = vrot.slane %v7474_v2, %v7929_v24  ;;  %v998_v31 = vmul.f32 %v979_v42, %v8456_v23  ;;  %v999_v1 = vmul.f32 %v983_v3, %v939_v59 }
 0x1e6   : > { %6143 = vmatpush1.bf16.msra.mxu1 %v6142_v14  ;;  %v8465_v40 = vmul.f32 %v2249_v63, %v939_v59  ;;  %v853_v17 = vsel %vm852_vm6, %v849_v33, %v11393_v8  ;;  %v8472_v60 = vsel %vm852_vm6, %v847_v19, %v849_v33  ;;  %v6092_v30 = vpack.c.bf16 %v997_v10, %v911_v57  ;;  %v1103_v42 = vpop.permute.xlu1 %1102  ;;  %v11395_v19 = vld [vmem:[#allocation63_spill] sm:$0xff] }
 0x1e7   : > { %v910_v38 = vmul.f32 %v11392_v55, %v8122_v4  ;;  %v912_v4 = vmul.f32 %v893_v61, %v8472_v60  ;;  %v913_v20 = vmul.f32 %v897_v34, %v853_v17  ;;  %v8475_v44 = vmul.f32 %v2188_v62, %v853_v17  ;;  %v11396_v61 = vld [vmem:[#allocation54_spill] sm:$0xff] }
 0x1e8   : > { %6093 = vmatprep.subr.bf16.mxu0 %v6092_v30  ;;  %v1019_v3 = vpop.permute.xlu0 %1018  ;;  %v1143_v59 = vrot.slane %v11394_v16, %v7929_v24  ;;  %v1114_v10 = vsel %vm1110_vm10, %v11395_v19, %v1103_v42  ;;  %v1061_v34 = vrot.slane %v11396_v61, %v7934_v45  ;;  %v1147_v57 = vrot.slane %v11394_v16, %v7934_v45  ;;  %v11397_v19 = vld [vmem:[#allocation59_spill] sm:$0xff] }
 0x1e9   : > { %v6094_v2 = vpack.c.bf16 %v996_v27, %v910_v38  ;;  %v6146_v63 = vpack.c.bf16 %v998_v31, %v912_v4  ;;  %v6144_v27 = vpack.c.bf16 %v999_v1, %v913_v20  ;;  %v1057_v62 = vrot.slane %v11396_v61, %v7929_v24 }
 0x1ea   : > { %v8493_v33 = vsel %vm1024_vm9, %v8212_v50, %v1019_v3  ;;  %v1021_v55 = vpop.permute.xlu1 %1020  ;;  %v1065_v38 = vrot.slane %v11396_v61, %v7981_v52  ;;  %v1168_v8 = vmul.f32 %v1143_v59, %v1114_v10  ;;  %v1069_v1 = vrot.slane %v11396_v61, %v11318_v9 }
 0x1eb   : > { %6095 = vmatpush1.bf16.msra.mxu0 %v6094_v2  ;;  %6145 = vmatprep.subr.bf16.mxu1 %v6144_v27  ;;  %v8501_v17 = vsel %vm1024_vm9, %v1019_v3, %v1021_v55  ;;  %v1083_v50 = vmul.f32 %v1061_v34, %v8493_v33  ;;  %v1151_v4 = vrot.slane %v11394_v16, %v7981_v52  ;;  %v11399_v27 = vld [vmem:[#allocation58_spill] sm:$0xff] }
 0x1ec   : > { %v1105_v31 = vpop.permute.xlu0 %1104  ;;  %6147 = vmatpush1.bf16.msra.mxu1 %v6146_v63  ;;  %v1155_v20 = vrot.slane %v11394_v16, %v11318_v9  ;;  %v1082_v59 = vmul.f32 %v1057_v62, %v8227_v25  ;;  %v8514_v3 = vsel %vm1024_vm9, %v1021_v55, %v11397_v19 }
 0x1ed   : > { %v1113_v30 = vsel %vm1110_vm10, %v1103_v42, %v1105_v31  ;;  %11398 = vst [vmem:[#allocation35_spill] sm:$0xff] %v8514_v3  ;;  %v1084_v42 = vmul.f32 %v1065_v38, %v8501_v17  ;;  %v1085_v25 = vmul.f32 %v1069_v1, %v8514_v3  ;;  %v11400_v38 = vld [vmem:[#allocation64_spill] sm:$0xff]  ;;  %v11408_v3 = vld [vmem:[#allocation71_spill] sm:$0xff] }
 0x1ee   : > { %v1169_v2 = vmul.f32 %v1147_v57, %v1113_v30  ;;  %v1189_v10 = vpop.permute.xlu1 %1188  ;;  %v6098_v34 = vpack.c.bf16 %v1168_v8, %v1082_v59  ;;  %v1233_v14 = vrot.slane %v11400_v38, %v7934_v45 }
 0x1f0   : > { %v1107_v63 = vpop.permute.xlu0 %1106  ;;  %v6096_v61 = vpack.c.bf16 %v1169_v2, %v1083_v50  ;;  %v11401_v2 = vld [vmem:[#allocation65_spill] sm:$0xff] }
 0x1f1   : > { %v1111_v57 = vsel %vm1110_vm10, %v1107_v63, %v11399_v27  ;;  %v1112_v16 = vsel %vm1110_vm10, %v1105_v31, %v1107_v63  ;;  %v1315_v59 = vrot.slane %v11401_v2, %v7929_v24  ;;  %v11402_v31 = vld [vmem:[#allocation70_spill] sm:$0xff]  ;;  %v11403_v63 = vld [vmem:[#allocation68_spill] sm:$0xff] }
 0x1f2   : > { %v1170_v62 = vmul.f32 %v1151_v4, %v1112_v16  ;;  %v1171_v30 = vmul.f32 %v1155_v20, %v1111_v57  ;;  %6097 = vmatprep.subr.bf16.mxu0 %v6096_v61  ;;  %v1275_v55 = vpop.permute.xlu1 %1274  ;;  %v1319_v4 = vrot.slane %v11401_v2, %v7934_v45  ;;  %v1229_v20 = vrot.slane %v11400_v38, %v7929_v24 }
 0x1f3   : > { %6099 = vmatpush1.bf16.msra.mxu0 %v6098_v34  ;;  %v1286_v1 = vsel %vm11069_vm12, %v11402_v31, %v1275_v55  ;;  %v1200_v61 = vsel %vm11067_vm11, %v11403_v63, %v1189_v10  ;;  %v1237_v57 = vrot.slane %v11400_v38, %v7981_v52  ;;  %v1323_v31 = vrot.slane %v11401_v2, %v7981_v52 }
 0x1f4   : > { %v6150_v19 = vpack.c.bf16 %v1170_v62, %v1084_v42  ;;  %v1191_v50 = vpop.permute.xlu0 %1190  ;;  %v6148_v8 = vpack.c.bf16 %v1171_v30, %v1085_v25  ;;  %v1340_v25 = vmul.f32 %v1315_v59, %v1286_v1 }
 0x1f5   : > { %v1199_v27 = vsel %vm11067_vm11, %v1189_v10, %v1191_v50  ;;  %v1254_v10 = vmul.f32 %v1229_v20, %v1200_v61 }
 0x1f6   : > { %6149 = vmatprep.subr.bf16.mxu1 %v6148_v8  ;;  %v1193_v42 = vpop.permute.xlu1 %1192  ;;  %v1255_v34 = vmul.f32 %v1233_v14, %v1199_v27  ;;  %v1241_v8 = vrot.slane %v11400_v38, %v11318_v9  ;;  %v1327_v14 = vrot.slane %v11401_v2, %v11318_v9  ;;  %v11404_v27 = vld [vmem:[#allocation67_spill] sm:$0xff]  ;;  %v11406_v2 = vld [vmem:[#allocation66_spill] sm:$0xff] }
 0x1f7   : > { %6151 = vmatpush1.bf16.msra.mxu1 %v6150_v19  ;;  %v1198_v62 = vsel %vm11067_vm11, %v1191_v50, %v1193_v42  ;;  %v1197_v59 = vsel %vm11067_vm11, %v1193_v42, %v11404_v27  ;;  %v11405_v50 = vld [vmem:[#allocation69_spill] sm:$0xff]  ;;  %vm11410_vm11 = vcmp.lt.s32.totalorder %v7124_v15, 127 }
 0x1f8   : > { %v1277_v16 = vpop.permute.xlu0 %1276  ;;  %v1401_v1 = vrot.slane %v11405_v50, %v7929_v24  ;;  %v1413_v38 = vrot.slane %v11405_v50, %v11318_v9  ;;  %v1409_v61 = vrot.slane %v11405_v50, %v7981_v52 }
 0x1f9   : > { %v1285_v30 = vsel %vm11069_vm12, %v1275_v55, %v1277_v16  ;;  %v1256_v55 = vmul.f32 %v1237_v57, %v1198_v62  ;;  %v1257_v57 = vmul.f32 %v1241_v8, %v1197_v59  ;;  %v11407_v62 = vld [vmem:[#allocation72_spill] sm:$0xff] }
 0x1fa   : > { %v1341_v19 = vmul.f32 %v1319_v4, %v1285_v30  ;;  %v1361_v63 = vpop.permute.xlu1 %1360  ;;  %v1405_v4 = vrot.slane %v11405_v50, %v7934_v45  ;;  %v6102_v30 = vpack.c.bf16 %v1340_v25, %v1254_v10 }
 0x1fc   : > { %v1279_v47 = vpop.permute.xlu0 %1278  ;;  %v6100_v28 = vpack.c.bf16 %v1341_v19, %v1255_v34  ;;  %v1372_v34 = vsel %vm11068_vm13, %v11407_v62, %v1361_v63 }
 0x1fd   : > { %v1283_v20 = vsel %vm11069_vm12, %v1279_v47, %v11406_v2  ;;  %v1284_v42 = vsel %vm11069_vm12, %v1277_v16, %v1279_v47  ;;  %v1426_v50 = vmul.f32 %v1401_v1, %v1372_v34  ;;  %v6515_v34 = vld [vmem:[%s6977_s12 + $0x20] sm:$0xff] }
 0x1fe   : > { %v1342_v19 = vmul.f32 %v1323_v31, %v1284_v42  ;;  %v1343_v27 = vmul.f32 %v1327_v14, %v1283_v20  ;;  %6101 = vmatprep.subr.bf16.mxu0 %v6100_v28  ;;  %v1365_v25 = vpop.permute.xlu1 %1364  ;;  %v11409_v42 = vld [vmem:[#allocation73_spill] sm:$0xff] }
 0x1ff   : > { %6103 = vmatpush1.bf16.msra.mxu0 %v6102_v30  ;;  %v1369_v2 = vsel %vm11068_vm13, %v1365_v25, %v11408_v3  ;;  %v6513_v3 = vld [vmem:[%s6977_s12 + $0x30] sm:$0xff]  ;;  %v1499_v1 = vrot.slane %v11409_v42, %v7934_v45 }
 0x200   : > { %v6154_v10 = vpack.c.bf16 %v1342_v19, %v1256_v55  ;;  %v1363_v47 = vpop.permute.xlu0 %1362  ;;  %v6152_v16 = vpack.c.bf16 %v1343_v27, %v1257_v57  ;;  %v1429_v8 = vmul.f32 %v1413_v38, %v1369_v2  ;;  %v6514_v38 = vld [vmem:[%s6977_s12 + $0x28] sm:$0xff]  ;;  %v6106_v19 = vpack.c.bf16 %v6515_v34, %v1426_v50  ;;  %v11418_v34 = vld [vmem:[#allocation76_spill] sm:$0xff] }
 0x201   : > { %v1370_v59 = vsel %vm11068_vm13, %v1363_v47, %v1365_v25  ;;  %v1371_v28 = vsel %vm11068_vm13, %v1361_v63, %v1363_v47  ;;  %v11412_v25 = vld [vmem:[#allocation77_spill] sm:$0xff]  ;;  %vm11413_vm13 = vmmov %vm11410_vm11 }
 0x202   : > { %v1427_v31 = vmul.f32 %v1405_v4, %v1371_v28  ;;  %v1428_v14 = vmul.f32 %v1409_v61, %v1370_v59  ;;  %6153 = vmatprep.subr.bf16.mxu1 %v6152_v16  ;;  %v1459_v55 = vpop.permute.xlu1 %1458  ;;  %v6156_v30 = vpack.c.bf16 %v7858_v0, %v1429_v8  ;;  %v1495_v4 = vrot.slane %v11409_v42, %v7929_v24  ;;  %v11411_v0 = vld [vmem:[#allocation74_spill] sm:$0xff] }
 0x203   : > { %6155 = vmatpush1.bf16.msra.mxu1 %v6154_v10  ;;  %v1581_v61 = vrot.slane %v11411_v0, %v7929_v24  ;;  %v1585_v27 = vrot.slane %v11411_v0, %v7934_v45  ;;  %v1589_v50 = vrot.slane %v11411_v0, %v7981_v52  ;;  %v11415_v59 = vld [vmem:[#allocation78_spill] sm:$0xff] }
 0x204   : > { %v6158_v20 = vpack.c.bf16 %v6513_v3, %v1428_v14  ;;  %v1457_v57 = vpop.permute.xlu0 %1456  ;;  %v6104_v62 = vpack.c.bf16 %v6514_v38, %v1427_v31  ;;  %6157 = vmatprep.subr.bf16.mxu1 %v6156_v30  ;;  %v1593_v31 = vrot.slane %v11411_v0, %v11318_v9  ;;  %v1503_v14 = vrot.slane %v11409_v42, %v7981_v52 }
 0x205   : > { %v1464_v63 = vsel %vm11410_vm11, %v1457_v57, %v1459_v55  ;;  %v1465_v10 = vsel %vm11413_vm13, %v11412_v25, %v1457_v57  ;;  %vm11414_vm11 = vcmp.lt.s32.totalorder %v7124_v15, 121 }
 0x206   : > { %6105 = vmatprep.subr.bf16.mxu0 %v6104_v62  ;;  %v1545_v2 = vpop.permute.xlu1 %1544  ;;  %v1521_v47 = vmul.f32 %v1499_v1, %v1464_v63  ;;  %vm11416_vm12 = vmmov %vm11414_vm11  ;;  %v1520_v30 = vmul.f32 %v1495_v4, %v1465_v10  ;;  %v1507_v1 = vrot.slane %v11409_v42, %v11318_v9 }
 0x207   : > { %6107 = vmatpush1.bf16.msra.mxu0 %v6106_v19  ;;  %6159 = vmatpush1.bf16.msra.mxu1 %v6158_v20  ;;  %vm11417_vm13 = vmmov %vm11414_vm11 }
 0x208   : > { %v1543_v16 = vpop.permute.xlu0 %1542 }
 0x209   : > { %v1550_v8 = vsel %vm11414_vm11, %v1543_v16, %v1545_v2  ;;  %v1551_v28 = vsel %vm11416_vm12, %v11415_v59, %v1543_v16  ;;  %vm11419_vm12 = vmmov %vm11414_vm11  ;;  %vm11420_vm11 = vcmp.lt.s32.totalorder %v7124_v15, 127  ;;  %v1671_v59 = vrot.slane %v7894_v49, %v7934_v45 }
 0x20a   : > { %v1606_v3 = vmul.f32 %v1581_v61, %v1551_v28  ;;  %v1607_v20 = vmul.f32 %v1585_v27, %v1550_v8  ;;  %v1547_v57 = vpop.permute.xlu1 %1546  ;;  %v11421_v61 = vld [vmem:[#allocation75_spill] sm:$0xff]  ;;  %vm11422_vm8 = vmmov %vm11420_vm11 }
 0x20b   : > { %v1549_v62 = vsel %vm11417_vm13, %v1545_v2, %v1547_v57  ;;  %v1556_v19 = vsel %vm11419_vm12, %v1547_v57, %v11418_v34  ;;  %v1761_v57 = vrot.slane %v7896_v48, %v7981_v52  ;;  %vm11535_vm12 = vcmp.lt.s32.totalorder %v7124_v15, 7 }
 0x20c   : > { %v6110_v38 = vpack.c.bf16 %v1606_v3, %v1520_v30  ;;  %v1461_v63 = vpop.permute.xlu0 %1460  ;;  %v6108_v0 = vpack.c.bf16 %v1607_v20, %v1521_v47  ;;  %v1608_v25 = vmul.f32 %v1589_v50, %v1549_v62  ;;  %v1609_v16 = vmul.f32 %v1593_v31, %v1556_v19  ;;  %v11423_v62 = vld [vmem:[#allocation83_spill] sm:$0xff] }
 0x20d   : > { %v1463_v4 = vsel %vm11420_vm11, %v1459_v55, %v1461_v63  ;;  %v1470_v42 = vsel %vm11422_vm8, %v1461_v63, %v11421_v61  ;;  %v1667_v55 = vrot.slane %v7894_v49, %v7929_v24  ;;  %v1753_v31 = vrot.slane %v7896_v48, %v7929_v24 }
 0x20e   : > { %v1522_v27 = vmul.f32 %v1503_v14, %v1463_v4  ;;  %v1523_v10 = vmul.f32 %v1507_v1, %v1470_v42  ;;  %6109 = vmatprep.subr.bf16.mxu0 %v6108_v0  ;;  %v1631_v2 = vpop.permute.xlu1 %1630  ;;  %v1757_v14 = vrot.slane %v7896_v48, %v7934_v45  ;;  %v1765_v19 = vrot.slane %v7896_v48, %v11318_v9 }
 0x20f   : > { %6111 = vmatpush1.bf16.msra.mxu0 %v6110_v38  ;;  %vm11527_vm8 = vcmask 719872   ;;  %vm11536_vm11 = vcmp.lt.s32.totalorder %v7124_v15, 8 }
 0x210   : > { %v6162_v8 = vpack.c.bf16 %v1608_v25, %v1522_v27  ;;  %v1629_v28 = vpop.permute.xlu0 %1628  ;;  %v6160_v47 = vpack.c.bf16 %v1609_v16, %v1523_v10  ;;  %v1679_v16 = vrot.slane %v7894_v49, %v11318_v9  ;;  %v11424_v27 = vld [vmem:[#allocation80_spill] sm:$0xff]  ;;  %vm11528_vm13 = vmmov %vm11527_vm8 }
 0x211   : > { %v1636_v50 = vsel %vm1634_vm14, %v1629_v28, %v1631_v2  ;;  %v1637_v30 = vsel %vm1634_vm14, %v7931_v5, %v1629_v28  ;;  %v1675_v5 = vrot.slane %v7894_v49, %v7981_v52 }
 0x212   : > { %6161 = vmatprep.subr.bf16.mxu1 %v6160_v47  ;;  %v1717_v3 = vpop.permute.xlu1 %1716  ;;  %v1693_v20 = vmul.f32 %v1671_v59, %v1636_v50  ;;  %v1692_v63 = vmul.f32 %v1667_v55, %v1637_v30  ;;  %v11425_v50 = vld [vmem:[#allocation79_spill] sm:$0xff]  ;;  %v2123_v55 = vrot.slane %v7364_v53, %v7934_v45  ;;  %v2245_v53 = vrot.slane %v7482_v35, %v7934_v45 }
 0x213   : > { %6163 = vmatpush1.bf16.msra.mxu1 %v6162_v8 }
 0x214   : > { %v1715_v1 = vpop.permute.xlu0 %1714 }
 0x215   : > { %v1722_v38 = vsel %vm1720_vm15, %v1715_v1, %v1717_v3  ;;  %v1723_v34 = vsel %vm1720_vm15, %v11423_v62, %v1715_v1  ;;  %v2145_v1 = vmul.f32 %v2123_v55, %v8398_v51  ;;  %v11431_v51 = vld [vmem:[#allocation25_spill] sm:$0xff] }
 0x216   : > { %v1778_v0 = vmul.f32 %v1753_v31, %v1723_v34  ;;  %v1779_v25 = vmul.f32 %v1757_v14, %v1722_v38  ;;  %v1719_v4 = vpop.permute.xlu1 %1718  ;;  %v2062_v31 = vrot.slane %v7360_v56, %v7934_v45  ;;  %v2184_v56 = vrot.slane %v7476_v12, %v7934_v45  ;;  %v11427_v38 = vld [vmem:[#allocation19_spill] sm:$0xff] }
 0x217   : > { %v1721_v42 = vsel %vm1720_vm15, %v1717_v3, %v1719_v4  ;;  %v1728_v10 = vsel %vm1720_vm15, %v1719_v4, %v11424_v27  ;;  %v11428_v62 = vpack.c.bf16 %v8207_v43, %v11427_v38  ;;  %v11433_v12 = vpack.c.bf16 %v8281_v29, %v8292_v26  ;;  %v11439_v29 = vld [vmem:[#allocation36_spill] sm:$0xff] }
 0x218   : > { %v6114_v61 = vpack.c.bf16 %v1778_v0, %v1692_v63  ;;  %v1633_v8 = vpop.permute.xlu0 %1632  ;;  %v6112_v48 = vpack.c.bf16 %v1779_v25, %v1693_v20  ;;  %v1780_v59 = vmul.f32 %v1761_v57, %v1721_v42  ;;  %v1781_v28 = vmul.f32 %v1765_v19, %v1728_v10  ;;  %v11449_v10 = vld [vmem:[#allocation60_spill] sm:$0xff] }
 0x219   : > { %v1635_v47 = vsel %vm1634_vm14, %v1631_v2, %v1633_v8  ;;  %v1642_v49 = vsel %vm1634_vm14, %v1633_v8, %v11425_v50  ;;  %v11426_v20 = vpack.c.bf16 %v8250_v21, %v8264_v18  ;;  %v2084_v57 = vmul.f32 %v2062_v31, %v8418_v39  ;;  %v11430_v18 = vld [vmem:[#allocation24_spill] sm:$0xff] }
 0x21a   : > { %v1694_v14 = vmul.f32 %v1675_v5, %v1635_v47  ;;  %v1695_v30 = vmul.f32 %v1679_v16, %v1642_v49  ;;  %6113 = vmatprep.subr.bf16.mxu0 %v6112_v48  ;;  %v11429_v21 = vpack.c.bf16 %v8330_v46, %v8346_v36  ;;  %v11432_v34 = vpack.c.bf16 %v11430_v18, %v11431_v51  ;;  %v11435_v46 = vld [vmem:[#allocation30_spill] sm:$0xff]  ;;  %v11436_v36 = vld [vmem:[#allocation31_spill] sm:$0xff] }
 0x21b   : > { %6115 = vmatpush1.bf16.msra.mxu0 %v6114_v61  ;;  %v2267_v39 = vmul.f32 %v2245_v53, %v8456_v23  ;;  %v2206_v35 = vmul.f32 %v2184_v56, %v8472_v60  ;;  %v6124_v19 = vpack.c.bf16 %v2145_v1, %v2084_v57  ;;  %v11434_v43 = vpack.c.bf16 %v8255_v58, %v8232_v54  ;;  %v11441_v54 = vld [vmem:[#allocation39_spill] sm:$0xff]  ;;  %v11442_v58 = vld [vmem:[#allocation40_spill] sm:$0xff] }
 0x21c   : > { %v6166_v3 = vpack.c.bf16 %v1780_v59, %v1694_v14  ;;  %6117 = vmatprep.subr.bf16.mxu0 %v11426_v20  ;;  %v6164_v2 = vpack.c.bf16 %v1781_v28, %v1695_v30  ;;  %v11437_v5 = vpack.c.bf16 %v11435_v46, %v11436_v36  ;;  %v2306_v23 = vrot.slane %v7926_v32, %v7934_v45  ;;  %v11447_v61 = vld [vmem:[#allocation51_spill] sm:$0xff]  ;;  %v11453_v59 = vld [vmem:[#allocation84_spill] sm:$0xff] }
 0x21d   : > { %v6128_v63 = vpack.c.bf16 %v2267_v39, %v2206_v35  ;;  %v11438_v60 = vpack.c.bf16 %v8367_v22, %v8389_v6  ;;  %v11440_v26 = vpack.c.bf16 %v8318_v13, %v11439_v29  ;;  %v11443_v0 = vpack.c.bf16 %v11441_v54, %v11442_v58  ;;  %v11446_v6 = vld [vmem:[#allocation50_spill] sm:$0xff] }
 0x21e   : > { %6165 = vmatprep.subr.bf16.mxu1 %v6164_v2  ;;  %v2302_v25 = vrot.slane %v7926_v32, %v7929_v24  ;;  %v2328_v16 = vmul.f32 %v2306_v23, %v8501_v17  ;;  %v2314_v4 = vrot.slane %v7926_v32, %v11318_v9  ;;  %v11444_v22 = vpack.c.bf16 %v8434_v7, %v8447_v41 }
 0x21f   : > { %6119 = vmatpush1.bf16.msra.mxu0 %v11428_v62  ;;  %6167 = vmatpush1.bf16.msra.mxu1 %v6166_v3  ;;  %v11445_v13 = vpack.c.bf16 %v8411_v11, %v8421_v37  ;;  %v11448_v42 = vpack.c.bf16 %v11446_v6, %v11447_v61  ;;  %v2310_v17 = vrot.slane %v7926_v32, %v7981_v52  ;;  %v11451_v37 = vld [vmem:[#allocation32_spill] sm:$0xff]  ;;  %v11452_v11 = vld [vmem:[#allocation35_spill] sm:$0xff]  ;;  %v6740_v48 = vmov 0  }
 0x220   : > { %6121 = vmatprep.subr.bf16.mxu0 %v11429_v21  ;;  %6169 = vmatprep.subr.bf16.mxu1 %v11432_v34  ;;  %v2327_v27 = vmul.f32 %v2302_v25, %v8493_v33  ;;  %v2330_v8 = vmul.f32 %v2314_v4, %v11449_v10  ;;  %v11450_v7 = vpack.c.bf16 %v8465_v40, %v8475_v44  ;;  %v4747_v52 = vld [vmem:[#allocation7 + $0xc0] ss:$8 sm:$0xf0] }
 0x221   : > { %v2329_v41 = vmul.f32 %v2310_v17, %v11452_v11  ;;  %6494 = vset.pattern.permute.xlu1 %v6740_v48 }
 0x222   : > { %2875 = vperm.xlu1 %6494, %v11453_v59  }
 0x223   : > { %6123 = vmatpush1.bf16.msra.mxu0 %v11433_v12  ;;  %6171 = vmatpush1.bf16.msra.mxu1 %v11434_v43 }
 0x224   : > { %6125 = vmatprep.subr.bf16.mxu0 %v6124_v19  ;;  %6173 = vmatprep.subr.bf16.mxu1 %v11437_v5 }
 0x227   : > { %6127 = vmatpush1.bf16.msra.mxu0 %v11438_v60  ;;  %6175 = vmatpush1.bf16.msra.mxu1 %v11440_v26 }
 0x228   : > { %6129 = vmatprep.subr.bf16.mxu0 %v6128_v63  ;;  %6177 = vmatprep.subr.bf16.mxu1 %v11443_v0 }
 0x22a   : > { %v8742_v12 = vpop.permute.xlu0 %2883 }
 0x22b   : > { %6131 = vmatpush1.bf16.msra.mxu0 %v11444_v22  ;;  %6179 = vmatpush1.bf16.msra.mxu1 %v11445_v13 }
 0x22c   : > { %2755 = vmatprep.subr.mxu0 %v2328_v16  ;;  %6181 = vmatprep.subr.bf16.mxu1 %v11448_v42 }
 0x22f   : > { %2756 = vmatpush1.msra.mxu0 %v2327_v27  ;;  %6183 = vmatpush1.bf16.msra.mxu1 %v11450_v7 }
 0x230   : > { %2826 = vmatprep.subr.mxu1 %v2330_v8  ;;  %2768 = vmatmul.mubr.f32.vlgmr.msra.gmra.mrb[2].mxu0 %v11451_v37 }
 0x233   : > { %2827 = vmatpush1.msra.mxu1 %v2329_v41 }
 0x234   : > { %2839 = vmatmul.mubr.f32.vlgmr.msra.gmra.mrb[2].mxu1 %v11451_v37 }
 0x294   : > { %v2627_v32 = vpop.f32.mrb[0].mxu0 }
 0x295   : > { %v2851_v33 = vmul.f32 %v2627_v32, %v2627_v32  ;;  %v2629_v28 = vpop.f32.mrb[1].mxu0 }
 0x296   : > { %v2845_v47 = vadd.f32 %v2629_v28, %v2627_v32  ;;  %v2852_v50 = vmul.f32 %v2629_v28, %v2629_v28 }
 0x298   : > { %v2855_v49 = vadd.f32 %v2852_v50, %v2851_v33 }
 0x2a1   : > { %v8744_v0 = vpop.permute.xlu1 %2875 }
 0x2a5   : > { %v2698_v40 = vpop.f32.mrb[0].mxu1 }
 0x2a6   : > { %v2846_v44 = vadd.f32 %v2845_v47, %v2698_v40  ;;  %v2853_v55 = vmul.f32 %v2698_v40, %v2698_v40  ;;  %v2700_v31 = vpop.f32.mrb[1].mxu1 }
 0x2a7   : > { %v2854_v14 = vmul.f32 %v2700_v31, %v2700_v31 }
 0x2a8   : > { %v2856_v30 = vadd.f32 %v2855_v49, %v2853_v55  ;;  %v2847_v3 = vadd.f32 %v2846_v44, %v2700_v31 }
 0x2aa   : > { %2848 = vadd.xlane.f32.xlu0 %v2847_v3  ;;  %v2857_v20 = vadd.f32 %v2856_v30, %v2854_v14 }
 0x2ae   : > { %2858 = vadd.xlane.f32.xlu0 %v2857_v20 }
 0x303   : > { %v8722_v2 = vpop.f32.mrb[2].mxu0 }
 0x304   : > { %v2904_v1 = vmul.f32 %v8722_v2, %v8722_v2  ;;  %v8726_v57 = vpop.f32.mrb[3].mxu0 }
 0x305   : > { %v2898_v53 = vadd.f32 %v8726_v57, %v8722_v2  ;;  %v2905_v56 = vmul.f32 %v8726_v57, %v8726_v57 }
 0x307   : > { %v2908_v38 = vadd.f32 %v2905_v56, %v2904_v1  ;;  %v8732_v62 = vpop.f32.mrb[2].mxu1 }
 0x308   : > { %v2899_v21 = vadd.f32 %v2898_v53, %v8732_v62  ;;  %v2906_v18 = vmul.f32 %v8732_v62, %v8732_v62  ;;  %v8737_v51 = vpop.f32.mrb[3].mxu1 }
 0x309   : > { %v2907_v34 = vmul.f32 %v8737_v51, %v8737_v51 }
 0x30a   : > { %v2909_v39 = vadd.f32 %v2908_v38, %v2906_v18  ;;  %v2900_v35 = vadd.f32 %v2899_v21, %v8737_v51  ;;  %v2974_v38 = vld [vmem:[#allocation7] ss:$8 sm:$0xf]  ;;  %v4386_v21 = vld [vmem:[#allocation7 + $0x82] ss:$8 sm:$0xf] }
 0x30b   : > { %v4387_v18 = vld [vmem:[#allocation7 + $0x82] ss:$8 sm:$0xf0] }
 0x30c   : > { %2901 = vadd.xlane.f32.xlu1 %v2900_v35  ;;  %v2910_v19 = vadd.f32 %v2909_v39, %v2907_v34  ;;  %v3059_v34 = vld [vmem:[#allocation7 + $0x1] ss:$8 sm:$0xf0]  ;;  %v4446_v39 = vld [vmem:[#allocation7 + $0x83] ss:$8 sm:$0xf] }
 0x30d   : > { %v4447_v35 = vld [vmem:[#allocation7 + $0x83] ss:$8 sm:$0xf0] }
 0x30e   : > { %2911 = vadd.xlane.f32.xlu0 %v2910_v19 }
 0x337   : > { %v2849_v43 = vpop.xlane.xlu0 %2848 }
 0x338   : > { %v2850_v46 = vmul.f32 0.001953125, %v2849_v43 }
 0x33a   : > { %v2861_v5 = vmul.f32 %v2850_v46, %v2850_v46  ;;  %v2865_v29 = vsub.f32 %v2627_v32, %v2850_v46  ;;  %v2866_v26 = vsub.f32 %v2629_v28, %v2850_v46  ;;  %v2867_v54 = vsub.f32 %v2698_v40, %v2850_v46 }
 0x33b   : > { %v2859_v36 = vpop.xlane.xlu0 %2858  ;;  %v2868_v7 = vsub.f32 %v2700_v31, %v2850_v46 }
 0x33c   : > { %v2860_v63 = vmul.f32 0.001953125, %v2859_v36  ;;  %v8908_v36 = vor.u32 %v4387_v18, %v4386_v21  ;;  %v4507_v21 = vld [vmem:[#allocation7 + $0x84] ss:$8 sm:$0xf0] }
 0x33d   : > { %v11472_v18 = vld [vmem:[#allocation23_spill] sm:$0xff] }
 0x33e   : > { %v2862_v23 = vsub.f32 %v2860_v63, %v2861_v5  ;;  %v8914_v63 = vor.u32 %v4447_v35, %v4446_v39 }
 0x340   : > { %v2863_v60 = vadd.f32 1e-05, %v2862_v23 }
 0x342   : > { %6500 = vrsqrt.f32 %v2863_v60 }
 0x34c   : > { %v6501_v58 = vpop.eup %6500 }
 0x34d   : > { %v2869_v25 = vmul.f32 %v6501_v58, %v2865_v29  ;;  %v2870_v16 = vmul.f32 %v6501_v58, %v2866_v26  ;;  %v2871_v4 = vmul.f32 %v6501_v58, %v2867_v54  ;;  %v2872_v37 = vmul.f32 %v6501_v58, %v2868_v7  ;;  %v11464_v29 = vld [vmem:[#allocation17_spill] sm:$0xff]  ;;  %v11465_v58 = vld [vmem:[#allocation18_spill] sm:$0xff] }
 0x34f   : > { %v2878_v22 = vmul.f32 %v8744_v0, %v2869_v25  ;;  %v2879_v13 = vmul.f32 %v8744_v0, %v2870_v16  ;;  %v2880_v6 = vmul.f32 %v8744_v0, %v2871_v4  ;;  %v2881_v11 = vmul.f32 %v8744_v0, %v2872_v37 }
 0x350   : > { %v4393_v25 = vrot.slane %v8908_v36, %v11465_v58  ;;  %v4453_v4 = vrot.slane %v8914_v63, %v11465_v58 }
 0x351   : > { %v2886_v61 = vadd.f32 %v8742_v12, %v2878_v22  ;;  %v2888_v42 = vadd.f32 %v8742_v12, %v2880_v6  ;;  %v2887_v27 = vadd.f32 %v8742_v12, %v2879_v13  ;;  %v2889_v41 = vadd.f32 %v8742_v12, %v2881_v11 }
 0x353   : > { %v8752_v17 = vmax.f32 %v2886_v61, 0.0  ;;  %v8754_v10 = vmax.f32 %v2888_v42, 0.0  ;;  %v8760_v8 = vmax.f32 %v2887_v27, 0.0  ;;  %v8780_v48 = vmax.f32 %v2889_v41, 0.0 }
 0x354   : > { %v4457_v61 = vrot.slane %v8914_v63, %v11464_v29  ;;  %v4397_v27 = vrot.slane %v8908_v36, %v11464_v29 }
 0x355   : > { %11454 = vst [vmem:[#allocation41_spill] sm:$0xff] %v8752_v17  ;;  %3038 = vrot.lane.b32.xlu0 %v8754_v10, %s11077_s27  ;;  %2950 = vrot.lane.b32.xlu1 %v8752_v17, %s11071_s29  ;;  %11455 = vst [vmem:[#allocation27_spill] sm:$0xff] %v8760_v8 }
 0x359   : > { %3118 = vrot.lane.b32.xlu0 %v8752_v17, %s11092_s16  ;;  %2952 = vrot.lane.b32.xlu1 %v8760_v8, %s11071_s29 }
 0x35d   : > { %3202 = vrot.lane.b32.xlu0 %v8752_v17, %s11073_s19  ;;  %3034 = vrot.lane.b32.xlu1 %v8752_v17, %s11077_s27 }
 0x361   : > { %3122 = vrot.lane.b32.xlu0 %v8754_v10, %s11092_s16  ;;  %3036 = vrot.lane.b32.xlu1 %v8760_v8, %s11077_s27 }
 0x365   : > { %3206 = vrot.lane.b32.xlu0 %v8754_v10, %s11073_s19  ;;  %2954 = vrot.lane.b32.xlu1 %v8754_v10, %s11071_s29 }
 0x369   : > { %3286 = vrot.lane.b32.xlu0 %v8752_v17, %s11090_s20  ;;  %2956 = vrot.lane.b32.xlu1 %v8780_v48, %s11071_s29  ;;  %s11458_s29 = smov 9  }
 0x36d   : > { %3370 = vrot.lane.b32.xlu0 %v8752_v17, %s11075_s10  ;;  %3040 = vrot.lane.b32.xlu1 %v8780_v48, %s11077_s27  ;;  %s11461_s27 = smov 119  }
 0x371   : > { %3290 = vrot.lane.b32.xlu0 %v8754_v10, %s11090_s20  ;;  %3120 = vrot.lane.b32.xlu1 %v8760_v8, %s11092_s16 }
 0x375   : > { %3374 = vrot.lane.b32.xlu0 %v8754_v10, %s11075_s10  ;;  %3204 = vrot.lane.b32.xlu1 %v8760_v8, %s11073_s19 }
 0x379   : > { %3454 = vrot.lane.b32.xlu0 %v8752_v17, %s11088_s14  ;;  %3124 = vrot.lane.b32.xlu1 %v8780_v48, %s11092_s16 }
 0x37d   : > { %3538 = vrot.lane.b32.xlu0 %v8752_v17, %s11456_s8  ;;  %3208 = vrot.lane.b32.xlu1 %v8780_v48, %s11073_s19  ;;  %s11459_s19 = smov 8  }
 0x381   : > { %3458 = vrot.lane.b32.xlu0 %v8754_v10, %s11088_s14  ;;  %3288 = vrot.lane.b32.xlu1 %v8760_v8, %s11090_s20 }
 0x385   : > { %3542 = vrot.lane.b32.xlu0 %v8754_v10, %s11456_s8  ;;  %3372 = vrot.lane.b32.xlu1 %v8760_v8, %s11075_s10 }
 0x389   : > { %3622 = vrot.lane.b32.xlu0 %v8752_v17, %s11457_s13  ;;  %3292 = vrot.lane.b32.xlu1 %v8780_v48, %s11090_s20 }
 0x38d   : > { %3706 = vrot.lane.b32.xlu0 %v8752_v17, %s11458_s29  ;;  %3376 = vrot.lane.b32.xlu1 %v8780_v48, %s11075_s10  ;;  %s11460_s10 = smov 120  }
 0x391   : > { %3626 = vrot.lane.b32.xlu0 %v8754_v10, %s11457_s13  ;;  %3456 = vrot.lane.b32.xlu1 %v8760_v8, %s11088_s14 }
 0x395   : > { %3710 = vrot.lane.b32.xlu0 %v8754_v10, %s11458_s29  ;;  %3540 = vrot.lane.b32.xlu1 %v8760_v8, %s11456_s8 }
 0x399   : > { %v2902_v59 = vpop.xlane.xlu1 %2901  ;;  %3790 = vrot.lane.b32.xlu0 %v8752_v17, %s11459_s19  ;;  %3460 = vrot.lane.b32.xlu1 %v8780_v48, %s11088_s14 }
 0x39a   : > { %v8830_v32 = vmul.f32 0.001953125, %v2902_v59 }
 0x39b   : > { %v2912_v33 = vpop.xlane.xlu0 %2911 }
 0x39c   : > { %v2919_v28 = vsub.f32 %v8726_v57, %v8830_v32  ;;  %v2920_v47 = vsub.f32 %v8732_v62, %v8830_v32  ;;  %v2914_v50 = vmul.f32 %v8830_v32, %v8830_v32  ;;  %v2913_v49 = vmul.f32 0.001953125, %v2912_v33  ;;  %v2975_v62 = vld [vmem:[#allocation7] ss:$8 sm:$0xf0] }
 0x39d   : > { %3874 = vrot.lane.b32.xlu0 %v8752_v17, %s11293_s17  ;;  %3544 = vrot.lane.b32.xlu1 %v8780_v48, %s11456_s8  ;;  %v2921_v30 = vsub.f32 %v8737_v51, %v8830_v32  ;;  %v3058_v51 = vld [vmem:[#allocation7 + $0x1] ss:$8 sm:$0xf]  ;;  %v8906_v46 = vor.u32 %v2975_v62, %v2974_v38  ;;  %v2918_v54 = vsub.f32 %v8722_v2, %v8830_v32  ;;  %v4506_v62 = vld [vmem:[#allocation7 + $0x84] ss:$8 sm:$0xf] }
 0x39e   : > { %v2915_v40 = vsub.f32 %v2913_v49, %v2914_v50  ;;  %v8912_v5 = vor.u32 %v3059_v34, %v3058_v51  ;;  %v4687_v33 = vld [vmem:[#allocation7 + $0x87] ss:$8 sm:$0xf0] }
 0x39f   : > { %v2985_v26 = vrot.slane %v8906_v46, %v11464_v29  ;;  %v2993_v51 = vrot.slane %v8906_v46, %v11472_v18 }
 0x3a0   : > { %v2916_v44 = vadd.f32 1e-05, %v2915_v40  ;;  %v3069_v16 = vrot.slane %v8912_v5, %v11464_v29  ;;  %v3077_v39 = vrot.slane %v8912_v5, %v11472_v18 }
 0x3a1   : > { %3794 = vrot.lane.b32.xlu0 %v8754_v10, %s11459_s19  ;;  %3624 = vrot.lane.b32.xlu1 %v8760_v8, %s11457_s13 }
 0x3a2   : > { %6502 = vrsqrt.f32 %v2916_v44 }
 0x3a5   : > { %3878 = vrot.lane.b32.xlu0 %v8754_v10, %s11293_s17  ;;  %3708 = vrot.lane.b32.xlu1 %v8760_v8, %s11458_s29 }
 0x3a9   : > { %3958 = vrot.lane.b32.xlu0 %v8752_v17, %s11295_s7  ;;  %3628 = vrot.lane.b32.xlu1 %v8780_v48, %s11457_s13 }
 0x3ac   : > { %v6503_v55 = vpop.eup %6502 }
 0x3ad   : > { %v8858_v31 = vmul.f32 %v6503_v55, %v2919_v28  ;;  %v8860_v14 = vmul.f32 %v6503_v55, %v2920_v47  ;;  %3964 = vrot.lane.b32.xlu0 %v8780_v48, %s11295_s7  ;;  %3712 = vrot.lane.b32.xlu1 %v8780_v48, %s11458_s29  ;;  %v2925_v3 = vmul.f32 %v6503_v55, %v2921_v30 }
 0x3ae   : > { %v2922_v2 = vmul.f32 %v6503_v55, %v2918_v54 }
 0x3af   : > { %v2929_v20 = vmul.f32 %v2925_v3, %v8744_v0 }
 0x3b0   : > { %v2926_v32 = vmul.f32 %v2922_v2, %v8744_v0 }
 0x3b1   : > { %4054 = vrot.lane.b32.xlu0 %v8754_v10, %s11299_s15  ;;  %3792 = vrot.lane.b32.xlu1 %v8760_v8, %s11459_s19  ;;  %v2933_v1 = vadd.f32 %v2929_v20, %v8742_v12 }
 0x3b2   : > { %v2930_v55 = vadd.f32 %v2926_v32, %v8742_v12 }
 0x3b3   : > { %v8894_v57 = vmax.f32 %v2933_v1, 0.0  ;;  %v11471_v1 = vld [vmem:[#allocation22_spill] sm:$0xff] }
 0x3b4   : > { %v2989_v38 = vrot.slane %v8906_v46, %v11471_v1  ;;  %v4401_v34 = vrot.slane %v8908_v36, %v11471_v1  ;;  %v4461_v35 = vrot.slane %v8914_v63, %v11471_v1 }
 0x3b5   : > { %4138 = vrot.lane.b32.xlu0 %v8754_v10, %s11301_s11  ;;  %3876 = vrot.lane.b32.xlu1 %v8760_v8, %s11293_s17  ;;  %11462 = vst [vmem:[#allocation26_spill] sm:$0xff] %v8894_v57 }
 0x3b9   : > { %4134 = vrot.lane.b32.xlu0 %v8752_v17, %s11301_s11  ;;  %3796 = vrot.lane.b32.xlu1 %v8780_v48, %s11459_s19 }
 0x3bd   : > { %4222 = vrot.lane.b32.xlu0 %v8754_v10, %s11460_s10  ;;  %3880 = vrot.lane.b32.xlu1 %v8780_v48, %s11293_s17 }
 0x3c1   : > { %4306 = vrot.lane.b32.xlu0 %v8754_v10, %s11461_s27  ;;  %3960 = vrot.lane.b32.xlu1 %v8760_v8, %s11295_s7 }
 0x3c5   : > { %4302 = vrot.lane.b32.xlu0 %v8752_v17, %s11461_s27  ;;  %3962 = vrot.lane.b32.xlu1 %v8754_v10, %s11295_s7 }
 0x3c7   : > { %v8896_v53 = vpop.permute.xlu1 %2950  ;;  %v8898_v56 = vpop.permute.xlu0 %3038 }
 0x3c9   : > { %3132 = vrot.lane.b32.xlu0 %v8894_v57, %s11092_s16  ;;  %4052 = vrot.lane.b32.xlu1 %v8760_v8, %s11299_s15  ;;  %s11488_s16 = smov 65  }
 0x3cb   : > { %v2953_v19 = vpop.permute.xlu1 %2952  ;;  %v8904_v43 = vpop.permute.xlu0 %3118 }
 0x3cc   : > { %v2972_v22 = vsel %vm337_vm1, %v8896_v53, %v2953_v19 }
 0x3cd   : > { %3300 = vrot.lane.b32.xlu0 %v8894_v57, %s11090_s20  ;;  %4136 = vrot.lane.b32.xlu1 %v8760_v8, %s11301_s11  ;;  %v3019_v7 = vmul.f32 %v2985_v26, %v2972_v22  ;;  %v8948_v37 = vmul.f32 %v4393_v25, %v2972_v22  ;;  %v4567_v26 = vld [vmem:[#allocation7 + $0x85] ss:$8 sm:$0xf0]  ;;  %v8998_v25 = vmax.f32 %v2930_v55, 0.0  ;;  %s11487_s20 = smov 73  }
 0x3cf   : > { %v8918_v23 = vpop.permute.xlu1 %3034  ;;  %v8920_v60 = vpop.permute.xlu0 %3202  ;;  %11466 = vst [vmem:[#allocation46_spill] sm:$0xff] %v8948_v37  ;;  %11473 = vst [vmem:[#allocation53_spill] sm:$0xff] %v8998_v25 }
 0x3d0   : > { %11463 = vst [vmem:[#allocation42_spill] sm:$0xff] %v8918_v23 }
 0x3d1   : > { %3468 = vrot.lane.b32.xlu0 %v8894_v57, %s11088_s14  ;;  %4050 = vrot.lane.b32.xlu1 %v8752_v17, %s11299_s15  ;;  %s11486_s14 = smov 72  }
 0x3d3   : > { %v3037_v13 = vpop.permute.xlu1 %3036  ;;  %v8939_v6 = vpop.permute.xlu0 %3122 }
 0x3d4   : > { %v3056_v42 = vsel %vm422_vm0, %v8918_v23, %v3037_v13  ;;  %v3055_v59 = vsel %vm422_vm0, %v3037_v13, %v8898_v56 }
 0x3d5   : > { %v3103_v11 = vmul.f32 %v3069_v16, %v3056_v42  ;;  %v8950_v41 = vmul.f32 %v4453_v4, %v3056_v42  ;;  %3636 = vrot.lane.b32.xlu0 %v8894_v57, %s11457_s13  ;;  %4056 = vrot.lane.b32.xlu1 %v8780_v48, %s11299_s15  ;;  %v8966_v40 = vmul.f32 %v4457_v61, %v3055_v59 }
 0x3d6   : > { %v3073_v16 = vrot.slane %v8912_v5, %v11471_v1  ;;  %v9010_v61 = vor.u32 %v4507_v21, %v4506_v62  ;;  %v3226_v21 = vld [vmem:[#allocation7 + $0x3] ss:$8 sm:$0xf] }
 0x3d7   : > { %11467 = vst [vmem:[#allocation45_spill] sm:$0xff] %v8950_v41  ;;  %v2955_v28 = vpop.permute.xlu1 %2954  ;;  %v8962_v47 = vpop.permute.xlu0 %3206  ;;  %v6184_v50 = vpack.c.bf16 %v3103_v11, %v3019_v7  ;;  %11468 = vst [vmem:[#allocation52_spill] sm:$0xff] %v8966_v40 }
 0x3d8   : > { %v2971_v49 = vsel %vm337_vm1, %v2953_v19, %v2955_v28  ;;  %v4566_v19 = vld [vmem:[#allocation7 + $0x85] ss:$8 sm:$0xf]  ;;  %v4517_v62 = vrot.slane %v9010_v61, %v11464_v29 }
 0x3d9   : > { %v8968_v44 = vmul.f32 %v4397_v27, %v2971_v49  ;;  %6185 = vmatprep.subr.bf16.mxu0 %v6184_v50  ;;  %3804 = vrot.lane.b32.xlu0 %v8894_v57, %s11459_s19  ;;  %v3020_v2 = vmul.f32 %v2989_v38, %v2971_v49  ;;  %v9012_v42 = vor.u32 %v4567_v26, %v4566_v19  ;;  %v3142_v19 = vld [vmem:[#allocation7 + $0x2] ss:$8 sm:$0xf] }
 0x3da   : > { %4140 = vrot.lane.b32.xlu1 %v8780_v48, %s11301_s11  ;;  %v3143_v26 = vld [vmem:[#allocation7 + $0x2] ss:$8 sm:$0xf0] }
 0x3db   : > { %11469 = vst [vmem:[#allocation33_spill] sm:$0xff] %v8968_v44  ;;  %v8975_v30 = vpop.permute.xlu1 %2956  ;;  %v8977_v3 = vpop.permute.xlu0 %3286 }
 0x3dc   : > { %11470 = vst [vmem:[#allocation34_spill] sm:$0xff] %v8975_v30  ;;  %v2970_v54 = vsel %vm337_vm1, %v2955_v28, %v8975_v30  ;;  %v3104_v28 = vmul.f32 %v3073_v16, %v3055_v59  ;;  %v4577_v59 = vrot.slane %v9012_v42, %v11464_v29 }
 0x3dd   : > { %3972 = vrot.lane.b32.xlu0 %v8894_v57, %s11295_s7  ;;  %v3021_v27 = vmul.f32 %v2993_v51, %v2970_v54  ;;  %v9014_v7 = vmul.f32 %v4401_v34, %v2970_v54  ;;  %v3227_v51 = vld [vmem:[#allocation7 + $0x3] ss:$8 sm:$0xf0] }
 0x3de   : > { %4220 = vrot.lane.b32.xlu1 %v8760_v8, %s11460_s10  ;;  %v6238_v38 = vpack.c.bf16 %v3104_v28, %v3020_v2  ;;  %v9044_v54 = vor.u32 %v3227_v51, %v3226_v21  ;;  %v4627_v21 = vld [vmem:[#allocation7 + $0x86] ss:$8 sm:$0xf0] }
 0x3df   : > { %v9002_v4 = vpop.permute.xlu1 %3040  ;;  %v9004_v22 = vpop.permute.xlu0 %3370  ;;  %11476 = vst [vmem:[#allocation47_spill] sm:$0xff] %v9014_v7 }
 0x3e0   : > { %11474 = vst [vmem:[#allocation44_spill] sm:$0xff] %v9002_v4  ;;  %11475 = vst [vmem:[#allocation43_spill] sm:$0xff] %v9004_v22  ;;  %v3054_v13 = vsel %vm422_vm0, %v8898_v56, %v9002_v4 }
 0x3e1   : > { %v3105_v11 = vmul.f32 %v3077_v39, %v3054_v13  ;;  %v9016_v32 = vmul.f32 %v4461_v35, %v3054_v13  ;;  %4058 = vrot.lane.b32.xlu0 %v8998_v25, %s11299_s15 }
 0x3e2   : > { %4304 = vrot.lane.b32.xlu1 %v8760_v8, %s11461_s27 }
 0x3e3   : > { %11477 = vst [vmem:[#allocation21_spill] sm:$0xff] %v9016_v32  ;;  %v9024_v50 = vpop.permute.xlu1 %3120  ;;  %v9026_v49 = vpop.permute.xlu0 %3290  ;;  %v6236_v55 = vpack.c.bf16 %v3105_v11, %v3021_v27  ;;  %v9058_v27 = vor.u32 %v3143_v26, %v3142_v19  ;;  %v3245_v19 = vrot.slane %v9044_v54, %v11472_v18  ;;  %v4581_v26 = vrot.slane %v9012_v42, %v11471_v1 }
 0x3e4   : > { %v3139_v34 = vsel %vm508_vm2, %v9024_v50, %v8939_v6 }
 0x3e5   : > { %4142 = vrot.lane.b32.xlu0 %v8998_v25, %s11301_s11  ;;  %6237 = vmatprep.subr.bf16.mxu1 %v6236_v55  ;;  %v9050_v2 = vmul.f32 %v4517_v62, %v3139_v34  ;;  %v4626_v62 = vld [vmem:[#allocation7 + $0x86] ss:$8 sm:$0xf]  ;;  %v3161_v51 = vrot.slane %v9058_v27, %v11472_v18  ;;  %v4686_v55 = vld [vmem:[#allocation7 + $0x87] ss:$8 sm:$0xf]  ;;  %v3157_v56 = vrot.slane %v9058_v27, %v11471_v1 }
 0x3e6   : > { %4218 = vrot.lane.b32.xlu1 %v8752_v17, %s11460_s10  ;;  %6239 = vmatpush1.bf16.msra.mxu1 %v6238_v38  ;;  %v3241_v38 = vrot.slane %v9044_v54, %v11471_v1  ;;  %v9094_v44 = vor.u32 %v4627_v21, %v4626_v62  ;;  %v9096_v40 = vor.u32 %v4687_v33, %v4686_v55  ;;  %v3394_v62 = vld [vmem:[#allocation7 + $0x5] ss:$8 sm:$0xf] }
 0x3e7   : > { %v9040_v39 = vpop.permute.xlu1 %3204  ;;  %v9042_v35 = vpop.permute.xlu0 %3374  ;;  %11478 = vst [vmem:[#allocation62_spill] sm:$0xff] %v9050_v2  ;;  %v3395_v21 = vld [vmem:[#allocation7 + $0x5] ss:$8 sm:$0xf0] }
 0x3e8   : > { %v3223_v16 = vsel %vm594_vm3, %v9040_v39, %v8962_v47 }
 0x3e9   : > { %v9052_v13 = vmul.f32 %v4577_v59, %v3223_v16  ;;  %4226 = vrot.lane.b32.xlu0 %v8998_v25, %s11460_s10  ;;  %v4521_v59 = vrot.slane %v9010_v61, %v11471_v1  ;;  %v3272_v37 = vmul.f32 %v3241_v38, %v3223_v16  ;;  %v3188_v16 = vmul.f32 %v3157_v56, %v3139_v34 }
 0x3ea   : > { %4224 = vrot.lane.b32.xlu1 %v8780_v48, %s11460_s10  ;;  %v4697_v56 = vrot.slane %v9096_v40, %v11464_v29 }
 0x3eb   : > { %11479 = vst [vmem:[#allocation57_spill] sm:$0xff] %v9052_v13  ;;  %v9060_v11 = vpop.permute.xlu1 %3124  ;;  %v9062_v28 = vpop.permute.xlu0 %3454 }
 0x3ec   : > { %11480 = vst [vmem:[#allocation56_spill] sm:$0xff] %v9060_v11  ;;  %11481 = vst [vmem:[#allocation61_spill] sm:$0xff] %v9062_v28  ;;  %v3138_v20 = vsel %vm508_vm2, %v8939_v6, %v9060_v11 }
 0x3ed   : > { %4310 = vrot.lane.b32.xlu0 %v8998_v25, %s11461_s27  ;;  %v3189_v6 = vmul.f32 %v3161_v51, %v3138_v20  ;;  %v9098_v7 = vmul.f32 %v4521_v59, %v3138_v20  ;;  %v6242_v20 = vpack.c.bf16 %v3272_v37, %v3188_v16  ;;  %v2927_v37 = vmul.f32 %v8858_v31, %v8744_v0  ;;  %v3310_v59 = vld [vmem:[#allocation7 + $0x4] ss:$8 sm:$0xf] }
 0x3ee   : > { %4308 = vrot.lane.b32.xlu1 %v8780_v48, %s11461_s27  ;;  %v2928_v31 = vmul.f32 %v8860_v14, %v8744_v0  ;;  %v4641_v0 = vrot.slane %v9094_v44, %v11471_v1 }
 0x3ef   : > { %v9086_v2 = vpop.permute.xlu1 %3208  ;;  %v9088_v13 = vpop.permute.xlu0 %3538  ;;  %11484 = vst [vmem:[#allocation29_spill] sm:$0xff] %v9098_v7 }
 0x3f0   : > { %11482 = vst [vmem:[#allocation20_spill] sm:$0xff] %v9086_v2  ;;  %11483 = vst [vmem:[#allocation28_spill] sm:$0xff] %v9088_v13  ;;  %v3222_v41 = vsel %vm594_vm3, %v8962_v47, %v9086_v2  ;;  %v4807_v2 = vld [vmem:[#allocation7 + $0xc1] ss:$8 sm:$0xf0] }
 0x3f1   : > { %v3273_v32 = vmul.f32 %v3245_v19, %v3222_v41  ;;  %v9100_v11 = vmul.f32 %v4581_v26, %v3222_v41  ;;  %3042 = vrot.lane.b32.xlu0 %v8998_v25, %s11486_s14  ;;  %v4637_v41 = vrot.slane %v9094_v44, %v11464_v29  ;;  %v3311_v19 = vld [vmem:[#allocation7 + $0x4] ss:$8 sm:$0xf0]  ;;  %v9130_v26 = vor.u32 %v3395_v21, %v3394_v62 }
 0x3f2   : > { %2964 = vrot.lane.b32.xlu1 %v8894_v57, %s11487_s20  ;;  %v9147_v62 = vor.u32 %v3311_v19, %v3310_v59  ;;  %v4806_v19 = vld [vmem:[#allocation7 + $0xc1] ss:$8 sm:$0xf]  ;;  %v3982_v13 = vld [vmem:[#allocation7 + $0x44] ss:$8 sm:$0xf] }
 0x3f3   : > { %11485 = vst [vmem:[#allocation37_spill] sm:$0xff] %v9100_v11  ;;  %v9108_v38 = vpop.permute.xlu1 %3288  ;;  %v9110_v33 = vpop.permute.xlu0 %3458  ;;  %v6240_v55 = vpack.c.bf16 %v3273_v32, %v3189_v6  ;;  %v3413_v14 = vrot.slane %v9130_v26, %v11472_v18 }
 0x3f4   : > { %v3307_v34 = vsel %vm680_vm4, %v9108_v38, %v9026_v49  ;;  %v3329_v7 = vrot.slane %v9147_v62, %v11472_v18 }
 0x3f5   : > { %3210 = vrot.lane.b32.xlu0 %v8998_v25, %s11488_s16  ;;  %6241 = vmatprep.subr.bf16.mxu1 %v6240_v55  ;;  %v9136_v16 = vmul.f32 %v4637_v41, %v3307_v34  ;;  %v2932_v41 = vadd.f32 %v2928_v31, %v8742_v12 }
 0x3f6   : > { %3048 = vrot.lane.b32.xlu1 %v8894_v57, %s11486_s14  ;;  %6243 = vmatpush1.bf16.msra.mxu1 %v6242_v20  ;;  %v2931_v20 = vadd.f32 %v2927_v37, %v8742_v12  ;;  %v4701_v37 = vrot.slane %v9096_v40, %v11471_v1 }
 0x3f7   : > { %v9126_v32 = vpop.permute.xlu1 %3372  ;;  %v9128_v51 = vpop.permute.xlu0 %3542  ;;  %11490 = vst [vmem:[#allocation48_spill] sm:$0xff] %v9136_v16 }
 0x3f8   : > { %11489 = vst [vmem:[#allocation38_spill] sm:$0xff] %v9126_v32  ;;  %v3391_v6 = vsel %vm766_vm5, %v9126_v32, %v9042_v35  ;;  %v9174_v16 = vmax.f32 %v2931_v20, 0.0  ;;  %v4746_v20 = vld [vmem:[#allocation7 + $0xc0] ss:$8 sm:$0xf] }
 0x3f9   : > { %v9138_v55 = vmul.f32 %v4697_v56, %v3391_v6  ;;  %3378 = vrot.lane.b32.xlu0 %v8998_v25, %s11492_s0  ;;  %v3409_v56 = vrot.slane %v9130_v26, %v11471_v1 }
 0x3fa   : > { %3216 = vrot.lane.b32.xlu1 %v8894_v57, %s11488_s16  ;;  %11495 = vst [vmem:[#allocation54_spill] sm:$0xff] %v9174_v16 }
 0x3fb   : > { %11491 = vst [vmem:[#allocation49_spill] sm:$0xff] %v9138_v55  ;;  %v9149_v21 = vpop.permute.xlu1 %3292  ;;  %v9151_v47 = vpop.permute.xlu0 %3622  ;;  %v3325_v55 = vrot.slane %v9147_v62, %v11471_v1  ;;  %v3440_v8 = vmul.f32 %v3409_v56, %v3391_v6  ;;  %v9194_v6 = vor.u32 %v4807_v2, %v4806_v19  ;;  %v9196_v56 = vmax.f32 %v2932_v41, 0.0  ;;  %v3563_v2 = vld [vmem:[#allocation7 + $0x7] ss:$8 sm:$0xf0] }
 0x3fc   : > { %11493 = vst [vmem:[#allocation55_spill] sm:$0xff] %v9149_v21  ;;  %11494 = vst [vmem:[#allocation63_spill] sm:$0xff] %v9151_v47  ;;  %v3306_v59 = vsel %vm680_vm4, %v9026_v49, %v9149_v21  ;;  %v3479_v41 = vld [vmem:[#allocation7 + $0x6] ss:$8 sm:$0xf0] }
 0x3fd   : > { %3546 = vrot.lane.b32.xlu0 %v8998_v25, %s11456_s8  ;;  %v3357_v21 = vmul.f32 %v3329_v7, %v3306_v59  ;;  %v9186_v30 = vmul.f32 %v4641_v0, %v3306_v59  ;;  %11500 = vst [vmem:[#allocation70_spill] sm:$0xff] %v9196_v56  ;;  %v3356_v45 = vmul.f32 %v3325_v55, %v3307_v34  ;;  %v3478_v55 = vld [vmem:[#allocation7 + $0x6] ss:$8 sm:$0xf] }
 0x3fe   : > { %3384 = vrot.lane.b32.xlu1 %v8894_v57, %s11492_s0  ;;  %v4817_v34 = vrot.slane %v9194_v6, %v11464_v29 }
 0x3ff   : > { %v9178_v11 = vpop.permute.xlu1 %3376  ;;  %v9180_v17 = vpop.permute.xlu0 %3706  ;;  %11498 = vst [vmem:[#allocation64_spill] sm:$0xff] %v9186_v30  ;;  %v6246_v59 = vpack.c.bf16 %v3440_v8, %v3356_v45 }
 0x400   : > { %11496 = vst [vmem:[#allocation59_spill] sm:$0xff] %v9178_v11  ;;  %11497 = vst [vmem:[#allocation58_spill] sm:$0xff] %v9180_v17  ;;  %v3390_v49 = vsel %vm766_vm5, %v9042_v35, %v9178_v11 }
 0x401   : > { %v3441_v12 = vmul.f32 %v3413_v14, %v3390_v49  ;;  %v9188_v31 = vmul.f32 %v4701_v37, %v3390_v49  ;;  %3044 = vrot.lane.b32.xlu0 %v9174_v16, %s11486_s14  ;;  %v9204_v37 = vor.u32 %v4747_v52, %v4746_v20  ;;  %v3562_v49 = vld [vmem:[#allocation7 + $0x7] ss:$8 sm:$0xf]  ;;  %v9230_v20 = vor.u32 %v3479_v41, %v3478_v55 }
 0x402   : > { %3552 = vrot.lane.b32.xlu1 %v8894_v57, %s11456_s8  ;;  %v9218_v8 = vor.u32 %v3563_v2, %v3562_v49  ;;  %v4821_v41 = vrot.slane %v9194_v6, %v11471_v1 }
 0x403   : > { %11499 = vst [vmem:[#allocation65_spill] sm:$0xff] %v9188_v31  ;;  %v9200_v35 = vpop.permute.xlu1 %3456  ;;  %v9202_v0 = vpop.permute.xlu0 %3626  ;;  %v6244_v14 = vpack.c.bf16 %v3441_v12, %v3357_v21  ;;  %11502 = vst [vmem:[#allocation67_spill] sm:$0xff] %v9204_v37  ;;  %v4757_v45 = vrot.slane %v9204_v37, %v11464_v29  ;;  %v3497_v30 = vrot.slane %v9230_v20, %v11472_v18 }
 0x404   : > { %11501 = vst [vmem:[#allocation68_spill] sm:$0xff] %v9200_v35  ;;  %v3475_v12 = vsel %vm852_vm6, %v9200_v35, %v9110_v33  ;;  %11505 = vst [vmem:[#allocation66_spill] sm:$0xff] %v9230_v20  ;;  %v3577_v7 = vrot.slane %v9218_v8, %v11471_v1  ;;  %v4761_v55 = vrot.slane %v9204_v37, %v11471_v1 }
 0x405   : > { %3046 = vrot.lane.b32.xlu0 %v9196_v56, %s11486_s14  ;;  %6245 = vmatprep.subr.bf16.mxu1 %v6244_v14  ;;  %s11504_s14 = smov 71   ;;  %v9240_v2 = vmul.f32 %v4757_v45, %v3475_v12  ;;  %v3493_v45 = vrot.slane %v9230_v20, %v11471_v1 }
 0x406   : > { %3720 = vrot.lane.b32.xlu1 %v8894_v57, %s11458_s29  ;;  %6247 = vmatpush1.bf16.msra.mxu1 %v6246_v59 }
 0x407   : > { %v9212_v19 = vpop.permute.xlu1 %3540  ;;  %v9214_v52 = vpop.permute.xlu0 %3710  ;;  %11509 = vst [vmem:[#allocation74_spill] sm:$0xff] %v9240_v2  ;;  %v3524_v11 = vmul.f32 %v3493_v45, %v3475_v12 }
 0x408   : > { %11503 = vst [vmem:[#allocation69_spill] sm:$0xff] %v9212_v19  ;;  %v3559_v21 = vsel %vm938_vm7, %v9212_v19, %v9128_v51 }
 0x409   : > { %3128 = vrot.lane.b32.xlu0 %v9174_v16, %s11504_s14  ;;  %v9232_v14 = vmul.f32 %v4817_v34, %v3559_v21  ;;  %v3581_v34 = vrot.slane %v9218_v8, %v11472_v18  ;;  %v3608_v24 = vmul.f32 %v3577_v7, %v3559_v21  ;;  %v9330_v7 = vld [vmem:[#allocation10 + $0x8] sm:$0xff] }
 0x40a   : > { %3888 = vrot.lane.b32.xlu1 %v8894_v57, %s11293_s17  ;;  %11524 = vst [vmem:[#allocation36_spill] sm:$0xff] %v9330_v7  ;;  %5962 = vmatprep.mubr.msk.f32.mxu1 %vm11527_vm8, %v9330_v7  ;;  %vm11537_vm8 = vmmov %vm11536_vm11 }
 0x40b   : > { %11506 = vst [vmem:[#allocation72_spill] sm:$0xff] %v9232_v14  ;;  %v9236_v59 = vpop.permute.xlu1 %3460  ;;  %v9238_v49 = vpop.permute.xlu0 %3790  ;;  %5961 = vmatprep.mubr.msk.f32.mxu0 %vm11528_vm13, %v9330_v7  ;;  %vm11539_vm13 = vmmov %vm11535_vm12 }
 0x40c   : > { %11507 = vst [vmem:[#allocation71_spill] sm:$0xff] %v9236_v59  ;;  %11508 = vst [vmem:[#allocation73_spill] sm:$0xff] %v9238_v49  ;;  %v3474_v31 = vsel %vm852_vm6, %v9110_v33, %v9236_v59 }
 0x40d   : > { %3130 = vrot.lane.b32.xlu0 %v9196_v56, %s11504_s14  ;;  %v3525_v17 = vmul.f32 %v3497_v30, %v3474_v31  ;;  %v9272_v28 = vmul.f32 %v4761_v55, %v3474_v31  ;;  %v3731_v31 = vld [vmem:[#allocation7 + $0x41] ss:$8 sm:$0xf0] }
 0x40e   : > { %2958 = vrot.lane.b32.xlu1 %v8998_v25, %s11487_s20 }
 0x40f   : > { %v9264_v4 = vpop.permute.xlu1 %3544  ;;  %v9266_v49 = vpop.permute.xlu0 %3874  ;;  %11512 = vst [vmem:[#allocation76_spill] sm:$0xff] %v9272_v28 }
 0x410   : > { %11510 = vst [vmem:[#allocation77_spill] sm:$0xff] %v9264_v4  ;;  %11511 = vst [vmem:[#allocation78_spill] sm:$0xff] %v9266_v49  ;;  %v3558_v47 = vsel %vm938_vm7, %v9128_v51, %v9264_v4  ;;  %v6250_v51 = vpack.c.bf16 %v3608_v24, %v3524_v11 }
 0x411   : > { %v3609_v33 = vmul.f32 %v3581_v34, %v3558_v47  ;;  %v9274_v59 = vmul.f32 %v4821_v41, %v3558_v47  ;;  %3296 = vrot.lane.b32.xlu0 %v9174_v16, %s11514_s1  ;;  %v3730_v47 = vld [vmem:[#allocation7 + $0x41] ss:$8 sm:$0xf]  ;;  %v3646_v34 = vld [vmem:[#allocation7 + $0x40] ss:$8 sm:$0xf] }
 0x412   : > { %3126 = vrot.lane.b32.xlu1 %v8998_v25, %s11504_s14  ;;  %v3647_v41 = vld [vmem:[#allocation7 + $0x40] ss:$8 sm:$0xf0]  ;;  %v9294_v45 = vor.u32 %v3731_v31, %v3730_v47  ;;  %s11518_s14 = smov 57  }
 0x413   : > { %11513 = vst [vmem:[#allocation75_spill] sm:$0xff] %v9274_v59  ;;  %v9282_v21 = vpop.permute.xlu1 %3624  ;;  %v9284_v2 = vpop.permute.xlu0 %3794  ;;  %v6248_v30 = vpack.c.bf16 %v3609_v33, %v3525_v17  ;;  %v9300_v24 = vor.u32 %v3647_v41, %v3646_v34 }
 0x414   : > { %11515 = vst [vmem:[#allocation83_spill] sm:$0xff] %v9282_v21  ;;  %11517 = vst [vmem:[#allocation79_spill] sm:$0xff] %v9294_v45  ;;  %v3745_v33 = vrot.slane %v9294_v45, %v11471_v1  ;;  %v3749_v47 = vrot.slane %v9294_v45, %v11472_v18  ;;  %v9336_v14 = vsel %vm1024_vm9, %v9282_v21, %v9202_v0 }
 0x415   : > { %3298 = vrot.lane.b32.xlu0 %v9196_v56, %s11514_s1  ;;  %6249 = vmatprep.subr.bf16.mxu1 %v6248_v30  ;;  %11519 = vst [vmem:[#allocation19_spill] sm:$0xff] %v9300_v24  ;;  %v3661_v31 = vrot.slane %v9300_v24, %v11471_v1  ;;  %11525 = vst [vmem:[#allocation39_spill] sm:$0xff] %v9336_v14 }
 0x416   : > { %3294 = vrot.lane.b32.xlu1 %v8998_v25, %s11514_s1  ;;  %6251 = vmatpush1.bf16.msra.mxu1 %v6250_v51  ;;  %v3665_v51 = vrot.slane %v9300_v24, %v11472_v18 }
 0x417   : > { %v9290_v12 = vpop.permute.xlu1 %3708  ;;  %v9292_v55 = vpop.permute.xlu0 %3878  ;;  %v3692_v49 = vmul.f32 %v3661_v31, %v9336_v14  ;;  %v3815_v31 = vld [vmem:[#allocation7 + $0x42] ss:$8 sm:$0xf0] }
 0x418   : > { %11516 = vst [vmem:[#allocation80_spill] sm:$0xff] %v9290_v12  ;;  %v3727_v30 = vsel %vm1110_vm10, %v9290_v12, %v9214_v52 }
 0x419   : > { %3464 = vrot.lane.b32.xlu0 %v9174_v16, %s11518_s14  ;;  %v3776_v59 = vmul.f32 %v3745_v33, %v3727_v30 }
 0x41a   : > { %3462 = vrot.lane.b32.xlu1 %v8998_v25, %s11518_s14 }
 0x41b   : > { %v9302_v17 = vpop.permute.xlu1 %3628  ;;  %v9304_v11 = vpop.permute.xlu0 %3958 }
 0x41c   : > { %11520 = vst [vmem:[#allocation24_spill] sm:$0xff] %v9302_v17  ;;  %11521 = vst [vmem:[#allocation25_spill] sm:$0xff] %v9304_v11  ;;  %v9326_v34 = vsel %vm1024_vm9, %v9202_v0, %v9302_v17 }
 0x41d   : > { %3466 = vrot.lane.b32.xlu0 %v9196_v56, %s11518_s14  ;;  %11522 = vst [vmem:[#allocation30_spill] sm:$0xff] %v9326_v34  ;;  %v3693_v0 = vmul.f32 %v3665_v51, %v9326_v34  ;;  %v3898_v51 = vld [vmem:[#allocation7 + $0x43] ss:$8 sm:$0xf] }
 0x41e   : > { %2960 = vrot.lane.b32.xlu1 %v9174_v16, %s11487_s20 }
 0x41f   : > { %v9328_v41 = vpop.permute.xlu0 %3964  ;;  %v9338_v28 = vpop.permute.xlu1 %3712 }
 0x420   : > { %11523 = vst [vmem:[#allocation31_spill] sm:$0xff] %v9328_v41  ;;  %11526 = vst [vmem:[#allocation40_spill] sm:$0xff] %v9338_v28  ;;  %v3726_v17 = vsel %vm1110_vm10, %v9214_v52, %v9338_v28  ;;  %v6254_v52 = vpack.c.bf16 %v3776_v59, %v3692_v49  ;;  %v3814_v28 = vld [vmem:[#allocation7 + $0x42] ss:$8 sm:$0xf] }
 0x421   : > { %3632 = vrot.lane.b32.xlu0 %v9174_v16, %s11457_s13  ;;  %v3777_v4 = vmul.f32 %v3749_v47, %v3726_v17  ;;  %v3899_v17 = vld [vmem:[#allocation7 + $0x43] ss:$8 sm:$0xf0] }
 0x422   : > { %2962 = vrot.lane.b32.xlu1 %v9196_v56, %s11487_s20  ;;  %v9366_v34 = vor.u32 %v3899_v17, %v3898_v51 }
 0x423   : > { %v9354_v33 = vpop.permute.xlu0 %4054  ;;  %v9356_v30 = vpop.permute.xlu1 %3792  ;;  %v6252_v21 = vpack.c.bf16 %v3777_v4, %v3693_v0  ;;  %v9372_v4 = vor.u32 %v3815_v31, %v3814_v28 }
 0x424   : > { %11529 = vst [vmem:[#allocation50_spill] sm:$0xff] %v9356_v30  ;;  %11531 = vst [vmem:[#allocation60_spill] sm:$0xff] %v9366_v34  ;;  %v3917_v28 = vrot.slane %v9366_v34, %v11472_v18  ;;  %v3811_v14 = vsel %vm11537_vm8, %v9356_v30, %v9284_v2 }
 0x425   : > { %3716 = vrot.lane.b32.xlu0 %v9174_v16, %s11458_s29  ;;  %6253 = vmatprep.subr.bf16.mxu1 %v6252_v21  ;;  %11532 = vst [vmem:[#allocation32_spill] sm:$0xff] %v9372_v4  ;;  %v3913_v21 = vrot.slane %v9366_v34, %v11471_v1  ;;  %v3829_v51 = vrot.slane %v9372_v4, %v11471_v1 }
 0x426   : > { %3630 = vrot.lane.b32.xlu1 %v8998_v25, %s11457_s13  ;;  %6255 = vmatpush1.bf16.msra.mxu1 %v6254_v52  ;;  %v3833_v52 = vrot.slane %v9372_v4, %v11472_v18 }
 0x427   : > { %v9362_v47 = vpop.permute.xlu0 %4138  ;;  %v9364_v7 = vpop.permute.xlu1 %3876  ;;  %v3860_v22 = vmul.f32 %v3829_v51, %v3811_v14  ;;  %v4158_v14 = vld [vmem:[#allocation7 + $0x47] ss:$8 sm:$0xf] }
 0x428   : > { %11530 = vst [vmem:[#allocation51_spill] sm:$0xff] %v9364_v7  ;;  %v3895_v0 = vsel %vm11535_vm12, %v9364_v7, %v9292_v55  ;;  %vm11541_vm12 = vcmp.lt.s32.totalorder %v7124_v15, 1 }
 0x429   : > { %3718 = vrot.lane.b32.xlu0 %v9196_v56, %s11458_s29  ;;  %v3944_v12 = vmul.f32 %v3913_v21, %v3895_v0 }
 0x42a   : > { %3212 = vrot.lane.b32.xlu1 %v9174_v16, %s11488_s16 }
 0x42b   : > { %v9374_v59 = vpop.permute.xlu0 %4134  ;;  %v9376_v49 = vpop.permute.xlu1 %3796  ;;  %v6258_v32 = vpack.c.bf16 %v3944_v12, %v3860_v22  ;;  %v4075_v22 = vld [vmem:[#allocation7 + $0x46] ss:$8 sm:$0xf0]  ;;  %v4159_v12 = vld [vmem:[#allocation7 + $0x47] ss:$8 sm:$0xf0] }
 0x42c   : > { %11533 = vst [vmem:[#allocation35_spill] sm:$0xff] %v9374_v59  ;;  %11534 = vst [vmem:[#allocation84_spill] sm:$0xff] %v9376_v49  ;;  %v3810_v17 = vsel %vm11536_vm11, %v9284_v2, %v9376_v49  ;;  %v3983_v49 = vld [vmem:[#allocation7 + $0x44] ss:$8 sm:$0xf0] }
 0x42d   : > { %3800 = vrot.lane.b32.xlu0 %v9174_v16, %s11459_s19  ;;  %v3861_v19 = vmul.f32 %v3833_v52, %v3810_v17  ;;  %v9416_v30 = vor.u32 %v3983_v49, %v3982_v13  ;;  %vm11544_vm11 = vmmov %vm11541_vm12 }
 0x42e   : > { %3214 = vrot.lane.b32.xlu1 %v9196_v56, %s11488_s16  ;;  %vm11545_vm8 = vmmov %vm11544_vm11 }
 0x42f   : > { %v9398_v31 = vpop.permute.xlu0 %4222  ;;  %v9404_v7 = vpop.permute.xlu1 %3880  ;;  %11540 = vst [vmem:[#allocation18_spill] sm:$0xff] %v9416_v30  ;;  %v4001_v13 = vrot.slane %v9416_v30, %v11472_v18 }
 0x430   : > { %11538 = vst [vmem:[#allocation17_spill] sm:$0xff] %v9404_v7  ;;  %v3894_v35 = vsel %vm11539_vm13, %v9292_v55, %v9404_v7  ;;  %vm11549_vm13 = vcmp.lt.s32.totalorder %v7124_v15, 127 }
 0x431   : > { %3884 = vrot.lane.b32.xlu0 %v9174_v16, %s11293_s17  ;;  %v3945_v23 = vmul.f32 %v3917_v28, %v3894_v35  ;;  %v3997_v35 = vrot.slane %v9416_v30, %v11471_v1 }
 0x432   : > { %3380 = vrot.lane.b32.xlu1 %v9174_v16, %s11492_s0 }
 0x433   : > { %v9414_v2 = vpop.permute.xlu0 %4306  ;;  %v3961_v21 = vpop.permute.xlu1 %3960  ;;  %v6256_v0 = vpack.c.bf16 %v3945_v23, %v3861_v19  ;;  %v4074_v23 = vld [vmem:[#allocation7 + $0x46] ss:$8 sm:$0xf] }
 0x434   : > { %v9421_v55 = vsel %vm11541_vm12, %v9304_v11, %v3961_v21  ;;  %vm11551_vm12 = vcmp.lt.s32.totalorder %v7124_v15, 121 }
 0x435   : > { %11542 = vst [vmem:[#allocation23_spill] sm:$0xff] %v9421_v55  ;;  %3886 = vrot.lane.b32.xlu0 %v9196_v56, %s11293_s17  ;;  %6257 = vmatprep.subr.bf16.mxu1 %v6256_v0  ;;  %v9444_v0 = vor.u32 %v4159_v12, %v4158_v14 }
 0x436   : > { %3382 = vrot.lane.b32.xlu1 %v9196_v56, %s11492_s0  ;;  %6259 = vmatpush1.bf16.msra.mxu1 %v6258_v32  ;;  %v9442_v32 = vor.u32 %v4075_v22, %v4074_v23 }
 0x437   : > { %v9431_v19 = vpop.permute.xlu0 %4302  ;;  %v3963_v49 = vpop.permute.xlu1 %3962  ;;  %11547 = vst [vmem:[#allocation88_spill] sm:$0xff] %v9444_v0  ;;  %v4165_v14 = vrot.slane %v9444_v0, %v11465_v58 }
 0x438   : > { %11543 = vst [vmem:[#allocation86_spill] sm:$0xff] %v9431_v19  ;;  %v3978_v52 = vsel %vm11544_vm11, %v3963_v49, %v9328_v41  ;;  %v3979_v28 = vsel %vm11545_vm8, %v3961_v21, %v3963_v49  ;;  %11546 = vst [vmem:[#allocation87_spill] sm:$0xff] %v9442_v32 }
 0x439   : > { %3968 = vrot.lane.b32.xlu0 %v9174_v16, %s11295_s7  ;;  %v4028_v51 = vmul.f32 %v3997_v35, %v3979_v28  ;;  %v4029_v17 = vmul.f32 %v4001_v13, %v3978_v52  ;;  %v4085_v35 = vrot.slane %v9442_v32, %v11464_v29  ;;  %vm11554_vm11 = vmmov %vm11551_vm12 }
 0x43a   : > { %3548 = vrot.lane.b32.xlu1 %v9174_v16, %s11456_s8  ;;  %vm11557_vm8 = vmmov %vm11549_vm13 }
 0x43b   : > { %v9446_v7 = vpop.permute.xlu0 %3132  ;;  %v6262_v19 = vpack.c.bf16 %v8754_v10, %v4028_v51  ;;  %v4053_v41 = vpop.permute.xlu1 %4052  ;;  %v6260_v11 = vpack.c.bf16 %v8780_v48, %v4029_v17  ;;  %v4169_v10 = vrot.slane %v9444_v0, %v11464_v29 }
 0x43c   : > { %11548 = vst [vmem:[#allocation89_spill] sm:$0xff] %v9446_v7  ;;  %v4071_v21 = vsel %vm11549_vm13, %v4053_v41, %v9354_v33  ;;  %vm11568_vm13 = vmmov %vm11554_vm11 }
 0x43d   : > { %4060 = vrot.lane.b32.xlu0 %v9174_v16, %s11299_s15  ;;  %6261 = vmatprep.subr.bf16.mxu1 %v6260_v11  ;;  %v9468_v22 = vmul.f32 %v4085_v35, %v4071_v21 }
 0x43e   : > { %3550 = vrot.lane.b32.xlu1 %v9196_v56, %s11456_s8  ;;  %6263 = vmatpush1.bf16.msra.mxu1 %v6262_v19  ;;  %v4081_v19 = vrot.slane %v9442_v32, %v11465_v58 }
 0x43f   : > { %v9461_v13 = vpop.permute.xlu0 %3300  ;;  %v4137_v48 = vpop.permute.xlu1 %4136  ;;  %11552 = vst [vmem:[#allocation91_spill] sm:$0xff] %v9468_v22 }
 0x440   : > { %11550 = vst [vmem:[#allocation90_spill] sm:$0xff] %v9461_v13  ;;  %v4155_v23 = vsel %vm11551_vm12, %v4137_v48, %v9362_v47  ;;  %v4156_v12 = vsel %vm11554_vm11, %v9374_v59, %v4137_v48  ;;  %vm11571_vm12 = vmmov %vm11557_vm8 }
 0x441   : > { %4144 = vrot.lane.b32.xlu0 %v9174_v16, %s11301_s11  ;;  %v9472_v11 = vmul.f32 %v4169_v10, %v4155_v23  ;;  %v9492_v17 = vmul.f32 %v4165_v14, %v4156_v12  ;;  %v4243_v23 = vld [vmem:[#allocation7 + $0x80] ss:$8 sm:$0xf0]  ;;  %v4327_v12 = vld [vmem:[#allocation7 + $0x81] ss:$8 sm:$0xf0]  ;;  %vm11572_vm11 = vmmov %vm11557_vm8 }
 0x442   : > { %3714 = vrot.lane.b32.xlu1 %v8998_v25, %s11458_s29 }
 0x443   : > { %11553 = vst [vmem:[#allocation92_spill] sm:$0xff] %v9472_v11  ;;  %v9481_v49 = vpop.permute.xlu0 %3468  ;;  %v9483_v52 = vpop.permute.xlu1 %4050  ;;  %11558 = vst [vmem:[#allocation95_spill] sm:$0xff] %v9492_v17  ;;  %v4093_v11 = vrot.slane %v9442_v32, %v11472_v18 }
 0x444   : > { %11555 = vst [vmem:[#allocation93_spill] sm:$0xff] %v9481_v49  ;;  %11556 = vst [vmem:[#allocation94_spill] sm:$0xff] %v9483_v52  ;;  %v4072_v51 = vsel %vm11557_vm8, %v9483_v52, %v4053_v41  ;;  %v4242_v41 = vld [vmem:[#allocation7 + $0x80] ss:$8 sm:$0xf] }
 0x445   : > { %4064 = vrot.lane.b32.xlu0 %v8894_v57, %s11299_s15  ;;  %v9494_v21 = vmul.f32 %v4081_v19, %v4072_v51  ;;  %v4326_v19 = vld [vmem:[#allocation7 + $0x81] ss:$8 sm:$0xf]  ;;  %v9512_v10 = vor.u32 %v4243_v23, %v4242_v41  ;;  %vm11575_vm8 = vmmov %vm11568_vm13 }
 0x446   : > { %3634 = vrot.lane.b32.xlu1 %v9196_v56, %s11457_s13  ;;  %v9514_v28 = vor.u32 %v4327_v12, %v4326_v19  ;;  %v4173_v19 = vrot.slane %v9444_v0, %v11471_v1 }
 0x447   : > { %11559 = vst [vmem:[#allocation96_spill] sm:$0xff] %v9494_v21  ;;  %v9498_v35 = vpop.permute.xlu0 %3636  ;;  %v4057_v48 = vpop.permute.xlu1 %4056  ;;  %11562 = vst [vmem:[#allocation99_spill] sm:$0xff] %v9512_v10  ;;  %v4253_v21 = vrot.slane %v9512_v10, %v11464_v29 }
 0x448   : > { %11560 = vst [vmem:[#allocation97_spill] sm:$0xff] %v9498_v35  ;;  %11563 = vst [vmem:[#allocation100_spill] sm:$0xff] %v9514_v28 }
 0x449   : > { %4228 = vrot.lane.b32.xlu0 %v9174_v16, %s11460_s10 }
 0x44a   : > { %3798 = vrot.lane.b32.xlu1 %v8998_v25, %s11459_s19 }
 0x44b   : > { %v9506_v14 = vpop.permute.xlu0 %3804 }
 0x44c   : > { %11561 = vst [vmem:[#allocation98_spill] sm:$0xff] %v9506_v14  ;;  %v4141_v51 = vpop.permute.xlu1 %4140 }
 0x44d   : > { %4312 = vrot.lane.b32.xlu0 %v9174_v16, %s11461_s27  ;;  %v4337_v16 = vrot.slane %v9514_v28, %v11464_v29  ;;  %v4154_v17 = vsel %vm11568_vm13, %v9362_v47, %v4141_v51  ;;  %vm11616_vm13 = vcmp.lt.s32.totalorder %v7124_v15, 7 }
 0x44e   : > { %3882 = vrot.lane.b32.xlu1 %v8998_v25, %s11293_s17 }
 0x44f   : > { %v9516_v59 = vpop.permute.xlu0 %3972 }
 0x450   : > { %11564 = vst [vmem:[#allocation101_spill] sm:$0xff] %v9516_v59  ;;  %v9518_v52 = vpop.permute.xlu1 %4220  ;;  %v4089_v59 = vrot.slane %v9442_v32, %v11471_v1 }
 0x451   : > { %11565 = vst [vmem:[#allocation102_spill] sm:$0xff] %v9518_v52  ;;  %4232 = vrot.lane.b32.xlu0 %v8894_v57, %s11460_s10  ;;  %v4239_v41 = vsel %vm1634_vm14, %v9518_v52, %v9398_v31  ;;  %v4177_v52 = vrot.slane %v9444_v0, %v11472_v18  ;;  %v4204_v0 = vmul.f32 %v4173_v19, %v4154_v17 }
 0x452   : > { %3802 = vrot.lane.b32.xlu1 %v9196_v56, %s11459_s19  ;;  %v9551_v55 = vmul.f32 %v4253_v21, %v4239_v41  ;;  %v4866_v21 = vld [vmem:[#allocation7 + $0xc2] ss:$8 sm:$0xf]  ;;  %s5975_s19 = sshll.u32 %s6802_s25, 10  ;;  %s5829_s25 = scalar_lea.sflag [#allocation6], %s6971_s26 }
 0x453   : > { %v9532_v23 = vpop.permute.xlu0 %4058  ;;  %v4867_v41 = vld [vmem:[#allocation7 + $0xc2] ss:$8 sm:$0xf0] }
 0x454   : > { %11566 = vst [vmem:[#allocation103_spill] sm:$0xff] %v9532_v23  ;;  %v9536_v12 = vpop.permute.xlu1 %4304  ;;  %11569 = vst [vmem:[#allocation105_spill] sm:$0xff] %v9551_v55  ;;  %v4069_v47 = vsel %vm11571_vm12, %v4057_v48, %v9532_v23  ;;  %vm11627_vm12 = vcmp.lt.s32.totalorder %v7124_v15, 8 }
 0x455   : > { %11567 = vst [vmem:[#allocation104_spill] sm:$0xff] %v9536_v12  ;;  %v4323_v22 = vsel %vm1720_vm15, %v9536_v12, %v9414_v2  ;;  %v4070_v12 = vsel %vm11572_vm11, %v9354_v33, %v4057_v48  ;;  %v4121_v23 = vmul.f32 %v4093_v11, %v4069_v47  ;;  %v3237_v48 = vrot.slane %v9044_v54, %v11464_v29  ;;  %vm11633_vm11 = vmmov %vm11627_vm12 }
 0x456   : > { %v9553_v14 = vmul.f32 %v4337_v16, %v4323_v22  ;;  %3966 = vrot.lane.b32.xlu1 %v8998_v25, %s11295_s7  ;;  %v4120_v17 = vmul.f32 %v4089_v59, %v4070_v12  ;;  %v9590_v12 = vor.u32 %v4867_v41, %v4866_v21  ;;  %v4345_v21 = vrot.slane %v9514_v28, %v11472_v18 }
 0x457   : > { %v9563_v35 = vpop.permute.xlu0 %4142  ;;  %v3233_v41 = vrot.slane %v9044_v54, %v11465_v58 }
 0x458   : > { %11570 = vst [vmem:[#allocation106_spill] sm:$0xff] %v9553_v14  ;;  %11573 = vst [vmem:[#allocation107_spill] sm:$0xff] %v9563_v35  ;;  %v9565_v49 = vpop.permute.xlu1 %4218  ;;  %v4153_v16 = vsel %vm11575_vm8, %v4141_v51, %v9563_v35  ;;  %v11584_v35 = vld [vmem:[#allocation42_spill] sm:$0xff]  ;;  %vm11640_vm8 = vcmp.lt.s32.totalorder %v7124_v15, 1 }
 0x459   : > { %11574 = vst [vmem:[#allocation108_spill] sm:$0xff] %v9565_v49  ;;  %v4205_v32 = vmul.f32 %v4177_v52, %v4153_v16  ;;  %11577 = vst [vmem:[#allocation110_spill] sm:$0xff] %v9590_v12  ;;  %v6266_v16 = vpack.c.bf16 %v4204_v0, %v4120_v17  ;;  %v4341_v0 = vrot.slane %v9514_v28, %v11471_v1 }
 0x45a   : > { %3970 = vrot.lane.b32.xlu1 %v9196_v56, %s11295_s7  ;;  %s6745_s7 = smov [#allocation12]  }
 0x45b   : > { %v9584_v52 = vpop.permute.xlu0 %4226  ;;  %v6264_v19 = vpack.c.bf16 %v4205_v32, %v4121_v23  ;;  %v4257_v32 = vrot.slane %v9512_v10, %v11471_v1  ;;  %v4261_v23 = vrot.slane %v9512_v10, %v11472_v18  ;;  %s6644_s8 = sshll.u32 %s6745_s7, 4  ;;  %s6645_s8 = int_to_ptr.vmem [resolvable:$false] %s6644_s8 }
 0x45c   : > { %11576 = vst [vmem:[#allocation109_spill] sm:$0xff] %v9584_v52  ;;  %v4225_v22 = vpop.permute.xlu1 %4224  ;;  %s6646_s13 = scalar_lea.vmem %s6645_s8, 2048 }
 0x45d   : > { %6265 = vmatprep.subr.bf16.mxu1 %v6264_v19  ;;  %v4238_v19 = vsel %vm1634_vm14, %v9398_v31, %v4225_v22 }
 0x45e   : > { %4062 = vrot.lane.b32.xlu1 %v9196_v56, %s11299_s15  ;;  %6267 = vmatpush1.bf16.msra.mxu1 %v6266_v16  ;;  %v4237_v16 = vsel %vm1634_vm14, %v4225_v22, %v9584_v52  ;;  %v4288_v59 = vmul.f32 %v4257_v32, %v4238_v19  ;;  %v4541_v22 = vrot.slane %v9010_v61, %v11318_v9  ;;  %s10902_s15 = scalar_lea.hbm %s10956_s6, %s5975_s19 }
 0x45f   : > { %v9618_v11 = vpop.permute.xlu0 %4310  ;;  %v4289_v51 = vmul.f32 %v4261_v23, %v4237_v16  ;;  %v2981_v16 = vrot.slane %v8906_v46, %v11465_v58 }
 0x460   : > { %11578 = vst [vmem:[#allocation111_spill] sm:$0xff] %v9618_v11  ;;  %v4309_v17 = vpop.permute.xlu1 %4308 }
 0x461   : > { %v4322_v47 = vsel %vm1720_vm15, %v9414_v2, %v4309_v17  ;;  %v4321_v33 = vsel %vm1720_vm15, %v4309_v17, %v9618_v11  ;;  %v3149_v2 = vrot.slane %v9058_v27, %v11465_v58  ;;  %v11583_v11 = vld [vmem:[#allocation43_spill] sm:$0xff] }
 0x462   : > { %v4372_v25 = vmul.f32 %v4341_v0, %v4322_v47  ;;  %v4373_v52 = vmul.f32 %v4345_v21, %v4321_v33  ;;  %4146 = vrot.lane.b32.xlu1 %v9196_v56, %s11301_s11  ;;  %v9654_v33 = vsel %vm594_vm3, %v8920_v60, %v9040_v39  ;;  %v9664_v21 = vsel %vm508_vm2, %v8904_v43, %v9024_v50 }
 0x463   : > { %v9648_v17 = vpop.permute.xlu0 %3042  ;;  %v3065_v50 = vrot.slane %v8912_v5, %v11465_v58  ;;  %v11580_v39 = vrot.slane %v9058_v27, %v11464_v29  ;;  %v4601_v47 = vrot.slane %v9012_v42, %v11318_v9 }
 0x464   : > { %v6270_v32 = vpack.c.bf16 %v4372_v25, %v4288_v59  ;;  %v9658_v23 = vpop.permute.xlu1 %2964  ;;  %v6268_v0 = vpack.c.bf16 %v4373_v52, %v4289_v51  ;;  %v4421_v25 = vrot.slane %v8908_v36, %v11318_v9  ;;  %v4481_v51 = vrot.slane %v8914_v63, %v11318_v9 }
 0x465   : > { %11579 = vst [vmem:[#allocation112_spill] sm:$0xff] %v9658_v23  ;;  %v3271_v52 = vmul.f32 %v3237_v48, %v9654_v33  ;;  %v2973_v31 = vsel %vm337_vm1, %v9658_v23, %v8896_v53  ;;  %v3187_v19 = vmul.f32 %v11580_v39, %v9664_v21  ;;  %v9707_v53 = vsel %vm680_vm4, %v8977_v3, %v9108_v38 }
 0x466   : > { %4148 = vrot.lane.b32.xlu1 %v8894_v57, %s11301_s11  ;;  %6269 = vmatprep.subr.bf16.mxu1 %v6268_v0  ;;  %v3141_v48 = vsel %vm508_vm2, %v9446_v7, %v8904_v43  ;;  %v3018_v1 = vmul.f32 %v2981_v16, %v2973_v31  ;;  %v9723_v12 = vmul.f32 %v4421_v25, %v2973_v31 }
 0x467   : > { %6271 = vmatpush1.bf16.msra.mxu1 %v6270_v32  ;;  %v9689_v0 = vpop.permute.xlu0 %3210  ;;  %v11582_v32 = vld [vmem:[#allocation38_spill] sm:$0xff]  ;;  %v6188_v43 = vpack.c.bf16 %v3271_v52, %v3187_v19  ;;  %v3401_v7 = vrot.slane %v9130_v26, %v11465_v58  ;;  %v11588_v31 = vrot.slane %v9147_v62, %v11464_v29  ;;  %v11589_v16 = vrot.slane %v9130_v26, %v11464_v29  ;;  %v11591_v52 = vld [vmem:[#allocation69_spill] sm:$0xff] }
 0x468   : > { %v9697_v59 = vpop.permute.xlu1 %3048  ;;  %v9713_v39 = vsel %vm766_vm5, %v11583_v11, %v11582_v32  ;;  %11585 = vst [vmem:[#allocation38_spill] sm:$0xff] %v9723_v12  ;;  %v11592_v32 = vld [vmem:[#allocation28_spill] sm:$0xff]  ;;  %v9755_v49 = vmul.f32 %v4541_v22, %v3141_v48  ;;  %v11599_v22 = vrot.slane %v9218_v8, %v11464_v29 }
 0x469   : > { %11581 = vst [vmem:[#allocation113_spill] sm:$0xff] %v9697_v59  ;;  %v3057_v23 = vsel %vm422_vm0, %v9697_v59, %v11584_v35  ;;  %v4721_v35 = vrot.slane %v9096_v40, %v11318_v9  ;;  %v3439_v25 = vmul.f32 %v11589_v16, %v9713_v39  ;;  %v9753_v59 = vsel %vm938_vm7, %v11592_v32, %v11591_v52  ;;  %v11600_v12 = vld [vmem:[#allocation80_spill] sm:$0xff] }
 0x46a   : > { %v3102_v38 = vmul.f32 %v3065_v50, %v3057_v23  ;;  %v9725_v55 = vmul.f32 %v4481_v51, %v3057_v23  ;;  %4230 = vrot.lane.b32.xlu1 %v9196_v56, %s11460_s10  ;;  %v3355_v23 = vmul.f32 %v11588_v31, %v9707_v53  ;;  %11593 = vst [vmem:[#allocation69_spill] sm:$0xff] %v9755_v49 }
 0x46b   : > { %v9731_v14 = vpop.permute.xlu0 %3378 }
 0x46c   : > { %11586 = vst [vmem:[#allocation43_spill] sm:$0xff] %v9725_v55  ;;  %11587 = vst [vmem:[#allocation42_spill] sm:$0xff] %v9731_v14  ;;  %v6186_v50 = vpack.c.bf16 %v3102_v38, %v3018_v1  ;;  %v9745_v51 = vpop.permute.xlu1 %3216  ;;  %v3186_v14 = vmul.f32 %v3149_v2, %v3141_v48  ;;  %v3309_v1 = vsel %vm680_vm4, %v9461_v13, %v8977_v3  ;;  %v11601_v55 = vld [vmem:[#allocation58_spill] sm:$0xff]  ;;  %v11668_v13 = vld [vmem:[#allocation21_spill] sm:$0xff] }
 0x46d   : > { %11590 = vst [vmem:[#allocation114_spill] sm:$0xff] %v9745_v51  ;;  %v3225_v31 = vsel %vm594_vm3, %v9745_v51, %v8920_v60  ;;  %v3569_v48 = vrot.slane %v9218_v8, %v11465_v58  ;;  %v4841_v3 = vrot.slane %v9194_v6, %v11318_v9  ;;  %v6192_v19 = vpack.c.bf16 %v3439_v25, %v3355_v23 }
 0x46e   : > { %v3270_v38 = vmul.f32 %v3233_v41, %v3225_v31  ;;  %v9765_v16 = vmul.f32 %v4601_v47, %v3225_v31  ;;  %6187 = vmatpush1.bf16.msra.mxu0 %v6186_v50  ;;  %4314 = vrot.lane.b32.xlu1 %v9196_v56, %s11461_s27  ;;  %v11596_v41 = vld [vmem:[#allocation68_spill] sm:$0xff]  ;;  %v11597_v47 = vld [vmem:[#allocation61_spill] sm:$0xff]  ;;  %v3607_v2 = vmul.f32 %v11599_v22, %v9753_v59 }
 0x46f   : > { %6189 = vmatprep.subr.bf16.mxu0 %v6188_v43  ;;  %v9773_v60 = vpop.permute.xlu0 %3546  ;;  %v9783_v50 = vsel %vm852_vm6, %v11597_v47, %v11596_v41  ;;  %v3728_v56 = vsel %vm1110_vm10, %v11601_v55, %v11600_v12  ;;  %v11602_v41 = vrot.slane %v9147_v62, %v11465_v58  ;;  %v11603_v25 = vrot.slane %v9094_v44, %v11318_v9 }
 0x470   : > { %11594 = vst [vmem:[#allocation28_spill] sm:$0xff] %v9765_v16  ;;  %11595 = vst [vmem:[#allocation115_spill] sm:$0xff] %v9773_v60  ;;  %v6190_v52 = vpack.c.bf16 %v3270_v38, %v3186_v14  ;;  %v9785_v31 = vpop.permute.xlu1 %3384  ;;  %v11606_v12 = vrot.slane %v9010_v61, %v11465_v58  ;;  %v11618_v16 = vrot.slane %v9204_v37, %v11318_v9 }
 0x471   : > { %11598 = vst [vmem:[#allocation68_spill] sm:$0xff] %v9785_v31  ;;  %v3354_v14 = vmul.f32 %v11602_v41, %v3309_v1  ;;  %v3393_v23 = vsel %vm766_vm5, %v9785_v31, %v11583_v11  ;;  %v9807_v38 = vmul.f32 %v11603_v25, %v3309_v1  ;;  %v11607_v11 = vrot.slane %v9012_v42, %v11465_v58  ;;  %v11609_v1 = vld [vmem:[#allocation93_spill] sm:$0xff]  ;;  %v11611_v25 = vld [vmem:[#allocation63_spill] sm:$0xff] }
 0x472   : > { %v3438_v22 = vmul.f32 %v3401_v7, %v3393_v23  ;;  %v9809_v43 = vmul.f32 %v4721_v35, %v3393_v23  ;;  %4316 = vrot.lane.b32.xlu1 %v8894_v57, %s11461_s27  ;;  %6191 = vmatpush1.bf16.msra.mxu0 %v6190_v52  ;;  %v9817_v41 = vmul.f32 %v11606_v12, %v9664_v21  ;;  %v11610_v21 = vld [vmem:[#allocation83_spill] sm:$0xff] }
 0x473   : > { %11604 = vst [vmem:[#allocation61_spill] sm:$0xff] %v9807_v38  ;;  %v9823_v49 = vmul.f32 %v11607_v11, %v9654_v33  ;;  %v11608_v7 = vrot.slane %v9230_v20, %v11464_v29  ;;  %v3477_v52 = vsel %vm852_vm6, %v11609_v1, %v11597_v47  ;;  %6193 = vmatprep.subr.bf16.mxu0 %v6192_v19  ;;  %v9833_v23 = vpop.permute.xlu0 %3044  ;;  %v11614_v57 = vld [vmem:[#allocation51_spill] sm:$0xff]  ;;  %v11615_v1 = vld [vmem:[#allocation78_spill] sm:$0xff] }
 0x474   : > { %11605 = vst [vmem:[#allocation80_spill] sm:$0xff] %v9809_v43  ;;  %v9839_v12 = vsel %vm1024_vm9, %v11611_v25, %v11610_v21  ;;  %v6194_v33 = vpack.c.bf16 %v3438_v22, %v3354_v14  ;;  %v9841_v11 = vpop.permute.xlu1 %3552  ;;  %v11613_v19 = vrot.slane %v9294_v45, %v11464_v29  ;;  %v3896_v31 = vsel %vm11616_vm13, %v11615_v1, %v11614_v57 }
 0x475   : > { %v3523_v35 = vmul.f32 %v11608_v7, %v9783_v50  ;;  %11612 = vst [vmem:[#allocation58_spill] sm:$0xff] %v9841_v11  ;;  %v3737_v7 = vrot.slane %v9294_v45, %v11465_v58  ;;  %v3561_v14 = vsel %vm938_vm7, %v9841_v11, %v11592_v32  ;;  %v11617_v21 = vrot.slane %v9230_v20, %v11465_v58  ;;  %v11622_v32 = vld [vmem:[#allocation97_spill] sm:$0xff] }
 0x476   : > { %v3775_v47 = vmul.f32 %v11613_v19, %v3728_v56  ;;  %v9864_v38 = vmul.f32 %v11618_v16, %v3477_v52  ;;  %v3606_v56 = vmul.f32 %v3569_v48, %v3561_v14  ;;  %v9866_v19 = vmul.f32 %v4841_v3, %v3561_v14  ;;  %6195 = vmatpush1.bf16.msra.mxu0 %v6194_v33  ;;  %v11625_v3 = vld [vmem:[#allocation50_spill] sm:$0xff] }
 0x477   : > { %v6196_v22 = vpack.c.bf16 %v3607_v2, %v3523_v35  ;;  %v3522_v51 = vmul.f32 %v11617_v21, %v3477_v52  ;;  %v11621_v57 = vrot.slane %v9300_v24, %v11464_v29  ;;  %v9876_v2 = vsel %vm1024_vm9, %v11622_v32, %v11611_v25  ;;  %v11624_v35 = vld [vmem:[#allocation81_spill] sm:$0xff]  ;;  %v9882_v48 = vpop.permute.xlu0 %3046 }
 0x478   : > { %11619 = vst [vmem:[#allocation83_spill] sm:$0xff] %v9864_v38  ;;  %11620 = vst [vmem:[#allocation63_spill] sm:$0xff] %v9866_v19  ;;  %v4465_v16 = vrot.slane %v8914_v63, %v11472_v18  ;;  %v11626_v52 = vld [vmem:[#allocation73_spill] sm:$0xff]  ;;  %v9890_v25 = vpop.permute.xlu1 %3720  ;;  %v11629_v32 = vrot.slane %v9366_v34, %v11464_v29  ;;  %v11643_v19 = vld [vmem:[#allocation44_spill] sm:$0xff] }
 0x479   : > { %v3691_v43 = vmul.f32 %v11621_v57, %v9839_v12  ;;  %11623 = vst [vmem:[#allocation51_spill] sm:$0xff] %v9876_v2  ;;  %6197 = vmatprep.subr.bf16.mxu0 %v6196_v22  ;;  %v3812_v33 = vsel %vm11627_vm12, %v11626_v52, %v11625_v3  ;;  %v6198_v57 = vpack.c.bf16 %v3606_v56, %v3522_v51  ;;  %11628 = vst [vmem:[#allocation78_spill] sm:$0xff] %v9890_v25  ;;  %v11636_v51 = vld [vmem:[#allocation23_spill] sm:$0xff]  ;;  %v11639_v38 = vld [vmem:[#allocation101_spill] sm:$0xff] }
 0x47a   : > { %v3943_v22 = vmul.f32 %v11629_v32, %v3896_v31  ;;  %v3729_v3 = vsel %vm1110_vm10, %v9890_v25, %v11601_v55  ;;  %v11630_v56 = vrot.slane %v9300_v24, %v11465_v58  ;;  %v3905_v31 = vrot.slane %v9366_v34, %v11465_v58  ;;  %v11632_v55 = vld [vmem:[#allocation98_spill] sm:$0xff]  ;;  %v11662_v25 = vld [vmem:[#allocation59_spill] sm:$0xff]  ;;  %vm11810_vm12 = vmmov %vm11640_vm8 }
 0x47b   : > { %v6200_v45 = vpack.c.bf16 %v3775_v47, %v3691_v43  ;;  %v3774_v14 = vmul.f32 %v3737_v7, %v3729_v3  ;;  %6199 = vmatpush1.bf16.msra.mxu0 %v6198_v57  ;;  %v11631_v32 = vrot.slane %v9372_v4, %v11464_v29  ;;  %v3813_v43 = vsel %vm11633_vm11, %v11632_v55, %v11626_v52  ;;  %v9922_v7 = vpop.permute.xlu0 %3128  ;;  %v11660_v34 = vld [vmem:[#allocation86_spill] sm:$0xff] }
 0x47c   : > { %v3690_v21 = vmul.f32 %v11630_v56, %v9876_v2  ;;  %v11634_v57 = vrot.slane %v9096_v40, %v11465_v58  ;;  %v9934_v47 = vpop.permute.xlu1 %3888  ;;  %v11638_v2 = vld [vmem:[#allocation25_spill] sm:$0xff] }
 0x47d   : > { %v3859_v11 = vmul.f32 %v11631_v32, %v3812_v33  ;;  %6201 = vmatprep.subr.bf16.mxu0 %v6200_v45  ;;  %11635 = vst [vmem:[#allocation81_spill] sm:$0xff] %v9934_v47  ;;  %v11637_v45 = vrot.slane %v9416_v30, %v11464_v29 }
 0x47e   : > { %v9928_v3 = vmul.f32 %v11634_v57, %v9713_v39  ;;  %v6202_v32 = vpack.c.bf16 %v3774_v14, %v3690_v21  ;;  %v3981_v39 = vsel %vm11640_vm8, %v11639_v38, %v11638_v2  ;;  %v3897_v57 = vsel %vm11616_vm13, %v9934_v47, %v11615_v1 }
 0x47f   : > { %v4027_v56 = vmul.f32 %v11637_v45, %v11636_v51  ;;  %v6204_v33 = vpack.c.bf16 %v3943_v22, %v3859_v11  ;;  %v11641_v21 = vrot.slane %v9094_v44, %v11465_v58  ;;  %v11642_v51 = vrot.slane %v9372_v4, %v11465_v58  ;;  %v11644_v11 = vld [vmem:[#allocation82_spill] sm:$0xff] }
 0x480   : > { %v3942_v52 = vmul.f32 %v3905_v31, %v3897_v57  ;;  %6203 = vmatpush1.bf16.msra.mxu0 %v6202_v32  ;;  %v4405_v2 = vrot.slane %v8908_v36, %v11472_v18  ;;  %v9963_v1 = vsel %vm422_vm0, %v11643_v19, %v9648_v17  ;;  %v9971_v31 = vpop.permute.xlu0 %3130  ;;  %v11646_v32 = vrot.slane %v9416_v30, %v11465_v58  ;;  %v9980_v38 = vpop.permute.xlu1 %2958  ;;  %v11661_v4 = vld [vmem:[#allocation42_spill] sm:$0xff] }
 0x481   : > { %v9952_v14 = vmul.f32 %v11641_v21, %v9707_v53  ;;  %v3858_v45 = vmul.f32 %v11642_v51, %v3813_v43  ;;  %v11645_v21 = vld [vmem:[#allocation85_spill] sm:$0xff]  ;;  %6205 = vmatprep.subr.bf16.mxu0 %v6204_v33  ;;  %v11647_v43 = vld [vmem:[#allocation34_spill] sm:$0xff]  ;;  %v4493_v30 = vmul.f32 %v4465_v16, %v9963_v1  ;;  %v4525_v53 = vrot.slane %v9010_v61, %v11472_v18  ;;  %v11649_v33 = vld [vmem:[#allocation20_spill] sm:$0xff] }
 0x482   : > { %v4026_v57 = vmul.f32 %v11646_v32, %v3981_v39  ;;  %v9990_v39 = vsel %vm337_vm1, %v11647_v43, %v9980_v38  ;;  %v11648_v32 = vld [vmem:[#allocation27_spill] sm:$0xff]  ;;  %v10003_v51 = vsel %vm594_vm3, %v11649_v33, %v9689_v0  ;;  %v11652_v16 = vrot.slane %v9204_v37, %v11465_v58  ;;  %v11654_v43 = vld [vmem:[#allocation108_spill] sm:$0xff] }
 0x483   : > { %v6206_v22 = vpack.c.bf16 %v3942_v52, %v3858_v45  ;;  %v6208_v19 = vpack.c.bf16 %v11648_v32, %v4027_v56  ;;  %v4433_v45 = vmul.f32 %v4405_v2, %v9990_v39  ;;  %v11655_v52 = vld [vmem:[#allocation56_spill] sm:$0xff] }
 0x484   : > { %v10011_v2 = vpop.permute.xlu0 %3296  ;;  %v10018_v55 = vpop.permute.xlu1 %3126  ;;  %v10024_v47 = vmul.f32 %v11652_v16, %v9783_v50 }
 0x485   : > { %6207 = vmatpush1.bf16.msra.mxu0 %v6206_v22  ;;  %11650 = vst [vmem:[#allocation50_spill] sm:$0xff] %v10011_v2  ;;  %v11651_v22 = vld [vmem:[#allocation41_spill] sm:$0xff]  ;;  %v6272_v56 = vpack.c.bf16 %v4493_v30, %v4433_v45  ;;  %v10036_v33 = vsel %vm508_vm2, %v11655_v52, %v10018_v55  ;;  %v11657_v30 = vrot.slane %v9012_v42, %v11472_v18  ;;  %v11665_v45 = vld [vmem:[#allocation91_spill] sm:$0xff] }
 0x486   : > { %6209 = vmatprep.subr.bf16.mxu0 %v6208_v19  ;;  %v6210_v32 = vpack.c.bf16 %v11651_v22, %v4026_v57  ;;  %v11653_v19 = vld [vmem:[#allocation102_spill] sm:$0xff]  ;;  %11656 = vst [vmem:[#allocation73_spill] sm:$0xff] %v10036_v33  ;;  %v4553_v16 = vmul.f32 %v4525_v53, %v10036_v33  ;;  %v11658_v22 = vrot.slane %v9194_v6, %v11465_v58  ;;  %v11669_v33 = vld [vmem:[#allocation47_spill] sm:$0xff] }
 0x487   : > { %v4240_v57 = vsel %vm1634_vm14, %v11654_v43, %v11653_v19  ;;  %v4613_v50 = vmul.f32 %v11657_v30, %v10003_v51  ;;  %v4645_v19 = vrot.slane %v9094_v44, %v11472_v18  ;;  %v11659_v43 = vld [vmem:[#allocation104_spill] sm:$0xff]  ;;  %v10061_v53 = vsel %vm766_vm5, %v11662_v25, %v11661_v4  ;;  %6273 = vmatprep.subr.bf16.mxu1 %v6272_v56  ;;  %v11674_v25 = vld [vmem:[#allocation95_spill] sm:$0xff] }
 0x488   : > { %v10051_v52 = vmul.f32 %v11658_v22, %v9753_v59  ;;  %v4324_v30 = vsel %vm1720_vm15, %v11660_v34, %v11659_v43  ;;  %11663 = vst [vmem:[#allocation23_spill] sm:$0xff] %v10061_v53  ;;  %v10066_v2 = vpop.permute.xlu0 %3298  ;;  %v11667_v59 = vrot.slane %v9512_v10, %v11465_v58  ;;  %v11670_v43 = vpack.c.bf16 %v11668_v13, %v11669_v33  ;;  %v10078_v56 = vpop.permute.xlu1 %3294  ;;  %v11677_v10 = vld [vmem:[#allocation77_spill] sm:$0xff] }
 0x489   : > { %6211 = vmatpush1.bf16.msra.mxu0 %v6210_v32  ;;  %v11664_v32 = vld [vmem:[#allocation92_spill] sm:$0xff]  ;;  %v4765_v13 = vrot.slane %v9204_v37, %v11472_v18  ;;  %v11683_v33 = vld [vmem:[#allocation29_spill] sm:$0xff] }
 0x48a   : > { %v11666_v24 = vpack.c.bf16 %v11664_v32, %v11665_v45  ;;  %v4286_v22 = vmul.f32 %v11667_v59, %v4240_v57  ;;  %6275 = vmatpush1.bf16.msra.mxu1 %v11670_v43  ;;  %v6276_v45 = vpack.c.bf16 %v4613_v50, %v4553_v16  ;;  %v11671_v32 = vld [vmem:[#allocation55_spill] sm:$0xff]  ;;  %v11672_v59 = vrot.slane %v9514_v28, %v11465_v58  ;;  %v11682_v28 = vld [vmem:[#allocation37_spill] sm:$0xff] }
 0x48b   : > { %v10086_v57 = vsel %vm680_vm4, %v11671_v32, %v10078_v56  ;;  %v11673_v50 = vrot.slane %v9096_v40, %v11472_v18  ;;  %v11675_v32 = vld [vmem:[#allocation96_spill] sm:$0xff] }
 0x48c   : > { %6213 = vmatprep.subr.bf16.mxu0 %v11666_v24  ;;  %v4370_v43 = vmul.f32 %v11672_v59, %v4324_v30  ;;  %v4673_v24 = vmul.f32 %v4645_v19, %v10086_v57  ;;  %v11676_v34 = vpack.c.bf16 %v11674_v25, %v11675_v32  ;;  %v10111_v30 = vsel %vm938_vm7, %v11677_v10, %v9773_v60  ;;  %v11679_v19 = vld [vmem:[#allocation106_spill] sm:$0xff]  ;;  %v10125_v60 = vpop.permute.xlu1 %3462  ;;  %v10127_v4 = vpop.permute.xlu0 %3464  ;;  %v11687_v59 = vld [vmem:[#allocation71_spill] sm:$0xff]  ;;  %v11695_v32 = vld [vmem:[#allocation65_spill] sm:$0xff] }
 0x48d   : > { %v4733_v16 = vmul.f32 %v11673_v50, %v10061_v53  ;;  %11678 = vst [vmem:[#allocation25_spill] sm:$0xff] %v10111_v30  ;;  %6277 = vmatprep.subr.bf16.mxu1 %v6276_v45  ;;  %v11680_v50 = vld [vmem:[#allocation105_spill] sm:$0xff]  ;;  %v11684_v53 = vpack.c.bf16 %v11682_v28, %v11683_v33  ;;  %11685 = vst [vmem:[#allocation44_spill] sm:$0xff] %v10125_v60  ;;  %v11689_v33 = vrot.slane %v9194_v6, %v11472_v18 }
 0x48e   : > { %6215 = vmatpush1.bf16.msra.mxu0 %v11676_v34  ;;  %v11681_v25 = vpack.c.bf16 %v11679_v19, %v11680_v50  ;;  %v6218_v34 = vpack.c.bf16 %v4370_v43, %v4286_v22  ;;  %11686 = vst [vmem:[#allocation82_spill] sm:$0xff] %v10127_v4  ;;  %v10133_v22 = vsel %vm852_vm6, %v11687_v59, %v10125_v60  ;;  %v11691_v28 = vld [vmem:[#allocation33_spill] sm:$0xff]  ;;  %v11715_v60 = vld [vmem:[#allocation112_spill] sm:$0xff] }
 0x48f   : > { %6279 = vmatpush1.bf16.msra.mxu1 %v11684_v53  ;;  %v6280_v45 = vpack.c.bf16 %v4733_v16, %v4673_v24  ;;  %11688 = vst [vmem:[#allocation85_spill] sm:$0xff] %v10133_v22  ;;  %v4853_v24 = vmul.f32 %v11689_v33, %v10111_v30  ;;  %v4793_v16 = vmul.f32 %v4765_v13, %v10133_v22  ;;  %v11693_v33 = vld [vmem:[#allocation110_spill] sm:$0xff]  ;;  %v11712_v22 = vld [vmem:[#allocation75_spill] sm:$0xff] }
 0x490   : > { %6217 = vmatprep.subr.bf16.mxu0 %v11681_v25  ;;  %v4409_v59 = vrot.slane %v8908_v36, %v11624_v35  ;;  %v10154_v50 = vsel %vm422_vm0, %v9648_v17, %v9833_v23  ;;  %v11690_v25 = vld [vmem:[#allocation52_spill] sm:$0xff]  ;;  %v11694_v19 = vrot.slane %v11693_v33, %v11465_v58  ;;  %v4413_v58 = vrot.slane %v8908_v36, %v11644_v11  ;;  %v11703_v13 = vld [vmem:[#allocation46_spill] sm:$0xff] }
 0x491   : > { %6281 = vmatprep.subr.bf16.mxu1 %v6280_v45  ;;  %v11692_v43 = vpack.c.bf16 %v11690_v25, %v11691_v28  ;;  %v11696_v17 = vld [vmem:[#allocation64_spill] sm:$0xff]  ;;  %v2961_v45 = vpop.permute.xlu1 %2960  ;;  %v6284_v30 = vpack.c.bf16 %v4853_v24, %v4793_v16  ;;  %v3009_v28 = vrot.slane %v8906_v46, %v11318_v9  ;;  %v11700_v16 = vrot.slane %v8914_v63, %v11624_v35 }
 0x492   : > { %6219 = vmatpush1.bf16.msra.mxu0 %v6218_v34  ;;  %v10167_v10 = vmul.f32 %v11694_v19, %v9839_v12  ;;  %v11697_v53 = vpack.c.bf16 %v11695_v32, %v11696_v17  ;;  %v10179_v25 = vsel %vm337_vm1, %v9980_v38, %v2961_v45  ;;  %v4417_v12 = vrot.slane %v8908_v36, %v11645_v21  ;;  %v11698_v32 = vld [vmem:[#allocation39_spill] sm:$0xff]  ;;  %v10200_v17 = vpop.permute.xlu0 %3466  ;;  %v11702_v34 = vld [vmem:[#allocation45_spill] sm:$0xff] }
 0x493   : > { %6221 = vmatprep.subr.bf16.mxu0 %v11692_v43  ;;  %v3005_v43 = vrot.slane %v8906_v46, %v11645_v21  ;;  %v10195_v19 = vmul.f32 %v11700_v16, %v10154_v50  ;;  %v10198_v38 = vmul.f32 %v4409_v59, %v10179_v25  ;;  %11701 = vst [vmem:[#allocation34_spill] sm:$0xff] %v10200_v17  ;;  %v11706_v16 = vld [vmem:[#allocation57_spill] sm:$0xff]  ;;  %v11707_v17 = vld [vmem:[#allocation62_spill] sm:$0xff] }
 0x494   : > { %6283 = vmatpush1.bf16.msra.mxu1 %v11697_v53  ;;  %v11699_v53 = vrot.slane %v11693_v33, %v11464_v29  ;;  %v11704_v36 = vpack.c.bf16 %v11702_v34, %v11703_v13  ;;  %v4885_v29 = vrot.slane %v11693_v33, %v11472_v18  ;;  %v3051_v59 = vsel %vm422_vm0, %v9833_v23, %v9882_v48  ;;  %v11709_v13 = vld [vmem:[#allocation30_spill] sm:$0xff]  ;;  %v11713_v23 = vld [vmem:[#allocation76_spill] sm:$0xff] }
 0x495   : > { %6285 = vmatprep.subr.bf16.mxu1 %v6284_v30  ;;  %v11708_v37 = vpack.c.bf16 %v11706_v16, %v11707_v17  ;;  %v3253_v30 = vrot.slane %v9044_v54, %v11644_v11  ;;  %v4589_v18 = vrot.slane %v9012_v42, %v11624_v35  ;;  %v11710_v34 = vld [vmem:[#allocation22_spill] sm:$0xff]  ;;  %v2963_v17 = vpop.permute.xlu1 %2962 }
 0x496   : > { %v10189_v24 = vmul.f32 %v11699_v53, %v11698_v32  ;;  %6223 = vmatpush1.bf16.msra.mxu0 %v11704_v36  ;;  %v11705_v32 = vld [vmem:[#allocation113_spill] sm:$0xff]  ;;  %v11711_v36 = vrot.slane %v11693_v33, %v11710_v34  ;;  %v2966_v4 = vsel %vm337_vm1, %v2963_v17, %v11715_v60 }
 0x497   : > { %v3050_v53 = vsel %vm422_vm0, %v9882_v48, %v11705_v32  ;;  %6225 = vmatprep.subr.bf16.mxu0 %v11708_v37  ;;  %v11714_v48 = vpack.c.bf16 %v11712_v22, %v11713_v23  ;;  %v10256_v16 = vmul.f32 %v4417_v12, %v2966_v4  ;;  %v11720_v22 = vld [vmem:[#allocation48_spill] sm:$0xff]  ;;  %vm11745_vm0 = vcmask 719872  }
 0x498   : > { %v4912_v32 = vmul.f32 %v11711_v36, %v11709_v13  ;;  %v2967_v13 = vsel %vm337_vm1, %v2961_v45, %v2963_v17  ;;  %v11716_v36 = vrot.slane %v8914_v63, %v11644_v11  ;;  %v11718_v45 = vpack.c.bf16 %v9823_v49, %v9817_v41  ;;  %v11719_v17 = vld [vmem:[#allocation49_spill] sm:$0xff]  ;;  %v10274_v41 = vpop.permute.xlu0 %3632  ;;  %vm11755_vm1 = vmmov %vm11745_vm0 }
 0x499   : > { %6287 = vmatpush1.bf16.msra.mxu1 %v11714_v48  ;;  %v11717_v48 = vrot.slane %v8914_v63, %v11645_v21  ;;  %v10254_v60 = vmul.f32 %v4413_v58, %v2967_v13  ;;  %v11721_v34 = vpack.c.bf16 %v11719_v17, %v11720_v22  ;;  %v10276_v22 = vpop.permute.xlu1 %3630  ;;  %v3135_v17 = vsel %vm508_vm2, %v9922_v7, %v9971_v31  ;;  %v11724_v58 = vld [vmem:[#allocation89_spill] sm:$0xff] }
 0x49a   : > { %v10247_v23 = vmul.f32 %v11716_v36, %v3051_v59  ;;  %6227 = vmatpush1.bf16.msra.mxu0 %v11718_v45  ;;  %v11723_v45 = vrot.slane %v8912_v5, %v11318_v9  ;;  %v3134_v63 = vsel %vm508_vm2, %v9971_v31, %v11724_v58  ;;  %v3024_v36 = vmul.f32 %v3005_v43, %v2967_v13 }
 0x49b   : > { %v10252_v20 = vmul.f32 %v11717_v48, %v3050_v53  ;;  %6229 = vmatprep.subr.bf16.mxu0 %v11721_v34  ;;  %v3025_v48 = vmul.f32 %v3009_v28, %v2966_v4  ;;  %v11722_v4 = vld [vmem:[#allocation24_spill] sm:$0xff]  ;;  %v11726_v34 = vrot.slane %v8912_v5, %v11624_v35  ;;  %v11728_v31 = vrot.slane %v8906_v46, %v11624_v35 }
 0x49c   : > { %v10290_v28 = vsel %vm1024_vm9, %v11722_v4, %v10276_v22  ;;  %v3109_v12 = vmul.f32 %v11723_v45, %v3050_v53  ;;  %v11725_v4 = vpack.c.bf16 %v9928_v3, %v9952_v14  ;;  %v11727_v53 = vrot.slane %v9044_v54, %v11624_v35  ;;  %v11729_v14 = vld [vmem:[#allocation72_spill] sm:$0xff] }
 0x49d   : > { %v4913_v37 = vmul.f32 %v4885_v29, %v10290_v28  ;;  %v3106_v49 = vmul.f32 %v11726_v34, %v9963_v1  ;;  %v3022_v43 = vmul.f32 %v11728_v31, %v9990_v39  ;;  %v3136_v3 = vsel %vm508_vm2, %v10018_v55, %v9922_v7  ;;  %v11730_v29 = vld [vmem:[#allocation74_spill] sm:$0xff]  ;;  %v10338_v7 = vld [vmem:[#allocation10] sm:$0xff]  ;;  %vm11797_vm2 = vmmov %vm11633_vm11 }
 0x49e   : > { %6231 = vmatpush1.bf16.msra.mxu0 %v11725_v4  ;;  %v10315_v45 = vmul.f32 %v11727_v53, %v10003_v51  ;;  %v11731_v13 = vpack.c.bf16 %v11729_v14, %v11730_v29  ;;  %v11732_v1 = vrot.slane %v8912_v5, %v11644_v11  ;;  %v11733_v58 = vrot.slane %v8912_v5, %v11645_v21  ;;  %v3213_v53 = vpop.permute.xlu1 %3212  ;;  %vm11812_vm11 = vmmov %vm11640_vm8 }
 0x49f   : > { %v11734_v39 = vrot.slane %v9058_v27, %v11645_v21  ;;  %5270 = vmatprep.subr.mxu1 %v4913_v37  ;;  %v6340_v55 = vpack.c.bf16 %v3109_v12, %v3025_v48  ;;  %v11735_v31 = vrot.slane %v9058_v27, %v11318_v9  ;;  %v11737_v5 = vrot.slane %v8906_v46, %v11644_v11 }
 0x4a0   : > { %6233 = vmatprep.subr.bf16.mxu0 %v11731_v13  ;;  %v3107_v51 = vmul.f32 %v11732_v1, %v10154_v50  ;;  %v3108_v34 = vmul.f32 %v11733_v58, %v3051_v59  ;;  %v11736_v50 = vrot.slane %v9010_v61, %v11644_v11  ;;  %v3220_v37 = vsel %vm594_vm3, %v9689_v0, %v3213_v53  ;;  %v10360_v1 = vpop.permute.xlu0 %3716 }
 0x4a1   : > { %v3192_v4 = vmul.f32 %v11734_v39, %v3135_v17  ;;  %v3193_v14 = vmul.f32 %v11735_v31, %v3134_v63  ;;  %v3023_v59 = vmul.f32 %v11737_v5, %v10179_v25  ;;  %5271 = vmatpush1.msra.mxu1 %v4912_v32  ;;  %v11738_v12 = vrot.slane %v9010_v61, %v11624_v35 }
 0x4a2   : > { %v10346_v29 = vmul.f32 %v11736_v50, %v3135_v17  ;;  %v6342_v13 = vpack.c.bf16 %v3108_v34, %v3024_v36  ;;  %v10362_v17 = vmul.f32 %v4589_v18, %v3220_v37  ;;  %v11739_v58 = vpack.c.bf16 %v10051_v52, %v10024_v47  ;;  %6341 = vmatprep.subr.bf16.mxu1 %v6340_v55  ;;  %v11741_v36 = vld [vmem:[#allocation73_spill] sm:$0xff] }
 0x4a3   : > { %v10358_v48 = vmul.f32 %v11738_v12, %v3136_v3  ;;  %v6290_v46 = vpack.c.bf16 %v3106_v49, %v3022_v43  ;;  %v11740_v0 = vrot.slane %v9010_v61, %v11645_v21  ;;  %v3275_v32 = vmul.f32 %v3253_v30, %v3220_v37  ;;  %5283 = vmatmul.mubr.f32.vlgmr.msra.gmra.mrb[4].mxu1 %v10338_v7  ;;  %v3215_v61 = vpop.permute.xlu1 %3214  ;;  %v11747_v43 = vld [vmem:[#allocation114_spill] sm:$0xff] }
 0x4a4   : > { %6235 = vmatpush1.bf16.msra.mxu0 %v11739_v58  ;;  %v11742_v18 = vrot.slane %v9058_v27, %v11624_v35  ;;  %v11743_v47 = vrot.slane %v9058_v27, %v11644_v11  ;;  %6343 = vmatpush1.bf16.msra.mxu1 %v6342_v13  ;;  %v3218_v39 = vsel %vm594_vm3, %v3215_v61, %v11747_v43 }
 0x4a5   : > { %v10370_v25 = vmul.f32 %v11740_v0, %v3134_v63  ;;  %5199 = vmatprep.subr.mxu0 %v10189_v24  ;;  %v11744_v63 = vld [vmem:[#allocation36_spill] sm:$0xff]  ;;  %v11746_v24 = vld [vmem:[#allocation90_spill] sm:$0xff]  ;;  %v3219_v27 = vsel %vm594_vm3, %v3213_v53, %v3215_v61  ;;  %v11748_v55 = vrot.slane %v9044_v54, %v11645_v21  ;;  %v11749_v50 = vrot.slane %v9044_v54, %v11318_v9  ;;  %v10420_v0 = vpop.permute.xlu0 %3718  ;;  %vm11799_vm3 = vmmov %vm11797_vm2 }
 0x4a6   : > { %v3190_v34 = vmul.f32 %v11742_v18, %v11741_v36  ;;  %v3191_v52 = vmul.f32 %v11743_v47, %v3136_v3  ;;  %5964 = vmatprep.mubr.msk.f32.mxu1 %vm11745_vm0, %v11744_v63  ;;  %v3302_v30 = vsel %vm680_vm4, %v10066_v2, %v11746_v24  ;;  %v6288_v3 = vpack.c.bf16 %v3107_v51, %v3023_v59  ;;  %v11752_v51 = vld [vmem:[#allocation50_spill] sm:$0xff] }
 0x4a7   : > { %v3276_v31 = vmul.f32 %v11748_v55, %v3219_v27  ;;  %v3277_v5 = vmul.f32 %v11749_v50, %v3218_v39  ;;  %v11750_v37 = vrot.slane %v9012_v42, %v11644_v11  ;;  %v11751_v13 = vrot.slane %v9012_v42, %v11645_v21  ;;  %v3381_v36 = vpop.permute.xlu1 %3380 }
 0x4a8   : > { %5200 = vmatpush1.msra.mxu0 %v10167_v10  ;;  %v3304_v53 = vsel %vm680_vm4, %v10078_v56, %v11752_v51  ;;  %v3303_v54 = vsel %vm680_vm4, %v11752_v51, %v10066_v2  ;;  %v6292_v59 = vpack.c.bf16 %v3275_v32, %v3191_v52  ;;  %v6294_v47 = vpack.c.bf16 %v10315_v45, %v3190_v34  ;;  %v11754_v32 = vld [vmem:[#allocation42_spill] sm:$0xff]  ;;  %v6516_v52 = vld [vmem:[#allocation10 + $0x8] sm:$0xff]  ;;  %vm11800_vm4 = vmmov %vm11616_vm13 }
 0x4a9   : > { %v10403_v12 = vmul.f32 %v11750_v37, %v3219_v27  ;;  %v10408_v58 = vmul.f32 %v11751_v13, %v3218_v39  ;;  %5212 = vmatmul.mubr.f32.vlgmr.msra.gmra.mrb[4].mxu0 %v10338_v7  ;;  %6289 = vmatprep.subr.bf16.mxu0 %v6288_v3  ;;  %v6346_v42 = vpack.c.bf16 %v3276_v31, %v3192_v4  ;;  %v11760_v39 = vld [vmem:[#allocation23_spill] sm:$0xff]  ;;  %vm11816_vm13 = vmmov %vm11640_vm8  ;;  %vm11821_vm0 = vcmp.lt.s32.totalorder %v7124_v15, 121 }
 0x4aa   : > { %6291 = vmatpush1.bf16.msra.mxu0 %v6290_v46  ;;  %v6344_v18 = vpack.c.bf16 %v3277_v5, %v3193_v14  ;;  %v11753_v2 = vrot.slane %v9147_v62, %v11624_v35  ;;  %v3388_v4 = vsel %vm766_vm5, %v11754_v32, %v3381_v36  ;;  %5963 = vmatprep.mubr.msk.f32.mxu0 %vm11755_vm1, %v6516_v52  ;;  %v11766_v32 = vld [vmem:[#allocation82_spill] sm:$0xff]  ;;  %vm11823_vm1 = vcmp.lt.s32.totalorder %v7124_v15, 127 }
 0x4ab   : > { %6293 = vmatprep.subr.bf16.mxu0 %v6292_v59  ;;  %v11756_v14 = vrot.slane %v9147_v62, %v11644_v11  ;;  %v11757_v45 = vrot.slane %v9094_v44, %v11624_v35  ;;  %v11759_v24 = vrot.slane %v9096_v40, %v11624_v35  ;;  %v11761_v27 = vrot.slane %v9130_v26, %v11624_v35 }
 0x4ac   : > { %v3358_v61 = vmul.f32 %v11753_v2, %v10086_v57  ;;  %v11758_v57 = vrot.slane %v9130_v26, %v11644_v11  ;;  %6345 = vmatprep.subr.bf16.mxu1 %v6344_v18  ;;  %v11762_v55 = vrot.slane %v9147_v62, %v11645_v21  ;;  %v11763_v50 = vrot.slane %v9147_v62, %v11318_v9  ;;  %v3383_v2 = vpop.permute.xlu1 %3382 }
 0x4ad   : > { %v3359_v46 = vmul.f32 %v11756_v14, %v3304_v53  ;;  %v10441_v34 = vmul.f32 %v11757_v45, %v3304_v53  ;;  %v10449_v43 = vmul.f32 %v11759_v24, %v3388_v4  ;;  %v3442_v3 = vmul.f32 %v11761_v27, %v11760_v39  ;;  %6347 = vmatpush1.bf16.msra.mxu1 %v6346_v42  ;;  %v11768_v14 = vld [vmem:[#allocation68_spill] sm:$0xff]  ;;  %v11774_v27 = vld [vmem:[#allocation66_spill] sm:$0xff] }
 0x4ae   : > { %v3443_v63 = vmul.f32 %v11758_v57, %v3388_v4  ;;  %v3360_v31 = vmul.f32 %v11762_v55, %v3303_v54  ;;  %v3361_v5 = vmul.f32 %v11763_v50, %v3302_v30  ;;  %v4829_v37 = vrot.slane %v9194_v6, %v11624_v35  ;;  %6295 = vmatpush1.bf16.msra.mxu0 %v6294_v47  ;;  %v11767_v4 = vld [vmem:[#allocation44_spill] sm:$0xff] }
 0x4af   : > { %v11764_v13 = vrot.slane %v9094_v44, %v11644_v11  ;;  %v11765_v53 = vrot.slane %v9094_v44, %v11645_v21  ;;  %v6298_v42 = vpack.c.bf16 %v3442_v3, %v3358_v61  ;;  %v3472_v52 = vsel %vm852_vm6, %v11767_v4, %v11766_v32 }
 0x4b0   : > { %v6296_v62 = vpack.c.bf16 %v3443_v63, %v3359_v46  ;;  %v3387_v44 = vsel %vm766_vm5, %v3381_v36, %v3383_v2  ;;  %v11769_v45 = vrot.slane %v9130_v26, %v11645_v21  ;;  %v11770_v61 = vrot.slane %v9130_v26, %v11318_v9  ;;  %v11773_v36 = vld [vmem:[#allocation85_spill] sm:$0xff] }
 0x4b1   : > { %v10466_v51 = vmul.f32 %v11764_v13, %v3303_v54  ;;  %v10471_v59 = vmul.f32 %v11765_v53, %v3302_v30  ;;  %v3386_v54 = vsel %vm766_vm5, %v3383_v2, %v11768_v14  ;;  %v10484_v30 = vpop.permute.xlu0 %3800  ;;  %v11771_v57 = vrot.slane %v9096_v40, %v11644_v11  ;;  %v3549_v2 = vpop.permute.xlu1 %3548  ;;  %v11776_v14 = vld [vmem:[#allocation25_spill] sm:$0xff]  ;;  %vm11802_vm5 = vmmov %vm11800_vm4 }
 0x4b2   : > { %v3444_v47 = vmul.f32 %v11769_v45, %v3387_v44  ;;  %v3445_v46 = vmul.f32 %v11770_v61, %v3386_v54  ;;  %v11772_v24 = vrot.slane %v9096_v40, %v11645_v21  ;;  %6297 = vmatprep.subr.bf16.mxu0 %v6296_v62  ;;  %v11775_v3 = vrot.slane %v11774_v27, %v11624_v35 }
 0x4b3   : > { %v10495_v63 = vmul.f32 %v11771_v57, %v3387_v44  ;;  %v3593_v26 = vrot.slane %v9218_v8, %v11645_v21  ;;  %v3597_v50 = vrot.slane %v9218_v8, %v11318_v9  ;;  %v4837_v13 = vrot.slane %v9194_v6, %v11645_v21  ;;  %6299 = vmatpush1.bf16.msra.mxu0 %v6298_v42  ;;  %v11779_v57 = vld [vmem:[#allocation67_spill] sm:$0xff]  ;;  %v11782_v42 = vld [vmem:[#allocation93_spill] sm:$0xff] }
 0x4b4   : > { %v10500_v39 = vmul.f32 %v11772_v24, %v3386_v54  ;;  %v3526_v55 = vmul.f32 %v11775_v3, %v11773_v36  ;;  %v6350_v53 = vpack.c.bf16 %v3444_v47, %v3360_v31  ;;  %v6348_v62 = vpack.c.bf16 %v3445_v46, %v3361_v5  ;;  %v11781_v24 = vld [vmem:[#allocation115_spill] sm:$0xff]  ;;  %v11783_v46 = vld [vmem:[#allocation34_spill] sm:$0xff] }
 0x4b5   : > { %v11777_v54 = vrot.slane %v9218_v8, %v11624_v35  ;;  %v11778_v45 = vrot.slane %v11774_v27, %v11644_v11  ;;  %v11780_v31 = vrot.slane %v11779_v57, %v11624_v35  ;;  %v3556_v5 = vsel %vm938_vm7, %v11781_v24, %v3549_v2 }
 0x4b6   : > { %v3470_v36 = vsel %vm852_vm6, %v11783_v46, %v11782_v42  ;;  %v10539_v3 = vsel %vm852_vm6, %v11766_v32, %v11783_v46  ;;  %6349 = vmatprep.subr.bf16.mxu1 %v6348_v62  ;;  %v11786_v42 = vld [vmem:[#allocation79_spill] sm:$0xff]  ;;  %v10552_v32 = vpop.permute.xlu0 %3884  ;;  %v3551_v46 = vpop.permute.xlu1 %3550  ;;  %vm11804_vm6 = vmmov %vm11800_vm4  ;;  %v11840_v15 = vpack.c.bf16 %v10195_v19, %v10198_v38  ;;  %v11846_v19 = vpack.c.bf16 %v10252_v20, %v10256_v16  ;;  %v11853_v16 = vld [vmem:[#allocation80_spill] sm:$0xff] }
 0x4b7   : > { %v3610_v44 = vmul.f32 %v11777_v54, %v11776_v14  ;;  %v3527_v61 = vmul.f32 %v11778_v45, %v3472_v52  ;;  %v10526_v47 = vmul.f32 %v11780_v31, %v3472_v52  ;;  %v11784_v14 = vrot.slane %v9218_v8, %v11644_v11  ;;  %v11785_v45 = vld [vmem:[#allocation19_spill] sm:$0xff]  ;;  %6351 = vmatpush1.bf16.msra.mxu1 %v6350_v53 }
 0x4b8   : > { %v10544_v54 = vmul.f32 %v4829_v37, %v3556_v5  ;;  %v3669_v31 = vrot.slane %v11785_v45, %v11624_v35  ;;  %v3673_v24 = vrot.slane %v11785_v45, %v11644_v11  ;;  %v3753_v40 = vrot.slane %v11786_v42, %v11624_v35 }
 0x4b9   : > { %v3611_v52 = vmul.f32 %v11784_v14, %v3556_v5  ;;  %v6302_v10 = vpack.c.bf16 %v3610_v44, %v3526_v55  ;;  %v3757_v62 = vrot.slane %v11786_v42, %v11644_v11  ;;  %v11787_v5 = vrot.slane %v11774_v27, %v11645_v21  ;;  %v11789_v55 = vld [vmem:[#allocation58_spill] sm:$0xff] }
 0x4ba   : > { %v11788_v53 = vrot.slane %v11774_v27, %v11318_v9  ;;  %v3554_v44 = vsel %vm938_vm7, %v3551_v46, %v11789_v55  ;;  %v10570_v8 = vsel %vm938_vm7, %v3549_v2, %v3551_v46  ;;  %v10584_v27 = vsel %vm1024_vm9, %v10276_v22, %v10274_v41  ;;  %v3887_v55 = vpop.permute.xlu0 %3886  ;;  %vm11805_vm7 = vmmov %vm11800_vm4 }
 0x4bb   : > { %v6300_v37 = vpack.c.bf16 %v3611_v52, %v3527_v61  ;;  %v3528_v14 = vmul.f32 %v11787_v5, %v10539_v3  ;;  %v11790_v61 = vrot.slane %v11779_v57, %v11645_v21  ;;  %v3612_v4 = vmul.f32 %v3593_v26, %v10570_v8 }
 0x4bc   : > { %v3529_v18 = vmul.f32 %v11788_v53, %v3470_v36  ;;  %v3613_v5 = vmul.f32 %v3597_v50, %v3554_v44  ;;  %v10578_v49 = vmul.f32 %v4837_v13, %v3554_v44  ;;  %v3761_v2 = vrot.slane %v11786_v42, %v11645_v21  ;;  %v3715_v50 = vpop.permute.xlu1 %3714  ;;  %v11791_v53 = vld [vmem:[#allocation40_spill] sm:$0xff] }
 0x4bd   : > { %v10575_v52 = vmul.f32 %v11790_v61, %v3470_v36  ;;  %6301 = vmatprep.subr.bf16.mxu0 %v6300_v37  ;;  %v3765_v36 = vrot.slane %v11786_v42, %v11318_v9  ;;  %v6354_v46 = vpack.c.bf16 %v3612_v4, %v3528_v14  ;;  %v3724_v37 = vsel %vm1110_vm10, %v3715_v50, %v10360_v1  ;;  %v11792_v61 = vld [vmem:[#allocation78_spill] sm:$0xff] }
 0x4be   : > { %6303 = vmatpush1.bf16.msra.mxu0 %v6302_v10  ;;  %v6352_v13 = vpack.c.bf16 %v3613_v5, %v3529_v18  ;;  %v3725_v22 = vsel %vm1110_vm10, %v11791_v53, %v3715_v50  ;;  %v3677_v10 = vrot.slane %v11785_v45, %v11645_v21  ;;  %v3681_v42 = vrot.slane %v11785_v45, %v11318_v9 }
 0x4bf   : > { %v3694_v4 = vmul.f32 %v3669_v31, %v10290_v28  ;;  %v3695_v14 = vmul.f32 %v3673_v24, %v10584_v27  ;;  %v3778_v18 = vmul.f32 %v3753_v40, %v3725_v22  ;;  %v3779_v44 = vmul.f32 %v3757_v62, %v3724_v37  ;;  %v11793_v31 = vld [vmem:[#allocation97_spill] sm:$0xff] }
 0x4c0   : > { %6353 = vmatprep.subr.bf16.mxu1 %v6352_v13  ;;  %v3722_v5 = vsel %vm1110_vm10, %v10420_v0, %v11792_v61  ;;  %v3723_v50 = vsel %vm1110_vm10, %v10360_v1, %v10420_v0  ;;  %v3635_v53 = vpop.permute.xlu1 %3634  ;;  %v3969_v0 = vpop.permute.xlu0 %3968  ;;  %v3891_v26 = vsel %vm11805_vm7, %v10552_v32, %v3887_v55  ;;  %vm11808_vm10 = vmmov %vm11797_vm2  ;;  %v11852_v20 = vpack.c.bf16 %v10408_v58, %v10370_v25  ;;  %v11858_v58 = vld [vmem:[#allocation63_spill] sm:$0xff] }
 0x4c1   : > { %6355 = vmatpush1.bf16.msra.mxu1 %v6354_v46  ;;  %v6306_v45 = vpack.c.bf16 %v3778_v18, %v3694_v4  ;;  %v6304_v28 = vpack.c.bf16 %v3779_v44, %v3695_v14  ;;  %v10615_v40 = vsel %vm1024_vm9, %v3635_v53, %v11793_v31  ;;  %v10620_v24 = vsel %vm1024_vm9, %v10274_v41, %v3635_v53  ;;  %v11795_v14 = vld [vmem:[#allocation32_spill] sm:$0xff]  ;;  %vm11807_vm9 = vmmov %vm11797_vm2 }
 0x4c2   : > { %11794 = vst [vmem:[#allocation27_spill] sm:$0xff] %v10615_v40  ;;  %v3780_v62 = vmul.f32 %v3761_v2, %v3723_v50  ;;  %v3781_v13 = vmul.f32 %v3765_v36, %v3722_v5  ;;  %v3696_v37 = vmul.f32 %v3677_v10, %v10620_v24  ;;  %v3697_v1 = vmul.f32 %v3681_v42, %v10615_v40  ;;  %v11796_v41 = vld [vmem:[#allocation60_spill] sm:$0xff]  ;;  %v11806_v40 = vld [vmem:[#allocation98_spill] sm:$0xff]  ;;  %vm11832_vm7 = vmmov %vm11821_vm0 }
 0x4c3   : > { %6305 = vmatprep.subr.bf16.mxu0 %v6304_v28  ;;  %v3837_v18 = vrot.slane %v11795_v14, %v11624_v35  ;;  %v3841_v44 = vrot.slane %v11795_v14, %v11644_v11  ;;  %v3921_v2 = vrot.slane %v11796_v41, %v11624_v35  ;;  %v3925_v36 = vrot.slane %v11796_v41, %v11644_v11  ;;  %v11798_v42 = vld [vmem:[#allocation84_spill] sm:$0xff]  ;;  %v11801_v28 = vld [vmem:[#allocation17_spill] sm:$0xff] }
 0x4c4   : > { %6307 = vmatpush1.bf16.msra.mxu0 %v6306_v45  ;;  %v6358_v46 = vpack.c.bf16 %v3780_v62, %v3696_v37  ;;  %v3799_v22 = vpop.permute.xlu1 %3798  ;;  %v6356_v4 = vpack.c.bf16 %v3781_v13, %v3697_v1  ;;  %v3929_v5 = vrot.slane %v11796_v41, %v11645_v21  ;;  %v3933_v50 = vrot.slane %v11796_v41, %v11318_v9  ;;  %v4061_v37 = vpop.permute.xlu0 %4060  ;;  %v11803_v41 = vld [vmem:[#allocation81_spill] sm:$0xff] }
 0x4c5   : > { %v3808_v10 = vsel %vm11797_vm2, %v3799_v22, %v10484_v30  ;;  %v3809_v61 = vsel %vm11799_vm3, %v11798_v42, %v3799_v22  ;;  %v3845_v62 = vrot.slane %v11795_v14, %v11645_v21  ;;  %v3849_v13 = vrot.slane %v11795_v14, %v11318_v9  ;;  %vm11825_vm2 = vmmov %vm11823_vm1 }
 0x4c6   : > { %6357 = vmatprep.subr.bf16.mxu1 %v6356_v4  ;;  %v3862_v1 = vmul.f32 %v3837_v18, %v3809_v61  ;;  %v3890_v42 = vsel %vm11804_vm6, %v3887_v55, %v11803_v41  ;;  %vm11826_vm3 = vmmov %vm11821_vm0  ;;  %v11857_v25 = vpack.c.bf16 %v10500_v39, %v10471_v59  ;;  %v11862_v59 = vpack.c.bf16 %v10578_v49, %v10575_v52  ;;  %v6521_v49 = vld [vmem:[%s6977_s12 + $0x10] sm:$0xff]  ;;  %v5431_v52 = vld [vmem:[%s10954_s4] sm:$0xff] }
 0x4c7   : > { %6359 = vmatpush1.bf16.msra.mxu1 %v6358_v46  ;;  %v3863_v46 = vmul.f32 %v3841_v44, %v3808_v10  ;;  %v11809_v44 = vld [vmem:[#allocation18_spill] sm:$0xff]  ;;  %v3948_v10 = vmul.f32 %v3929_v5, %v3891_v26  ;;  %v3949_v61 = vmul.f32 %v3933_v50, %v3890_v42  ;;  %v11813_v5 = vld [vmem:[#allocation53_spill] sm:$0xff]  ;;  %vm11830_vm6 = vmmov %vm11821_vm0 }
 0x4c8   : > { %v3883_v45 = vpop.permute.xlu1 %3882  ;;  %v4013_v26 = vrot.slane %v11809_v44, %v11645_v21 }
 0x4c9   : > { %v3892_v53 = vsel %vm11800_vm4, %v3883_v45, %v10552_v32  ;;  %v3893_v31 = vsel %vm11802_vm5, %v11801_v28, %v3883_v45  ;;  %vm11828_vm4 = vmmov %vm11823_vm1  ;;  %v11863_v39 = vld [vmem:[#allocation27_spill] sm:$0xff] }
 0x4ca   : > { %v3946_v22 = vmul.f32 %v3921_v2, %v3893_v31  ;;  %v3947_v4 = vmul.f32 %v3925_v36, %v3892_v53  ;;  %v4005_v2 = vrot.slane %v11809_v44, %v11624_v35  ;;  %v4009_v36 = vrot.slane %v11809_v44, %v11644_v11  ;;  %v4145_v53 = vpop.permute.xlu0 %4144  ;;  %vm11829_vm5 = vmmov %vm11823_vm1 }
 0x4cc   : > { %v6310_v45 = vpack.c.bf16 %v3946_v22, %v3862_v1  ;;  %v3803_v28 = vpop.permute.xlu1 %3802  ;;  %v6308_v56 = vpack.c.bf16 %v3947_v4, %v3863_v46 }
 0x4cd   : > { %v3806_v14 = vsel %vm11807_vm9, %v3803_v28, %v11806_v40  ;;  %v3807_v18 = vsel %vm11808_vm10, %v10484_v30, %v3803_v28  ;;  %v11811_v30 = vld [vmem:[#allocation31_spill] sm:$0xff] }
 0x4ce   : > { %v3864_v32 = vmul.f32 %v3845_v62, %v3807_v18  ;;  %v3865_v55 = vmul.f32 %v3849_v13, %v3806_v14  ;;  %6309 = vmatprep.subr.bf16.mxu0 %v6308_v56  ;;  %v4017_v56 = vrot.slane %v11809_v44, %v11318_v9  ;;  %v11814_v13 = vld [vmem:[#allocation54_spill] sm:$0xff]  ;;  %v4065_v18 = vpop.permute.xlu0 %4064 }
 0x4cf   : > { %6311 = vmatpush1.bf16.msra.mxu0 %v6310_v45  ;;  %v11815_v45 = vld [vmem:[#allocation101_spill] sm:$0xff] }
 0x4d0   : > { %v6362_v31 = vpack.c.bf16 %v3948_v10, %v3864_v32  ;;  %v3967_v1 = vpop.permute.xlu1 %3966  ;;  %v6360_v40 = vpack.c.bf16 %v3949_v61, %v3865_v55  ;;  %v11817_v10 = vld [vmem:[#allocation70_spill] sm:$0xff] }
 0x4d1   : > { %v3976_v46 = vsel %vm11810_vm12, %v3967_v1, %v3969_v0  ;;  %v3977_v22 = vsel %vm11812_vm11, %v11811_v30, %v3967_v1  ;;  %v11818_v32 = vld [vmem:[#allocation26_spill] sm:$0xff]  ;;  %v11822_v30 = vld [vmem:[#allocation87_spill] sm:$0xff] }
 0x4d2   : > { %v4030_v4 = vmul.f32 %v4005_v2, %v3977_v22  ;;  %v4031_v41 = vmul.f32 %v4009_v36, %v3976_v46  ;;  %6361 = vmatprep.subr.bf16.mxu1 %v6360_v40  ;;  %v11820_v40 = vld [vmem:[#allocation107_spill] sm:$0xff] }
 0x4d3   : > { %6363 = vmatpush1.bf16.msra.mxu1 %v6362_v31  ;;  %v11819_v31 = vld [vmem:[#allocation88_spill] sm:$0xff]  ;;  %v4152_v46 = vsel %vm11821_vm0, %v11820_v40, %v4145_v53 }
 0x4d4   : > { %v6314_v50 = vpack.c.bf16 %v11813_v5, %v4030_v4  ;;  %v3971_v62 = vpop.permute.xlu1 %3970  ;;  %v6312_v42 = vpack.c.bf16 %v11814_v13, %v4031_v41  ;;  %v4181_v1 = vrot.slane %v11819_v31, %v11624_v35  ;;  %v4185_v22 = vrot.slane %v11819_v31, %v11644_v11  ;;  %v4229_v5 = vpop.permute.xlu0 %4228 }
 0x4d5   : > { %v3974_v28 = vsel %vm11640_vm8, %v3971_v62, %v11815_v45  ;;  %v3975_v14 = vsel %vm11816_vm13, %v3969_v0, %v3971_v62  ;;  %v4101_v0 = vrot.slane %v11822_v30, %v11644_v11  ;;  %v4097_v4 = vrot.slane %v11822_v30, %v11624_v35 }
 0x4d6   : > { %v4032_v2 = vmul.f32 %v4013_v26, %v3975_v14  ;;  %v4033_v36 = vmul.f32 %v4017_v56, %v3974_v28  ;;  %6313 = vmatprep.subr.bf16.mxu0 %v6312_v42  ;;  %v11824_v26 = vld [vmem:[#allocation103_spill] sm:$0xff]  ;;  %v4206_v62 = vmul.f32 %v4181_v1, %v4152_v46  ;;  %v4109_v13 = vrot.slane %v11822_v30, %v11318_v9 }
 0x4d7   : > { %6315 = vmatpush1.bf16.msra.mxu0 %v6314_v50  ;;  %v4068_v56 = vsel %vm11825_vm2, %v11824_v26, %v4061_v37  ;;  %v4105_v42 = vrot.slane %v11822_v30, %v11645_v21  ;;  %v11831_v46 = vld [vmem:[#allocation35_spill] sm:$0xff] }
 0x4d8   : > { %v6366_v44 = vpack.c.bf16 %v11817_v10, %v4032_v2  ;;  %v4063_v61 = vpop.permute.xlu1 %4062  ;;  %v6364_v55 = vpack.c.bf16 %v11818_v32, %v4033_v36  ;;  %v4189_v2 = vrot.slane %v11819_v31, %v11645_v21  ;;  %v4122_v36 = vmul.f32 %v4097_v4, %v4068_v56  ;;  %v11827_v10 = vld [vmem:[#allocation94_spill] sm:$0xff] }
 0x4d9   : > { %v4067_v41 = vsel %vm11823_vm1, %v4061_v37, %v4063_v61  ;;  %v4193_v37 = vrot.slane %v11819_v31, %v11318_v9  ;;  %v4066_v32 = vsel %vm11829_vm5, %v4063_v61, %v4065_v18  ;;  %v4313_v31 = vpop.permute.xlu0 %4312  ;;  %v11833_v61 = vld [vmem:[#allocation100_spill] sm:$0xff] }
 0x4da   : > { %6365 = vmatprep.subr.bf16.mxu1 %v6364_v55  ;;  %v4123_v28 = vmul.f32 %v4101_v0, %v4067_v41  ;;  %v6318_v40 = vpack.c.bf16 %v4206_v62, %v4122_v36  ;;  %v4349_v62 = vrot.slane %v11833_v61, %v11624_v35 }
 0x4db   : > { %6367 = vmatpush1.bf16.msra.mxu1 %v6366_v44  ;;  %v4073_v44 = vsel %vm11828_vm4, %v4065_v18, %v11827_v10 }
 0x4dc   : > { %v4147_v50 = vpop.permute.xlu1 %4146  ;;  %v4125_v0 = vmul.f32 %v4109_v13, %v4073_v44  ;;  %v4353_v13 = vrot.slane %v11833_v61, %v11644_v11 }
 0x4dd   : > { %v4151_v45 = vsel %vm11826_vm3, %v4145_v53, %v4147_v50  ;;  %v4233_v10 = vpop.permute.xlu0 %4232 }
 0x4de   : > { %v4207_v14 = vmul.f32 %v4185_v22, %v4151_v45  ;;  %v4124_v22 = vmul.f32 %v4105_v42, %v4066_v32  ;;  %v11834_v45 = vld [vmem:[#allocation111_spill] sm:$0xff] }
 0x4e0   : > { %v4149_v55 = vpop.permute.xlu1 %4148  ;;  %v6316_v1 = vpack.c.bf16 %v4207_v14, %v4123_v28  ;;  %v11835_v28 = vld [vmem:[#allocation99_spill] sm:$0xff] }
 0x4e1   : > { %v4150_v53 = vsel %vm11830_vm6, %v4147_v50, %v4149_v55  ;;  %v4157_v30 = vsel %vm11832_vm7, %v4149_v55, %v11831_v46  ;;  %v4320_v50 = vsel %vm1720_vm15, %v11834_v45, %v4313_v31  ;;  %v4269_v14 = vrot.slane %v11835_v28, %v11644_v11  ;;  %v11838_v45 = vld [vmem:[#allocation86_spill] sm:$0xff] }
 0x4e2   : > { %v4208_v4 = vmul.f32 %v4189_v2, %v4150_v53  ;;  %v4209_v41 = vmul.f32 %v4193_v37, %v4157_v30  ;;  %6317 = vmatprep.subr.bf16.mxu0 %v6316_v1  ;;  %v4265_v42 = vrot.slane %v11835_v28, %v11624_v35  ;;  %v11836_v37 = vld [vmem:[#allocation109_spill] sm:$0xff]  ;;  %v4374_v32 = vmul.f32 %v4349_v62, %v4320_v50 }
 0x4e3   : > { %6319 = vmatpush1.bf16.msra.mxu0 %v6318_v40  ;;  %v4236_v36 = vsel %vm1634_vm14, %v11836_v37, %v4229_v5  ;;  %v4277_v55 = vrot.slane %v11835_v28, %v11318_v9  ;;  %v4273_v1 = vrot.slane %v11835_v28, %v11645_v21  ;;  %v4357_v30 = vrot.slane %v11833_v61, %v11645_v21 }
 0x4e4   : > { %v6370_v26 = vpack.c.bf16 %v4208_v4, %v4124_v22  ;;  %v4231_v56 = vpop.permute.xlu1 %4230  ;;  %v6368_v18 = vpack.c.bf16 %v4209_v41, %v4125_v0  ;;  %v4290_v0 = vmul.f32 %v4265_v42, %v4236_v36  ;;  %v11837_v22 = vld [vmem:[#allocation108_spill] sm:$0xff]  ;;  %v4833_v37 = vrot.slane %v9194_v6, %v11644_v11 }
 0x4e5   : > { %v4235_v2 = vsel %vm1634_vm14, %v4229_v5, %v4231_v56  ;;  %v4361_v5 = vrot.slane %v11833_v61, %v11318_v9  ;;  %v4241_v4 = vsel %vm1634_vm14, %v4233_v10, %v11837_v22  ;;  %v4234_v41 = vsel %vm1634_vm14, %v4231_v56, %v4233_v10  ;;  %v6525_v22 = vld [vmem:[%s6977_s12 + $0x30] sm:$0xff] }
 0x4e6   : > { %6369 = vmatprep.subr.bf16.mxu1 %v6368_v18  ;;  %v4291_v53 = vmul.f32 %v4269_v14, %v4235_v2  ;;  %v6322_v62 = vpack.c.bf16 %v4374_v32, %v4290_v0  ;;  %v4293_v28 = vmul.f32 %v4277_v55, %v4241_v4  ;;  %v4292_v61 = vmul.f32 %v4273_v1, %v4234_v41  ;;  %v6524_v0 = vld [vmem:[%s10955_s5] sm:$0xff] }
 0x4e7   : > { %6371 = vmatpush1.bf16.msra.mxu1 %v6370_v26  ;;  %v11839_v56 = vpack.c.bf16 %v10247_v23, %v10254_v60  ;;  %v4773_v36 = vrot.slane %v11779_v57, %v11644_v11  ;;  %v11841_v10 = vpack.c.bf16 %v10403_v12, %v10346_v29  ;;  %v11843_v23 = vld [vmem:[#allocation38_spill] sm:$0xff]  ;;  %v4855_v32 = vmul.f32 %v4833_v37, %v10570_v8  ;;  %v11848_v12 = vld [vmem:[#allocation28_spill] sm:$0xff]  ;;  %v11849_v57 = vld [vmem:[#allocation69_spill] sm:$0xff] }
 0x4e8   : > { %v4315_v44 = vpop.permute.xlu1 %4314  ;;  %v11845_v6 = vpack.c.bf16 %v10362_v17, %v10358_v48  ;;  %v11847_v29 = vpack.c.bf16 %v10495_v63, %v10466_v51  ;;  %v11850_v55 = vpack.c.bf16 %v11848_v12, %v11849_v57  ;;  %v4893_v8 = vrot.slane %v11693_v33, %v11644_v11  ;;  %v11854_v17 = vld [vmem:[#allocation61_spill] sm:$0xff] }
 0x4e9   : > { %v4319_v40 = vsel %vm1720_vm15, %v4313_v31, %v4315_v44  ;;  %v4795_v38 = vmul.f32 %v4773_v36, %v10539_v3  ;;  %v11851_v48 = vpack.c.bf16 %v10449_v43, %v10441_v34  ;;  %v11855_v51 = vpack.c.bf16 %v11853_v16, %v11854_v17  ;;  %v11859_v3 = vld [vmem:[#allocation83_spill] sm:$0xff] }
 0x4ea   : > { %v4375_v46 = vmul.f32 %v4353_v13, %v4319_v40  ;;  %v4889_v63 = vrot.slane %v11693_v33, %v11624_v35  ;;  %v4901_v11 = vrot.slane %v11693_v33, %v11318_v9  ;;  %v4915_v34 = vmul.f32 %v4893_v8, %v10620_v24  ;;  %v11861_v24 = vld [vmem:[#allocation51_spill] sm:$0xff] }
 0x4eb   : > { %v6336_v1 = vpack.c.bf16 %v4855_v32, %v4795_v38  ;;  %v11856_v43 = vpack.c.bf16 %v10544_v54, %v10526_v47  ;;  %v11860_v40 = vpack.c.bf16 %v11858_v58, %v11859_v3  ;;  %v4897_v9 = vrot.slane %v11693_v33, %v11645_v21  ;;  %v6517_v54 = vld [vmem:[%s6977_s12 + $0x8] sm:$0xff]  ;;  %v6520_v33 = vld [vmem:[%s6977_s12 + $0x18] sm:$0xff] }
 0x4ec   : > { %v4317_v26 = vpop.permute.xlu1 %4316  ;;  %v6320_v18 = vpack.c.bf16 %v4375_v46, %v4291_v53  ;;  %v4914_v35 = vmul.f32 %v4889_v63, %v10584_v27  ;;  %v4917_v53 = vmul.f32 %v4901_v11, %v11861_v24  ;;  %v6518_v27 = vld [vmem:[%s6977_s12] sm:$0xff]  ;;  %v6519_v21 = vld [vmem:[%s6977_s12 + $0x28] sm:$0xff]  ;;  %vm5436_vm14 = vcmask 64512   ;;  %v6522_v46 = vld [vmem:[%s6977_s12 + $0x38] sm:$0xff] }
 0x4ed   : > { %v4318_v31 = vsel %vm1720_vm15, %v4315_v44, %v4317_v26  ;;  %v4325_v50 = vsel %vm1720_vm15, %v4317_v26, %v11838_v45  ;;  %v11842_v44 = vld [vmem:[#allocation43_spill] sm:$0xff]  ;;  %v4916_v47 = vmul.f32 %v4897_v9, %v11863_v39  ;;  %v6743_v4 = vmov 3  }
 0x4ee   : > { %v4376_v14 = vmul.f32 %v4357_v30, %v4318_v31  ;;  %v4377_v13 = vmul.f32 %v4361_v5, %v4325_v50  ;;  %6321 = vmatprep.subr.bf16.mxu0 %v6320_v18  ;;  %v11844_v60 = vpack.c.bf16 %v11842_v44, %v11843_v23  ;;  %v6741_v30 = vmov 0.0   ;;  %v6523_v5 = vld [vmem:[%s6977_s12 + $0x20] sm:$0xff]  ;;  %s11864_s12 = sshll.u32 %s6971_s26, 6 }
 0x4ef   : > { %6323 = vmatpush1.bf16.msra.mxu0 %v6322_v62  ;;  %v6744_v41 = vmov 4   ;;  %s10883_s16 = scalar_lea.vmem [#allocation12], %s11864_s12 }
 0x4f0   : > { %v6374_v42 = vpack.c.bf16 %v4376_v14, %v4292_v61  ;;  %6325 = vmatprep.subr.bf16.mxu0 %v11839_v56  ;;  %v6372_v2 = vpack.c.bf16 %v4377_v13, %v4293_v28  ;;  %6497 = vset.pattern.permute.xlu0 %v6744_v41  ;;  %s5843_s20 = sshll.u32 %s10883_s16, 4  ;;  %s10904_s20 = int_to_ptr.vmem [resolvable:$true] %s5843_s20 }
 0x4f1   : > { %s6640_s17 = scalar_lea.vmem %s10904_s20, 1024  ;;  %p6647_p12 = scmp.lt.s32.totalorder %s10904_s20, %s6645_s8 }
 0x4f2   : > { %6373 = vmatprep.subr.bf16.mxu1 %v6372_v2  ;;  %p6641_p10 = scmp.ne.s32.totalorder %s10904_s20, %s6640_s17  ;;  %p6648_p2 = scmp.lt.s32.totalorder %s6646_s13, %s6640_s17 }
 0x4f3   : > { %6327 = vmatpush1.bf16.msra.mxu0 %v11840_v15  ;;  %6375 = vmatpush1.bf16.msra.mxu1 %v6374_v42 }
 0x4f4   : > { %6329 = vmatprep.subr.bf16.mxu0 %v11841_v10  ;;  %6377 = vmatprep.subr.bf16.mxu1 %v11844_v60  ;;  %p6642_p3 = pnand %p6641_p10, %p6926_p5  ;;  %p6649_p1 = por %p6648_p2, %p6647_p12 }
 0x4f6   : > { %p6643_p7 = pneg %p6642_p3 }
 0x4f7   : > { %6331 = vmatpush1.bf16.msra.mxu0 %v11845_v6  ;;  %6379 = vmatpush1.bf16.msra.mxu1 %v11846_v19 }
 0x4f8   : > { %6333 = vmatprep.subr.bf16.mxu0 %v11847_v29  ;;  %6381 = vmatprep.subr.bf16.mxu1 %v11850_v55  ;;  %p6650_p4 = pnand %p6649_p1, %p6643_p7 }
 0x4fb   : > { %6335 = vmatpush1.bf16.msra.mxu0 %v11851_v48  ;;  %6383 = vmatpush1.bf16.msra.mxu1 %v11852_v20 }
 0x4fc   : > { %6337 = vmatprep.subr.bf16.mxu0 %v6336_v1  ;;  %6385 = vmatprep.subr.bf16.mxu1 %v11855_v51 }
 0x4ff   : > { %6339 = vmatpush1.bf16.msra.mxu0 %v11856_v43  ;;  %6387 = vmatpush1.bf16.msra.mxu1 %v11857_v25 }
 0x500   : > { %5341 = vmatprep.subr.mxu0 %v4915_v34  ;;  %6389 = vmatprep.subr.bf16.mxu1 %v11860_v40 }
 0x503   : > { %5342 = vmatpush1.msra.mxu0 %v4914_v35  ;;  %6391 = vmatpush1.bf16.msra.mxu1 %v11862_v59 }
 0x504   : > { %5354 = vmatmul.mubr.f32.vlgmr.msra.gmra.mrb[6].mxu0 %v10338_v7  ;;  %5412 = vmatprep.subr.mxu1 %v4917_v53 }
 0x505   : > { %5440 = vmatprep.subr.mxu0 %v6517_v54  ;;  %5504 = vmatprep.mubr.f32.mxu0 %v6741_v30 }
 0x506   : > { %5441 = vmatpush1.msra.mxu0 %v6518_v27 }
 0x507   : > { %5413 = vmatpush1.msra.mxu1 %v4916_v47  ;;  %5582 = vmatprep.subr.mxu0 %v6519_v21 }
 0x508   : > { %5425 = vmatmul.mubr.f32.vlgmr.msra.gmra.mrb[6].mxu1 %v10338_v7  ;;  %5511 = vmatprep.subr.mxu1 %v6520_v33  ;;  %v6742_v7 = vmov 2  }
 0x509   : > { %5512 = vmatpush1.msra.mxu1 %v6521_v49  ;;  %5575 = vmatprep.mubr.f32.mxu1 %v6741_v30 }
 0x50a   : > { %5653 = vmatprep.subr.mxu1 %v6522_v46  ;;  %5965 = vmatmul.mubr.msk.f32.vlgmr.msra.gmra.mrb[8].mxu0 %vm5436_vm14, %v5431_v52 }
 0x50b   : > { %6496 = vset.pattern.permute.xlu1 %v6742_v7  ;;  %5583 = vmatpush1.msra.mxu0 %v6523_v5 }
 0x50c   : > { %5966 = vmatmul.mubr.msk.f32.vlgmr.msra.gmra.mrb[8].mxu1 %vm5436_vm14, %v5431_v52  ;;  %5753 = vperm.xlu1 %6496, %v6524_v0  }
 0x50d   : > { %5654 = vmatpush1.msra.mxu1 %v6525_v22  ;;  %5646 = vmatprep.mubr.f32.mxu0 %v6741_v30 }
 0x50e   : > { %5717 = vmatprep.mubr.f32.mxu1 %v6741_v30  ;;  %5967 = vmatmul.mubr.msk.f32.vlgmr.msra.gmra.mrb[10].mxu0 %vm5436_vm14, %v5431_v52 }
 0x510   : > { %5968 = vmatmul.mubr.msk.f32.vlgmr.msra.gmra.mrb[10].mxu1 %vm5436_vm14, %v5431_v52  ;;  %6498 = vset.pattern.permute.xlu1 %v6743_v4 }
 0x576   : > { %v10841_v26 = vpop.f32.mrb[4].mxu1 }
 0x577   : > { %v10843_v18 = vpop.f32.mrb[5].mxu1  ;;  %v5732_v61 = vmul.f32 %v10841_v26, %v10841_v26 }
 0x578   : > { %v5733_v42 = vmul.f32 %v10843_v18, %v10843_v18 }
 0x57c   : > { %v5213_v62 = vpop.f32.mrb[4].mxu0 }
 0x57d   : > { %v5730_v31 = vmul.f32 %v5213_v62, %v5213_v62  ;;  %v5215_v45 = vpop.f32.mrb[5].mxu0 }
 0x57e   : > { %v5724_v50 = vadd.f32 %v5215_v45, %v5213_v62  ;;  %v5731_v28 = vmul.f32 %v5215_v45, %v5215_v45 }
 0x580   : > { %v5734_v14 = vadd.f32 %v5731_v28, %v5730_v31  ;;  %v5725_v13 = vadd.f32 %v5724_v50, %v10841_v26 }
 0x582   : > { %v5735_v56 = vadd.f32 %v5734_v14, %v5732_v61  ;;  %v5726_v2 = vadd.f32 %v5725_v13, %v10843_v18 }
 0x584   : > { %5727 = vadd.xlane.f32.xlu0 %v5726_v2  ;;  %v5736_v37 = vadd.f32 %v5735_v56, %v5733_v42 }
 0x588   : > { %5737 = vadd.xlane.f32.xlu0 %v5736_v37 }
 0x58b   : > { %v5754_v35 = vpop.permute.xlu1 %5753 }
 0x5d7   : > { %v10851_v15 = vpop.f32.mrb[6].mxu0 }
 0x5d8   : > { %v5786_v36 = vmul.f32 %v10851_v15, %v10851_v15  ;;  %v10855_v10 = vpop.f32.mrb[7].mxu0 }
 0x5d9   : > { %v5780_v44 = vadd.f32 %v10855_v10, %v10851_v15  ;;  %v5787_v23 = vmul.f32 %v10855_v10, %v10855_v10 }
 0x5db   : > { %v5790_v60 = vadd.f32 %v5787_v23, %v5786_v36  ;;  %v10861_v32 = vpop.f32.mrb[6].mxu1 }
 0x5dc   : > { %v5781_v6 = vadd.f32 %v5780_v44, %v10861_v32  ;;  %v5788_v19 = vmul.f32 %v10861_v32, %v10861_v32  ;;  %v10866_v38 = vpop.f32.mrb[7].mxu1 }
 0x5dd   : > { %v5789_v29 = vmul.f32 %v10866_v38, %v10866_v38  ;;  %v5506_v8 = vpop.f32.mrb[8].mxu0 }
 0x5de   : > { %v5791_v12 = vadd.f32 %v5790_v60, %v5788_v19  ;;  %v5782_v57 = vadd.f32 %v5781_v6, %v10866_v38  ;;  %v5508_v48 = vpop.f32.mrb[9].mxu0 }
 0x5df   : > { %v5577_v1 = vpop.f32.mrb[8].mxu1 }
 0x5e0   : > { %5783 = vadd.xlane.f32.xlu1 %v5782_v57  ;;  %v5792_v55 = vadd.f32 %v5791_v12, %v5789_v29  ;;  %v5579_v20 = vpop.f32.mrb[9].mxu1 }
 0x5e1   : > { %v10871_v16 = vpop.f32.mrb[10].mxu0 }
 0x5e2   : > { %5793 = vadd.xlane.f32.xlu0 %v5792_v55  ;;  %v10875_v51 = vpop.f32.mrb[11].mxu0 }
 0x5e3   : > { %v10873_v17 = vpop.f32.mrb[10].mxu1 }
 0x5e4   : > { %v10877_v63 = vpop.f32.mrb[11].mxu1 }
 0x5f1   : > { %5761 = vperm.xlu1 %6498, %v6524_v0  }
 0x5f8   : > { %5433 = vperm.xlu0 %6497, %v6524_v0  }
 0x5fc   : > { %6499 = vset.pattern.permute.xlu0 %v6743_v4 }
 0x611   : > { %v5728_v11 = vpop.xlane.xlu0 %5727 }
 0x612   : > { %v5729_v43 = vmul.f32 0.001953125, %v5728_v11 }
 0x614   : > { %v5740_v25 = vmul.f32 %v5729_v43, %v5729_v43  ;;  %v5744_v59 = vsub.f32 %v5213_v62, %v5729_v43  ;;  %v5745_v39 = vsub.f32 %v5215_v45, %v5729_v43  ;;  %v5746_v47 = vsub.f32 %v10841_v26, %v5729_v43 }
 0x615   : > { %v5738_v34 = vpop.xlane.xlu0 %5737  ;;  %v5747_v54 = vsub.f32 %v10843_v18, %v5729_v43 }
 0x616   : > { %v5739_v58 = vmul.f32 0.001953125, %v5738_v34 }
 0x618   : > { %v5741_v3 = vsub.f32 %v5739_v58, %v5740_v25 }
 0x61a   : > { %v5742_v40 = vadd.f32 1e-05, %v5741_v3 }
 0x61c   : > { %6504 = vrsqrt.f32 %v5742_v40 }
 0x626   : > { %v6505_v24 = vpop.eup %6504 }
 0x627   : > { %v5748_v49 = vmul.f32 %v6505_v24, %v5744_v59  ;;  %v5749_v52 = vmul.f32 %v6505_v24, %v5745_v39  ;;  %v5750_v46 = vmul.f32 %v6505_v24, %v5746_v47  ;;  %v5751_v30 = vmul.f32 %v6505_v24, %v5747_v54 }
 0x629   : > { %v5756_v22 = vmul.f32 %v5754_v35, %v5748_v49  ;;  %v5757_v4 = vmul.f32 %v5754_v35, %v5749_v52  ;;  %v5758_v41 = vmul.f32 %v5754_v35, %v5750_v46  ;;  %v5759_v31 = vmul.f32 %v5754_v35, %v5751_v30 }
 0x66d   : > { %v5784_v9 = vpop.xlane.xlu1 %5783 }
 0x66e   : > { %v5785_v53 = vmul.f32 0.001953125, %v5784_v9 }
 0x66f   : > { %v5794_v27 = vpop.xlane.xlu0 %5793 }
 0x670   : > { %v5796_v21 = vmul.f32 %v5785_v53, %v5785_v53  ;;  %v5795_v33 = vmul.f32 0.001953125, %v5794_v27  ;;  %v5800_v6 = vsub.f32 %v10851_v15, %v5785_v53  ;;  %v5802_v19 = vsub.f32 %v10861_v32, %v5785_v53 }
 0x671   : > { %v5762_v0 = vpop.permute.xlu1 %5761  ;;  %v5801_v29 = vsub.f32 %v10855_v10, %v5785_v53  ;;  %v5803_v12 = vsub.f32 %v10866_v38, %v5785_v53 }
 0x672   : > { %v5797_v7 = vsub.f32 %v5795_v33, %v5796_v21  ;;  %v5764_v62 = vadd.f32 %v5762_v0, %v5756_v22  ;;  %v5765_v45 = vadd.f32 %v5762_v0, %v5757_v4  ;;  %v5766_v26 = vadd.f32 %v5762_v0, %v5758_v41 }
 0x673   : > { %v5767_v18 = vadd.f32 %v5762_v0, %v5759_v31 }
 0x674   : > { %v5798_v5 = vadd.f32 1e-05, %v5797_v7 }
 0x676   : > { %6506 = vrsqrt.f32 %v5798_v5 }
 0x677   : > { %v5434_v50 = vpop.permute.xlu0 %5433 }
 0x678   : > { %v5507_v28 = vadd.f32 %v5506_v8, %v5434_v50  ;;  %v5509_v61 = vadd.f32 %v5508_v48, %v5434_v50  ;;  %v5578_v14 = vadd.f32 %v5577_v1, %v5434_v50  ;;  %v5580_v13 = vadd.f32 %v5579_v20, %v5434_v50 }
 0x679   : > { %v5649_v20 = vadd.f32 %v10871_v16, %v5434_v50  ;;  %v5720_v11 = vadd.f32 %v10873_v17, %v5434_v50  ;;  %v5651_v34 = vadd.f32 %v10875_v51, %v5434_v50  ;;  %v5722_v15 = vadd.f32 %v10877_v63, %v5434_v50 }
 0x67a   : > { %v5768_v42 = vadd.f32 %v5764_v62, %v5507_v28  ;;  %v5769_v56 = vadd.f32 %v5765_v45, %v5509_v61  ;;  %v5770_v2 = vadd.f32 %v5766_v26, %v5578_v14  ;;  %v5771_v37 = vadd.f32 %v5767_v18, %v5580_v13 }
 0x67c   : > { %v5772_v36 = vmax.f32 %v5768_v42, 0.0  ;;  %v5773_v44 = vmax.f32 %v5769_v56, 0.0  ;;  %v5774_v23 = vmax.f32 %v5770_v2, 0.0  ;;  %v5775_v60 = vmax.f32 %v5771_v37, 0.0 }
 0x67e   : > { %5776 = vst [vmem:[%s10883_s16] sm:$0xff] %v5772_v36  ;;  %5777 = vst [vmem:[%s10883_s16 + $0x8] sm:$0xff] %v5773_v44 }
 0x67f   : > { %5778 = vst [vmem:[%s10883_s16 + $0x10] sm:$0xff] %v5774_v23  ;;  %5779 = vst [vmem:[%s10883_s16 + $0x18] sm:$0xff] %v5775_v60 }
 0x680   : > { %v6507_v57 = vpop.eup %6506 }
 0x681   : > { %v5804_v55 = vmul.f32 %v6507_v57, %v5800_v6  ;;  %v5806_v8 = vmul.f32 %v6507_v57, %v5802_v19  ;;  %v5805_v1 = vmul.f32 %v6507_v57, %v5801_v29  ;;  %v5807_v48 = vmul.f32 %v6507_v57, %v5803_v12 }
 0x683   : > { %v5808_v32 = vmul.f32 %v5804_v55, %v5754_v35  ;;  %v5810_v43 = vmul.f32 %v5806_v8, %v5754_v35  ;;  %v5809_v10 = vmul.f32 %v5805_v1, %v5754_v35  ;;  %v5811_v25 = vmul.f32 %v5807_v48, %v5754_v35 }
 0x685   : > { %v5812_v38 = vadd.f32 %v5808_v32, %v5762_v0  ;;  %v5814_v58 = vadd.f32 %v5810_v43, %v5762_v0  ;;  %v5813_v3 = vadd.f32 %v5809_v10, %v5762_v0  ;;  %v5815_v40 = vadd.f32 %v5811_v25, %v5762_v0 }
 0x687   : > { %v5816_v16 = vadd.f32 %v5812_v38, %v5649_v20  ;;  %v5818_v17 = vadd.f32 %v5814_v58, %v5720_v11  ;;  %v5817_v51 = vadd.f32 %v5813_v3, %v5651_v34  ;;  %v5819_v63 = vadd.f32 %v5815_v40, %v5722_v15 }
 0x689   : > { %v5820_v9 = vmax.f32 %v5816_v16, 0.0  ;;  %v5822_v24 = vmax.f32 %v5818_v17, 0.0  ;;  %v5821_v53 = vmax.f32 %v5817_v51, 0.0  ;;  %v5823_v35 = vmax.f32 %v5819_v63, 0.0 }
 0x68b   : > { %5824 = vst [vmem:[%s10883_s16 + $0x20] sm:$0xff] %v5820_v9  ;;  %5826 = vst [vmem:[%s10883_s16 + $0x30] sm:$0xff] %v5822_v24 }
 0x68c   : > { %5825 = vst [vmem:[%s10883_s16 + $0x28] sm:$0xff] %v5821_v53  ;;  %5827 = vst [vmem:[%s10883_s16 + $0x38] sm:$0xff] %v5823_v35 }
 0x68d   : > { %6653 = shalt.err (!%p6650_p4)
}
 0x68e   : > { %s6654_s26 = scalar_lea.hbm %s10902_s15, 1024  ;;  %s6658_s1 = scalar_lea.hbm %s10956_s6, 2048 }
 0x68f   : > { %p6655_p0 = scmp.ne.s32.totalorder %s10902_s15, %s6654_s26  ;;  %p6659_p8 = scmp.lt.u32.totalorder %s10902_s15, %s10956_s6 }
 0x690   : > { %p6660_p13 = scmp.lt.u32.totalorder %s6658_s1, %s6654_s26  ;;  %p6662_p10 = scmp.lt.u32.totalorder %s6654_s26, %s10902_s15 }
 0x691   : > { %p6656_p9 = pnand %p6655_p0, %p6926_p5 }
 0x692   : > { %p6661_p6 = por %p6660_p13, %p6659_p8 }
 0x693   : > { %p6657_p11 = pneg %p6656_p9 }
 0x694   : > { %p6663_p3 = por %p6662_p10, %p6661_p6 }
 0x696   : > { %p6664_p7 = pnand %p6663_p3, %p6657_p11 }
 0x698   : > { %6667 = shalt.err (!%p6664_p7)
}
 0x699   : > { %6406 = dma.vmem_to_hbm [thread:$0]  (%p6926_p5), %s10904_s20, 1024, %s10902_s15, %s5829_s25  }
 0x69a PF: > { %s5855_s12 = sand.u32 1, %s6702_s21   ;;  %p11865_p12 = scmp.ne.s32.totalorder %s11224_s28, 0 }
 0x69b   : > { %p11866_p2 = scmp.ge.s32.totalorder %s6714_s24, 2  ;;  %s5856_s16 = scalar_lea.sflag [#allocation6], %s5855_s12 }
 0x69d   : > { %p6423_p1 = pnand %p11866_p2, %p11865_p12 }
 0x69f   : > { %6697 = dma.done.wait (!%p6423_p1), %s5856_s16, 1024  }
 0x6a0   : > { %6699 = vsyncadd (!%p6423_p1), %s5856_s16, 4294966272  ;;  %p21_p4 = scmp.ge.s32.totalorder %s6912_s18, 4   ;;  %s11867_s21 = smov %s6706_s22 }
 0x6a1   : > { %s11868_s22 = smov %s6710_s23  ;;  %s11869_s23 = smov %s6922_s30 }
 0x6a2   : > { %s11870_s24 = smov %s6912_s18  ;;  %23 = sbr.rel (!%p21_p4) target bundleno = 10 (0xa), region = 126 }
 0x6a9   :  { %5861 = vsyncpa [#allocation5], 1 }
 0x6aa   :  { %5863 = vsyncpa [#allocation5 + $0x1], 1 }
 0x6ab   :  { %5864 = vsyncpa [#allocation8], 1 }
 0x6ac   :  { %5865 = vsyncpa [#allocation11], 1 }
 0x6ad   :  { %5866 = vsyncpa [#allocation6], 1 }
 0x6ae   :  { %5868 = vsyncpa [#allocation6 + $0x1], 1 }

</bundles_post_ra>
